<compile_context>
chip_gen: v6e
topology: v6e:2x2x1
jax: 0.10.0
libtpu: 0.0.40
codegen_flags: <defaults>
</compile_context>

<pallas_src>
import functools
import math

import jax
import jax.numpy as jnp
from jax.experimental import pallas as pl
from jax.experimental.pallas import tpu as pltpu

_EPS = 1e-5
_LANE = 128
# Comfortably below physical VMEM on every generation (v7x: 64 MiB).
_VMEM_LIMIT = 48 * 1024 * 1024


def _round_up(x, m):
    return (x + m - 1) // m * m


def _pick_tile(dim, candidates):
    for c in candidates:
        if dim % c == 0:
            return c
    return dim


# ----------------------------------------------------------------------------
# Kernel 1: fused matmul  out = act((X @ W) * scale + shift)   (classifier)
# ----------------------------------------------------------------------------
def _fused_matmul_kernel(x_ref, w_ref, scale_ref, shift_ref, o_ref, acc_ref,
                         *, apply_relu, apply_scale):
    @pl.when(pl.program_id(2) == 0)
    def _():
        acc_ref[...] = jnp.zeros_like(acc_ref)

    acc_ref[...] += jnp.dot(x_ref[...], w_ref[...],
                            preferred_element_type=jnp.float32)

    @pl.when(pl.program_id(2) == pl.num_programs(2) - 1)
    def _():
        y = acc_ref[...]
        if apply_scale:                      # folded BatchNorm scale
            y = y * scale_ref[...]
        y = y + shift_ref[...]               # folded bias / BN shift
        if apply_relu:
            y = jnp.maximum(y, 0.0)
        o_ref[...] = y.astype(o_ref.dtype)


def fused_matmul(x, w_pad, scale_pad, shift_pad, *, n_out, apply_relu,
                 apply_scale, out_dtype):
    """act((x @ w) * scale + shift); w/scale/shift are pre-padded at init."""
    M, K = x.shape
    Kp, Np = w_pad.shape
    assert Kp >= K and Kp % _LANE == 0 and Np % _LANE == 0

    # bf16 operands -> M tiles must be multiples of 16 (bf16 sublane tile).
    Mp = _round_up(max(M, 16), 16)
    xb = x.astype(jnp.bfloat16)
    if (Mp, Kp) != (M, K):
        xb = jnp.zeros((Mp, Kp), jnp.bfloat16).at[:M, :K].set(xb)

    tm = Mp if Mp <= 256 else _pick_tile(Mp, (256, 128, 64, 32, 16))
    tk = _pick_tile(Kp, (512, 256, 128))
    # Keep >= 2 blocks along N when possible so both v7x TensorCores get work.
    tn = _LANE
    for cand in (512, 256, 128):
        if Np % cand == 0 and Np // cand >= 2:
            tn = cand
            break
    if Np < 2 * _LANE:
        tn = Np

    kernel = functools.partial(_fused_matmul_kernel, apply_relu=apply_relu,
                               apply_scale=apply_scale)
    out = pl.pallas_call(
        kernel,
        out_shape=jax.ShapeDtypeStruct((Mp, Np), out_dtype),
        grid_spec=pltpu.PrefetchScalarGridSpec(
            num_scalar_prefetch=0,
            grid=(Mp // tm, Np // tn, Kp // tk),
            in_specs=[
                pl.BlockSpec((tm, tk), lambda i, j, k: (i, k)),
                pl.BlockSpec((tk, tn), lambda i, j, k: (k, j)),
                pl.BlockSpec((1, tn), lambda i, j, k: (0, j)),
                pl.BlockSpec((1, tn), lambda i, j, k: (0, j)),
            ],
            out_specs=pl.BlockSpec((tm, tn), lambda i, j, k: (i, j)),
            scratch_shapes=[pltpu.VMEM((tm, tn), jnp.float32)],
        ),
        compiler_params=pltpu.CompilerParams(
            dimension_semantics=("parallel", "parallel", "arbitrary"),
            vmem_limit_bytes=_VMEM_LIMIT),
    )(xb, w_pad, scale_pad, shift_pad)
    return out[:M, :n_out]


# ----------------------------------------------------------------------------
# Kernel 2: fused 3x3 conv (pad=1) + BatchNorm (eval) + ReLU, no im2col
# ----------------------------------------------------------------------------
def _conv_bn_relu_kernel(x_ref, w_ref, scale_ref, shift_ref, o_ref, acc_ref,
                         *, H, W):
    # x_ref : (1, rows_pad, Cin)   zero-padded image, flattened row-major (H,W)
    # w_ref : (9, Cin, Cout)       3x3 taps of the conv weight
    # o_ref : (1, H*(W+2), Cout)   conv output incl. 2 junk columns per row
    Wp = W + 2
    L = H * Wp
    acc_ref[...] = jnp.zeros_like(acc_ref)
    for tap in range(9):
        di, dj = divmod(tap, 3)
        start = di * Wp + dj
        # Shifted window of the single in-VMEM image copy: the element at
        # local row h*Wp + w is the padded pixel (h+di, w+dj), so all 9 tap
        # matmuls accumulate into aligned positions.  Columns w in {W, W+1}
        # are junk and are sliced away in the wrapper.
        xs = x_ref[0, start:start + L, :]
        acc_ref[...] += jnp.dot(xs, w_ref[tap],
                                preferred_element_type=jnp.float32)
    y = acc_ref[...] * scale_ref[...] + shift_ref[...]
    o_ref[0, :, :] = jnp.maximum(y, 0.0).astype(o_ref.dtype)


def conv3x3_bn_relu(x_nhwc, w9, scale, shift):
    """Conv2d(3x3, pad=1) + folded eval-mode BatchNorm + ReLU, one Pallas call."""
    B, H, W, Cin = x_nhwc.shape
    Cin_pad, Cout = w9.shape[1], w9.shape[2]
    Wp = W + 2
    rows = (H + 2) * Wp
    rows_pad = _round_up(rows + 2, 8)     # +2: tap (2,2) window overrun rows
    L = H * Wp

    xp = jnp.pad(x_nhwc.astype(jnp.bfloat16),
                 ((0, 0), (1, 1), (1, 1), (0, Cin_pad - Cin)))
    x2 = xp.reshape(B, rows, Cin_pad)
    if rows_pad != rows:
        x2 = jnp.pad(x2, ((0, 0), (0, rows_pad - rows), (0, 0)))

    kernel = functools.partial(_conv_bn_relu_kernel, H=H, W=W)
    out = pl.pallas_call(
        kernel,
        out_shape=jax.ShapeDtypeStruct((B, L, Cout), jnp.bfloat16),
        grid_spec=pltpu.PrefetchScalarGridSpec(
            num_scalar_prefetch=0,
            grid=(B,),
            in_specs=[
                pl.BlockSpec((1, rows_pad, Cin_pad), lambda b: (b, 0, 0)),
                pl.BlockSpec((9, Cin_pad, Cout), lambda b: (0, 0, 0)),
                pl.BlockSpec((1, Cout), lambda b: (0, 0)),
                pl.BlockSpec((1, Cout), lambda b: (0, 0)),
            ],
            out_specs=pl.BlockSpec((1, L, Cout), lambda b: (b, 0, 0)),
            scratch_shapes=[pltpu.VMEM((L, Cout), jnp.float32)],
        ),
        compiler_params=pltpu.CompilerParams(
            dimension_semantics=("parallel",),
            vmem_limit_bytes=_VMEM_LIMIT),
    )(x2, w9, scale, shift)
    # Drop the 2 junk columns per row; XLA fuses this slice with the pool.
    return out.reshape(B, H, Wp, Cout)[:, :, :W, :]


def maxpool2x2(x_nhwc):
    # glue: 2x2/stride-2 max-pool (not the hot path here)
    B, H, W, C = x_nhwc.shape
    return jnp.max(x_nhwc.reshape(B, H // 2, 2, W // 2, 2, C), axis=(2, 4))


# ----------------------------------------------------------------------------
# Parameters (mirrors _initialize_weights; BN folded + weights padded at init)
# ----------------------------------------------------------------------------
def make_params(key, cfg, num_classes):
    params = {"conv": [], "fc": []}

    c_in = cfg["in_ch"]
    for c_out in cfg["conv_channels"]:
        key, k = jax.random.split(key)
        n = 3 * 3 * c_out
        w = (jax.random.normal(k, (c_out, c_in, 3, 3), jnp.float32)
             * math.sqrt(2.0 / n))
        bias = jnp.zeros((c_out,), jnp.float32)
        gamma = jnp.ones((c_out,), jnp.float32)
        beta = jnp.zeros((c_out,), jnp.float32)
        mean = jnp.zeros((c_out,), jnp.float32)
        var = jnp.ones((c_out,), jnp.float32)
        s = gamma / jnp.sqrt(var + _EPS)          # fold bias + eval BN
        scale = s.reshape(1, c_out)
        shift = ((bias - mean) * s + beta).reshape(1, c_out)
        # (Cout,Cin,3,3) -> (3,3,Cin,Cout) -> (9,Cin,Cout), lane-padded, bf16
        c_in_pad = _round_up(c_in, _LANE)
        w9 = jnp.transpose(w, (2, 3, 1, 0)).reshape(9, c_in, c_out)
        w9 = jnp.pad(w9, ((0, 0), (0, c_in_pad - c_in), (0, 0)))
        params["conv"].append(dict(w9=w9.astype(jnp.bfloat16),
                                   scale=scale, shift=shift))
        c_in = c_out

    feat = cfg["conv_channels"][-1] * cfg["final_spatial"] ** 2
    dims = [feat, cfg["hidden"], cfg["hidden"], num_classes]
    for idx in range(3):
        key, k = jax.random.split(key)
        d_in, d_out = dims[idx], dims[idx + 1]
        w = jax.random.normal(k, (d_out, d_in), jnp.float32) * 0.01
        bias = jnp.zeros((d_out,), jnp.float32)
        if idx < 2:   # Linear + BatchNorm1d (eval) + ReLU
            gamma = jnp.ones((d_out,), jnp.float32)
            beta = jnp.zeros((d_out,), jnp.float32)
            mean = jnp.zeros((d_out,), jnp.float32)
            var = jnp.ones((d_out,), jnp.float32)
            s = gamma / jnp.sqrt(var + _EPS)
            scale = s
            shift = (bias - mean) * s + beta
        else:         # final plain Linear
            scale = jnp.ones((d_out,), jnp.float32)
            shift = bias
        kp, npad = _round_up(d_in, _LANE), _round_up(d_out, _LANE)
        w_kn = jnp.zeros((kp, npad), jnp.float32).at[:d_in, :d_out].set(w.T)
        sc = jnp.zeros((1, npad), jnp.float32).at[0, :d_out].set(scale)
        sh = jnp.zeros((1, npad), jnp.float32).at[0, :d_out].set(shift)
        params["fc"].append(dict(w=w_kn.astype(jnp.bfloat16),
                                 scale=sc, shift=sh, n_out=d_out))
    return params


# ----------------------------------------------------------------------------
# VGG_imagenet forward (eval mode)
# ----------------------------------------------------------------------------
def vgg_forward(params, x_nchw):
    # PyTorch NCHW -> NHWC (channels on the TPU lane axis), bf16 activations.
    x = jnp.transpose(x_nchw, (0, 2, 3, 1)).astype(jnp.bfloat16)

    # features: [Conv3x3-BN-ReLU, MaxPool2x2] per stage
    for layer in params["conv"]:
        x = conv3x3_bn_relu(x, layer["w9"], layer["scale"], layer["shift"])
        x = maxpool2x2(x)

    # x.view(B, -1) in PyTorch flattens NCHW -> (B, C*H*W)
    x = jnp.transpose(x, (0, 3, 1, 2)).reshape(x.shape[0], -1)

    # classifier: Linear-BN-ReLU-Dropout, Linear-BN-ReLU-Dropout, Linear
    # (Dropout is the eval-mode identity.)
    n_fc = len(params["fc"])
    for i, layer in enumerate(params["fc"]):
        last = (i == n_fc - 1)
        x = fused_matmul(x, layer["w"], layer["scale"], layer["shift"],
                         n_out=layer["n_out"],
                         apply_relu=not last, apply_scale=not last,
                         out_dtype=jnp.float32 if last else jnp.bfloat16)
    return x


if __name__ == "__main__":
    cfg = {
        "in_ch": 3,
        "conv_channels": (128, 128),  # reduced stand-in for the VGG stack
        "final_spatial": 4,           # 16 -> pool -> 8 -> pool -> 4
        "hidden": 256,                # reduced stand-in for 4096
    }
    num_classes = 10

    key = jax.random.PRNGKey(0)
    key, kx = jax.random.split(key)
    x = jax.random.normal(kx, (2, 3, 16, 16), jnp.float32)  # NCHW like PyTorch

    params = make_params(key, cfg, num_classes)
    out = vgg_forward(params, x)
    out = jax.block_until_ready(out)
    assert out.shape == (2, num_classes), out.shape
    assert bool(jnp.all(jnp.isfinite(out)))
    print("KERNEL_OK")
</pallas_src>

<mosaic_0001>
module attributes {stable_mosaic.version = 11 : i64} {
  func.func @_conv_bn_relu_kernel(%arg0: i32, %arg1: memref<1x328x128xbf16, #tpu.memory_space<vmem>>, %arg2: memref<9x128x128xbf16, #tpu.memory_space<vmem>>, %arg3: memref<1x128xf32, #tpu.memory_space<vmem>>, %arg4: memref<1x128xf32, #tpu.memory_space<vmem>>, %arg5: memref<1x288x128xbf16, #tpu.memory_space<vmem>>, %arg6: memref<288x128xf32, #tpu.memory_space<vmem>>) attributes {dimension_semantics = [#tpu.dimension_semantics<parallel>], iteration_bounds = array<i64: 2>, scalar_prefetch = 0 : i64, scratch_operands = 1 : i64, tpu.core_type = #tpu.core_type<tc>, window_params = [{transform_indices = @transform_0, window_bounds = array<i64: 1, 328, 128>}, {pipeline_mode = #tpu.pipeline_mode<synchronous>, transform_indices = @transform_1, window_bounds = array<i64: 9, 128, 128>}, {pipeline_mode = #tpu.pipeline_mode<synchronous>, transform_indices = @transform_2, window_bounds = array<i64: 1, 128>}, {pipeline_mode = #tpu.pipeline_mode<synchronous>, transform_indices = @transform_3, window_bounds = array<i64: 1, 128>}, {transform_indices = @transform_4, window_bounds = array<i64: 1, 288, 128>}]} {
    %cst = arith.constant 0.000000e+00 : f32
    %0 = vector.broadcast %cst : f32 to vector<288x128xf32>
    %c0 = arith.constant 0 : index
    %c0_0 = arith.constant 0 : index
    %1 = vector.load %arg6[%c0, %c0_0] : memref<288x128xf32, #tpu.memory_space<vmem>>, vector<288x128xf32>
    tpu.vector_store %arg6[%c0, %c0_0], %0 {strides = array<i32>} : memref<288x128xf32, #tpu.memory_space<vmem>>, vector<288x128xf32>,
    %c0_1 = arith.constant 0 : index
    %c0_2 = arith.constant 0 : index
    %c0_3 = arith.constant 0 : index
    %2 = vector.load %arg1[%c0_1, %c0_2, %c0_3] : memref<1x328x128xbf16, #tpu.memory_space<vmem>>, vector<1x288x128xbf16>
    %3 = vector.shape_cast %2 : vector<1x288x128xbf16> to vector<288x128xbf16>
    %c0_4 = arith.constant 0 : index
    %c0_5 = arith.constant 0 : index
    %4 = vector.load %arg6[%c0_4, %c0_5] : memref<288x128xf32, #tpu.memory_space<vmem>>, vector<288x128xf32>
    %c0_6 = arith.constant 0 : index
    %c0_7 = arith.constant 0 : index
    %c0_8 = arith.constant 0 : index
    %5 = vector.load %arg2[%c0_6, %c0_7, %c0_8] : memref<9x128x128xbf16, #tpu.memory_space<vmem>>, vector<1x128x128xbf16>
    %6 = vector.shape_cast %5 : vector<1x128x128xbf16> to vector<128x128xbf16>
    %cst_9 = arith.constant dense<0.000000e+00> : vector<288x128xf32>
    %7 = tpu.matmul %3, %6, %cst_9 {dimension_numbers = #tpu.dot_dimension_numbers<[1], [0], [0], [1], [0, 0, 1, 1], [], []>} : vector<288x128xbf16>, vector<128x128xbf16>, vector<288x128xf32> -> vector<288x128xf32>
    %8 = arith.addf %4, %7 : vector<288x128xf32>
    %c0_10 = arith.constant 0 : index
    %c0_11 = arith.constant 0 : index
    %9 = vector.load %arg6[%c0_10, %c0_11] : memref<288x128xf32, #tpu.memory_space<vmem>>, vector<288x128xf32>
    tpu.vector_store %arg6[%c0_10, %c0_11], %8 {strides = array<i32>} : memref<288x128xf32, #tpu.memory_space<vmem>>, vector<288x128xf32>,
    %c0_12 = arith.constant 0 : index
    %c1 = arith.constant 1 : index
    %c0_13 = arith.constant 0 : index
    %10 = vector.load %arg1[%c0_12, %c1, %c0_13] : memref<1x328x128xbf16, #tpu.memory_space<vmem>>, vector<1x288x128xbf16>
    %11 = vector.shape_cast %10 : vector<1x288x128xbf16> to vector<288x128xbf16>
    %c0_14 = arith.constant 0 : index
    %c0_15 = arith.constant 0 : index
    %12 = vector.load %arg6[%c0_14, %c0_15] : memref<288x128xf32, #tpu.memory_space<vmem>>, vector<288x128xf32>
    %c1_16 = arith.constant 1 : index
    %c0_17 = arith.constant 0 : index
    %c0_18 = arith.constant 0 : index
    %13 = vector.load %arg2[%c1_16, %c0_17, %c0_18] : memref<9x128x128xbf16, #tpu.memory_space<vmem>>, vector<1x128x128xbf16>
    %14 = vector.shape_cast %13 : vector<1x128x128xbf16> to vector<128x128xbf16>
    %cst_19 = arith.constant dense<0.000000e+00> : vector<288x128xf32>
    %15 = tpu.matmul %11, %14, %cst_19 {dimension_numbers = #tpu.dot_dimension_numbers<[1], [0], [0], [1], [0, 0, 1, 1], [], []>} : vector<288x128xbf16>, vector<128x128xbf16>, vector<288x128xf32> -> vector<288x128xf32>
    %16 = arith.addf %12, %15 : vector<288x128xf32>
    %c0_20 = arith.constant 0 : index
    %c0_21 = arith.constant 0 : index
    %17 = vector.load %arg6[%c0_20, %c0_21] : memref<288x128xf32, #tpu.memory_space<vmem>>, vector<288x128xf32>
    tpu.vector_store %arg6[%c0_20, %c0_21], %16 {strides = array<i32>} : memref<288x128xf32, #tpu.memory_space<vmem>>, vector<288x128xf32>,
    %c0_22 = arith.constant 0 : index
    %c2 = arith.constant 2 : index
    %c0_23 = arith.constant 0 : index
    %18 = vector.load %arg1[%c0_22, %c2, %c0_23] : memref<1x328x128xbf16, #tpu.memory_space<vmem>>, vector<1x288x128xbf16>
    %19 = vector.shape_cast %18 : vector<1x288x128xbf16> to vector<288x128xbf16>
    %c0_24 = arith.constant 0 : index
    %c0_25 = arith.constant 0 : index
    %20 = vector.load %arg6[%c0_24, %c0_25] : memref<288x128xf32, #tpu.memory_space<vmem>>, vector<288x128xf32>
    %c2_26 = arith.constant 2 : index
    %c0_27 = arith.constant 0 : index
    %c0_28 = arith.constant 0 : index
    %21 = vector.load %arg2[%c2_26, %c0_27, %c0_28] : memref<9x128x128xbf16, #tpu.memory_space<vmem>>, vector<1x128x128xbf16>
    %22 = vector.shape_cast %21 : vector<1x128x128xbf16> to vector<128x128xbf16>
    %cst_29 = arith.constant dense<0.000000e+00> : vector<288x128xf32>
    %23 = tpu.matmul %19, %22, %cst_29 {dimension_numbers = #tpu.dot_dimension_numbers<[1], [0], [0], [1], [0, 0, 1, 1], [], []>} : vector<288x128xbf16>, vector<128x128xbf16>, vector<288x128xf32> -> vector<288x128xf32>
    %24 = arith.addf %20, %23 : vector<288x128xf32>
    %c0_30 = arith.constant 0 : index
    %c0_31 = arith.constant 0 : index
    %25 = vector.load %arg6[%c0_30, %c0_31] : memref<288x128xf32, #tpu.memory_space<vmem>>, vector<288x128xf32>
    tpu.vector_store %arg6[%c0_30, %c0_31], %24 {strides = array<i32>} : memref<288x128xf32, #tpu.memory_space<vmem>>, vector<288x128xf32>,
    %c0_32 = arith.constant 0 : index
    %c18 = arith.constant 18 : index
    %c0_33 = arith.constant 0 : index
    %26 = vector.load %arg1[%c0_32, %c18, %c0_33] : memref<1x328x128xbf16, #tpu.memory_space<vmem>>, vector<1x288x128xbf16>
    %27 = vector.shape_cast %26 : vector<1x288x128xbf16> to vector<288x128xbf16>
    %c0_34 = arith.constant 0 : index
    %c0_35 = arith.constant 0 : index
    %28 = vector.load %arg6[%c0_34, %c0_35] : memref<288x128xf32, #tpu.memory_space<vmem>>, vector<288x128xf32>
    %c3 = arith.constant 3 : index
    %c0_36 = arith.constant 0 : index
    %c0_37 = arith.constant 0 : index
    %29 = vector.load %arg2[%c3, %c0_36, %c0_37] : memref<9x128x128xbf16, #tpu.memory_space<vmem>>, vector<1x128x128xbf16>
    %30 = vector.shape_cast %29 : vector<1x128x128xbf16> to vector<128x128xbf16>
    %cst_38 = arith.constant dense<0.000000e+00> : vector<288x128xf32>
    %31 = tpu.matmul %27, %30, %cst_38 {dimension_numbers = #tpu.dot_dimension_numbers<[1], [0], [0], [1], [0, 0, 1, 1], [], []>} : vector<288x128xbf16>, vector<128x128xbf16>, vector<288x128xf32> -> vector<288x128xf32>
    %32 = arith.addf %28, %31 : vector<288x128xf32>
    %c0_39 = arith.constant 0 : index
    %c0_40 = arith.constant 0 : index
    %33 = vector.load %arg6[%c0_39, %c0_40] : memref<288x128xf32, #tpu.memory_space<vmem>>, vector<288x128xf32>
    tpu.vector_store %arg6[%c0_39, %c0_40], %32 {strides = array<i32>} : memref<288x128xf32, #tpu.memory_space<vmem>>, vector<288x128xf32>,
    %c0_41 = arith.constant 0 : index
    %c19 = arith.constant 19 : index
    %c0_42 = arith.constant 0 : index
    %34 = vector.load %arg1[%c0_41, %c19, %c0_42] : memref<1x328x128xbf16, #tpu.memory_space<vmem>>, vector<1x288x128xbf16>
    %35 = vector.shape_cast %34 : vector<1x288x128xbf16> to vector<288x128xbf16>
    %c0_43 = arith.constant 0 : index
    %c0_44 = arith.constant 0 : index
    %36 = vector.load %arg6[%c0_43, %c0_44] : memref<288x128xf32, #tpu.memory_space<vmem>>, vector<288x128xf32>
    %c4 = arith.constant 4 : index
    %c0_45 = arith.constant 0 : index
    %c0_46 = arith.constant 0 : index
    %37 = vector.load %arg2[%c4, %c0_45, %c0_46] : memref<9x128x128xbf16, #tpu.memory_space<vmem>>, vector<1x128x128xbf16>
    %38 = vector.shape_cast %37 : vector<1x128x128xbf16> to vector<128x128xbf16>
    %cst_47 = arith.constant dense<0.000000e+00> : vector<288x128xf32>
    %39 = tpu.matmul %35, %38, %cst_47 {dimension_numbers = #tpu.dot_dimension_numbers<[1], [0], [0], [1], [0, 0, 1, 1], [], []>} : vector<288x128xbf16>, vector<128x128xbf16>, vector<288x128xf32> -> vector<288x128xf32>
    %40 = arith.addf %36, %39 : vector<288x128xf32>
    %c0_48 = arith.constant 0 : index
    %c0_49 = arith.constant 0 : index
    %41 = vector.load %arg6[%c0_48, %c0_49] : memref<288x128xf32, #tpu.memory_space<vmem>>, vector<288x128xf32>
    tpu.vector_store %arg6[%c0_48, %c0_49], %40 {strides = array<i32>} : memref<288x128xf32, #tpu.memory_space<vmem>>, vector<288x128xf32>,
    %c0_50 = arith.constant 0 : index
    %c20 = arith.constant 20 : index
    %c0_51 = arith.constant 0 : index
    %42 = vector.load %arg1[%c0_50, %c20, %c0_51] : memref<1x328x128xbf16, #tpu.memory_space<vmem>>, vector<1x288x128xbf16>
    %43 = vector.shape_cast %42 : vector<1x288x128xbf16> to vector<288x128xbf16>
    %c0_52 = arith.constant 0 : index
    %c0_53 = arith.constant 0 : index
    %44 = vector.load %arg6[%c0_52, %c0_53] : memref<288x128xf32, #tpu.memory_space<vmem>>, vector<288x128xf32>
    %c5 = arith.constant 5 : index
    %c0_54 = arith.constant 0 : index
    %c0_55 = arith.constant 0 : index
    %45 = vector.load %arg2[%c5, %c0_54, %c0_55] : memref<9x128x128xbf16, #tpu.memory_space<vmem>>, vector<1x128x128xbf16>
    %46 = vector.shape_cast %45 : vector<1x128x128xbf16> to vector<128x128xbf16>
    %cst_56 = arith.constant dense<0.000000e+00> : vector<288x128xf32>
    %47 = tpu.matmul %43, %46, %cst_56 {dimension_numbers = #tpu.dot_dimension_numbers<[1], [0], [0], [1], [0, 0, 1, 1], [], []>} : vector<288x128xbf16>, vector<128x128xbf16>, vector<288x128xf32> -> vector<288x128xf32>
    %48 = arith.addf %44, %47 : vector<288x128xf32>
    %c0_57 = arith.constant 0 : index
    %c0_58 = arith.constant 0 : index
    %49 = vector.load %arg6[%c0_57, %c0_58] : memref<288x128xf32, #tpu.memory_space<vmem>>, vector<288x128xf32>
    tpu.vector_store %arg6[%c0_57, %c0_58], %48 {strides = array<i32>} : memref<288x128xf32, #tpu.memory_space<vmem>>, vector<288x128xf32>,
    %c0_59 = arith.constant 0 : index
    %c36 = arith.constant 36 : index
    %c0_60 = arith.constant 0 : index
    %50 = vector.load %arg1[%c0_59, %c36, %c0_60] : memref<1x328x128xbf16, #tpu.memory_space<vmem>>, vector<1x288x128xbf16>
    %51 = vector.shape_cast %50 : vector<1x288x128xbf16> to vector<288x128xbf16>
    %c0_61 = arith.constant 0 : index
    %c0_62 = arith.constant 0 : index
    %52 = vector.load %arg6[%c0_61, %c0_62] : memref<288x128xf32, #tpu.memory_space<vmem>>, vector<288x128xf32>
    %c6 = arith.constant 6 : index
    %c0_63 = arith.constant 0 : index
    %c0_64 = arith.constant 0 : index
    %53 = vector.load %arg2[%c6, %c0_63, %c0_64] : memref<9x128x128xbf16, #tpu.memory_space<vmem>>, vector<1x128x128xbf16>
    %54 = vector.shape_cast %53 : vector<1x128x128xbf16> to vector<128x128xbf16>
    %cst_65 = arith.constant dense<0.000000e+00> : vector<288x128xf32>
    %55 = tpu.matmul %51, %54, %cst_65 {dimension_numbers = #tpu.dot_dimension_numbers<[1], [0], [0], [1], [0, 0, 1, 1], [], []>} : vector<288x128xbf16>, vector<128x128xbf16>, vector<288x128xf32> -> vector<288x128xf32>
    %56 = arith.addf %52, %55 : vector<288x128xf32>
    %c0_66 = arith.constant 0 : index
    %c0_67 = arith.constant 0 : index
    %57 = vector.load %arg6[%c0_66, %c0_67] : memref<288x128xf32, #tpu.memory_space<vmem>>, vector<288x128xf32>
    tpu.vector_store %arg6[%c0_66, %c0_67], %56 {strides = array<i32>} : memref<288x128xf32, #tpu.memory_space<vmem>>, vector<288x128xf32>,
    %c0_68 = arith.constant 0 : index
    %c37 = arith.constant 37 : index
    %c0_69 = arith.constant 0 : index
    %58 = vector.load %arg1[%c0_68, %c37, %c0_69] : memref<1x328x128xbf16, #tpu.memory_space<vmem>>, vector<1x288x128xbf16>
    %59 = vector.shape_cast %58 : vector<1x288x128xbf16> to vector<288x128xbf16>
    %c0_70 = arith.constant 0 : index
    %c0_71 = arith.constant 0 : index
    %60 = vector.load %arg6[%c0_70, %c0_71] : memref<288x128xf32, #tpu.memory_space<vmem>>, vector<288x128xf32>
    %c7 = arith.constant 7 : index
    %c0_72 = arith.constant 0 : index
    %c0_73 = arith.constant 0 : index
    %61 = vector.load %arg2[%c7, %c0_72, %c0_73] : memref<9x128x128xbf16, #tpu.memory_space<vmem>>, vector<1x128x128xbf16>
    %62 = vector.shape_cast %61 : vector<1x128x128xbf16> to vector<128x128xbf16>
    %cst_74 = arith.constant dense<0.000000e+00> : vector<288x128xf32>
    %63 = tpu.matmul %59, %62, %cst_74 {dimension_numbers = #tpu.dot_dimension_numbers<[1], [0], [0], [1], [0, 0, 1, 1], [], []>} : vector<288x128xbf16>, vector<128x128xbf16>, vector<288x128xf32> -> vector<288x128xf32>
    %64 = arith.addf %60, %63 : vector<288x128xf32>
    %c0_75 = arith.constant 0 : index
    %c0_76 = arith.constant 0 : index
    %65 = vector.load %arg6[%c0_75, %c0_76] : memref<288x128xf32, #tpu.memory_space<vmem>>, vector<288x128xf32>
    tpu.vector_store %arg6[%c0_75, %c0_76], %64 {strides = array<i32>} : memref<288x128xf32, #tpu.memory_space<vmem>>, vector<288x128xf32>,
    %c0_77 = arith.constant 0 : index
    %c38 = arith.constant 38 : index
    %c0_78 = arith.constant 0 : index
    %66 = vector.load %arg1[%c0_77, %c38, %c0_78] : memref<1x328x128xbf16, #tpu.memory_space<vmem>>, vector<1x288x128xbf16>
    %67 = vector.shape_cast %66 : vector<1x288x128xbf16> to vector<288x128xbf16>
    %c0_79 = arith.constant 0 : index
    %c0_80 = arith.constant 0 : index
    %68 = vector.load %arg6[%c0_79, %c0_80] : memref<288x128xf32, #tpu.memory_space<vmem>>, vector<288x128xf32>
    %c8 = arith.constant 8 : index
    %c0_81 = arith.constant 0 : index
    %c0_82 = arith.constant 0 : index
    %69 = vector.load %arg2[%c8, %c0_81, %c0_82] : memref<9x128x128xbf16, #tpu.memory_space<vmem>>, vector<1x128x128xbf16>
    %70 = vector.shape_cast %69 : vector<1x128x128xbf16> to vector<128x128xbf16>
    %cst_83 = arith.constant dense<0.000000e+00> : vector<288x128xf32>
    %71 = tpu.matmul %67, %70, %cst_83 {dimension_numbers = #tpu.dot_dimension_numbers<[1], [0], [0], [1], [0, 0, 1, 1], [], []>} : vector<288x128xbf16>, vector<128x128xbf16>, vector<288x128xf32> -> vector<288x128xf32>
    %72 = arith.addf %68, %71 : vector<288x128xf32>
    %c0_84 = arith.constant 0 : index
    %c0_85 = arith.constant 0 : index
    %73 = vector.load %arg6[%c0_84, %c0_85] : memref<288x128xf32, #tpu.memory_space<vmem>>, vector<288x128xf32>
    tpu.vector_store %arg6[%c0_84, %c0_85], %72 {strides = array<i32>} : memref<288x128xf32, #tpu.memory_space<vmem>>, vector<288x128xf32>,
    %c0_86 = arith.constant 0 : index
    %c0_87 = arith.constant 0 : index
    %74 = vector.load %arg6[%c0_86, %c0_87] : memref<288x128xf32, #tpu.memory_space<vmem>>, vector<288x128xf32>
    %c0_88 = arith.constant 0 : index
    %c0_89 = arith.constant 0 : index
    %75 = vector.load %arg3[%c0_88, %c0_89] : memref<1x128xf32, #tpu.memory_space<vmem>>, vector<1x128xf32>
    %76 = vector.broadcast %75 : vector<1x128xf32> to vector<288x128xf32>
    %77 = arith.mulf %74, %76 : vector<288x128xf32>
    %c0_90 = arith.constant 0 : index
    %c0_91 = arith.constant 0 : index
    %78 = vector.load %arg4[%c0_90, %c0_91] : memref<1x128xf32, #tpu.memory_space<vmem>>, vector<1x128xf32>
    %79 = vector.broadcast %78 : vector<1x128xf32> to vector<288x128xf32>
    %80 = arith.addf %77, %79 : vector<288x128xf32>
    %cst_92 = arith.constant 0.000000e+00 : f32
    %81 = vector.broadcast %cst_92 : f32 to vector<288x128xf32>
    %82 = arith.maximumf %80, %81 : vector<288x128xf32>
    %83 = arith.truncf %82 : vector<288x128xf32> to vector<288x128xbf16>
    %c0_93 = arith.constant 0 : index
    %c0_94 = arith.constant 0 : index
    %c0_95 = arith.constant 0 : index
    %84 = vector.load %arg5[%c0_93, %c0_94, %c0_95] : memref<1x288x128xbf16, #tpu.memory_space<vmem>>, vector<1x288x128xbf16>
    %85 = vector.shape_cast %84 : vector<1x288x128xbf16> to vector<288x128xbf16>
    %86 = vector.shape_cast %83 : vector<288x128xbf16> to vector<1x288x128xbf16>
    tpu.vector_store %arg5[%c0_93, %c0_94, %c0_95], %86 {strides = array<i32>} : memref<1x288x128xbf16, #tpu.memory_space<vmem>>, vector<1x288x128xbf16>,
    return
  }
  func.func @transform_0(%arg0: i32) -> (i32, i32, i32) {
    %c0_i32 = arith.constant 0 : i32
    %c0_i32_0 = arith.constant 0 : i32
    %c0_i32_1 = arith.constant 0 : i32
    return %arg0, %c0_i32, %c0_i32_0 : i32, i32, i32
  }
  func.func @transform_1(%arg0: i32) -> (i32, i32, i32) {
    %c0_i32 = arith.constant 0 : i32
    %c0_i32_0 = arith.constant 0 : i32
    %c0_i32_1 = arith.constant 0 : i32
    %c0_i32_2 = arith.constant 0 : i32
    return %c0_i32, %c0_i32_0, %c0_i32_1 : i32, i32, i32
  }
  func.func @transform_2(%arg0: i32) -> (i32, i32) {
    %c0_i32 = arith.constant 0 : i32
    %c0_i32_0 = arith.constant 0 : i32
    %c0_i32_1 = arith.constant 0 : i32
    return %c0_i32, %c0_i32_0 : i32, i32
  }
  func.func @transform_3(%arg0: i32) -> (i32, i32) {
    %c0_i32 = arith.constant 0 : i32
    %c0_i32_0 = arith.constant 0 : i32
    %c0_i32_1 = arith.constant 0 : i32
    return %c0_i32, %c0_i32_0 : i32, i32
  }
  func.func @transform_4(%arg0: i32) -> (i32, i32, i32) {
    %c0_i32 = arith.constant 0 : i32
    %c0_i32_0 = arith.constant 0 : i32
    %c0_i32_1 = arith.constant 0 : i32
    return %arg0, %c0_i32, %c0_i32_0 : i32, i32, i32
  }
}

</mosaic_0001>

<bundles_post_ra>
// kernel: tpu_custom_call.1
= control target key start
LH: loop header
LB: loop body
LE: loop exit
PB: predicated region body
PF: predicated region fallthrough
CT: control target
= control target key end

     0   :  { %9 = vsyncpa [#allocation4], 0  ;;  %s8586_s0 = inlined_call_operand.hbm [shape: bf16[2,328,128], index: 0, kind: input, shape index: {}]   ;;  %s8587_s1 = inlined_call_operand.hbm [shape: bf16[9,128,128], index: 1, kind: input, shape index: {}]   ;;  %s8588_s2 = inlined_call_operand.vmem [shape: f32[1,128], index: 2, kind: input, shape index: {}]   ;;  %s8589_s3 = inlined_call_operand.vmem [shape: f32[1,128], index: 3, kind: input, shape index: {}]   ;;  %s8590_s4 = inlined_call_operand.hbm [shape: bf16[2,288,128], index: 4, kind: output, shape index: {}]  }
   0x1   :  { %11 = vsyncpa [#allocation4 + $0x1], 0 }
   0x2   :  { %12 = vsyncpa [#allocation7], 0 }
   0x3   :  { %13 = vsyncpa [#allocation5], 0 }
   0x4   :  { %15 = vsyncpa [#allocation5 + $0x1], 0  ;;  %s7474_s15 = smov 0   ;;  %s7476_s16 = smov 0  }
   0x5   :  { %s7478_s17 = smov 0   ;;  %s7480_s18 = smov 0  }
   0x6 LB: > { %s7495_s19 = sadd.s32 4294967295, %s7440_s18   ;;  %s5859_s20 = sadd.s32 4294967294, %s7440_s18   ;;  %s7440_s18 = sphi %s7480_s18, %s8634_s18   ;;  %s7436_s17 = sphi %s7478_s17, %s8633_s17   ;;  %s7432_s16 = sphi %s7476_s16, %s8632_s16   ;;  %s7428_s15 = sphi %s7474_s15, %s8631_s15  }
   0x7   : > { %p41_p0 = scmp.ne.s32.totalorder %s7432_s16, %s7428_s15  ;;  %p8591_p1 = scmp.eq.s32.totalorder %s7495_s19, 0 }
   0x8   : > { %p134_p3 = scmp.eq.s32.totalorder %s5859_s20, 1  ;;  %p5860_p5 = scmp.ge.s32.totalorder %s7440_s18, 1 }
   0x9   : > { %p7504_p4 = por %p8591_p1, %p41_p0  ;;  %p141_p7 = scmp.lt.s32.totalorder %s7440_s18, 3 }
   0xa   : > { %p7509_p6 = por %p134_p3, %p41_p0  ;;  %s7442_s24 = smov [#allocation6]  }
   0xb   : > { %s8595_s21 = scalar_select %p7504_p4, 1, 0 }
   0xc   : > { %s8596_s22 = scalar_select %p7509_p6, 1, 0 }
   0xd   : > { %p7514_p8 = pnand %p5860_p5, %p141_p7  ;;  %s153_s25 = sshll.u32 %s7442_s24, 4  ;;  %s154_s25 = int_to_ptr.vmem [resolvable:$true] %s153_s25 }
   0xe   : > { %s7528_s27 = sadd.s32 1, %s7440_s18   ;;  %s28_s28 = sadd.s32 1, %s7436_s17 }
   0xf   : > { %s8597_s23 = scalar_select %p7514_p8, 1, 0 }
  0x10   : > { %p7023_p9 = pneg %p7514_p8  ;;  %s25_s29 = ssub.s32 %s7440_s18, %s7528_s27 }
  0x11   : > { %s7329_s30 = scalar_lea.vmem %s154_s25, 9216  ;;  %p7337_p5 = scmp.lt.s32.totalorder %s154_s25, %s154_s25 }
  0x12   : > { %p7523_p11 = pnand %p7023_p9, %p8591_p1  ;;  %p7330_p13 = scmp.ne.s32.totalorder %s154_s25, %s7329_s30 }
  0x13   : > { %p7338_p7 = scmp.lt.s32.totalorder %s7329_s30, %s7329_s30 }
  0x14   : > { %p7320_p12 = pneg %p7523_p11 }
  0x15   : > { %p7339_p10 = por %p7338_p7, %p7337_p5 }
  0x16   : > { %p7332_p0 = pnand %p7330_p13, %p7320_p12 }
  0x18   : > { %p7333_p3 = pneg %p7332_p0 }
  0x1a   : > { %p7340_p2 = pnand %p7339_p10, %p7333_p3 }
  0x1c   : > { %7343 = shalt.err (!%p7340_p2)
}
  0x1d   : > { %s7443_s5 = smov 64   ;;  %s7444_s6 = smov 4  }
  0x1e   : > { %7026 = dma.hbm_to_vmem [thread:$0]  (!%p7523_p11), %s8587_s1, 9216, %s154_s25, [#allocation7], %s7443_s5, %s7443_s5, %s7444_s6  }
  0x1f   : > { %p26_p2 = scmp.eq.s32.totalorder %s25_s29, 0  ;;  %p35_p9 = scmp.ne.s32.totalorder %s7436_s17, %s7432_s16 }
  0x20   : > { %p36_p10 = scmp.eq.s32.totalorder %s7440_s18, 0  ;;  %p7036_p12 = scmp.lt.s32.totalorder %s7440_s18, 2 }
  0x21   : > { %s7548_s9 = scalar_select %p26_p2, %s7436_s17, %s28_s28  }
  0x22   : > { %p37_p13 = por %p36_p10, %p35_p9  ;;  %p8599_p0 = scmp.eq.s32.totalorder %s7495_s19, 1 }
  0x23   : > { %s173_s11 = sand.u32 1, %s7436_s17   ;;  %s7011_s12 = smul.u32 2624, %s7440_s18 }
  0x24   : > { %p7552_p3 = por %p8599_p0, %p35_p9  ;;  %s7010_s13 = smul.u32 164, %s173_s11 }
  0x25   : > { %p7558_p5 = pnand %p7036_p12, %p37_p13  ;;  %s7565_s25 = scalar_lea.hbm %s8586_s0, %s7011_s12 }
  0x26   : > { %s8600_s10 = scalar_select %p7552_p3, 1, 0 }
  0x27   : > { %s177_s26 = scalar_lea.vmem [#allocation3], %s7010_s13  ;;  %s7569_s29 = scalar_lea.sflag [#allocation4], %s173_s11 }
  0x28   : > { %s184_s28 = sshll.u32 %s177_s26, 4  ;;  %s7344_s30 = scalar_lea.hbm %s7565_s25, 2624  ;;  %s7567_s28 = int_to_ptr.vmem [resolvable:$true] %s184_s28 }
  0x29   : > { %p7345_p11 = scmp.ne.s32.totalorder %s7565_s25, %s7344_s30  ;;  %p7346_p7 = pneg %p7558_p5 }
  0x2a   : > { %s7349_s12 = scalar_lea.hbm %s8586_s0, 5248  ;;  %p7350_p10 = scmp.lt.s32.totalorder %s7565_s25, %s8586_s0 }
  0x2b   : > { %p7347_p2 = pnand %p7346_p7, %p7345_p11  ;;  %p7351_p12 = scmp.lt.s32.totalorder %s7349_s12, %s7344_s30 }
  0x2d   : > { %p7348_p9 = pneg %p7347_p2  ;;  %p7352_p13 = por %p7351_p12, %p7350_p10 }
  0x2f   : > { %p7353_p0 = pnand %p7352_p13, %p7348_p9 }
  0x31   : > { %7356 = shalt.err (!%p7353_p0)
}
  0x32   : > { %s7357_s11 = scalar_lea.vmem %s7567_s28, 2624  ;;  %s7445_s13 = smov [#allocation3]  }
  0x33   : > { %p7358_p1 = scmp.ne.s32.totalorder %s7567_s28, %s7357_s11  ;;  %s7362_s26 = sshll.u32 %s7445_s13, 4  ;;  %s7363_s26 = int_to_ptr.vmem [resolvable:$false] %s7362_s26 }
  0x34   : > { %s7364_s7 = scalar_lea.vmem %s7363_s26, 5248  ;;  %p7365_p2 = scmp.lt.s32.totalorder %s7567_s28, %s7363_s26 }
  0x35   : > { %p7360_p6 = pnand %p7358_p1, %p7346_p7  ;;  %p7366_p3 = scmp.lt.s32.totalorder %s7364_s7, %s7357_s11 }
  0x37   : > { %p7361_p11 = pneg %p7360_p6  ;;  %p7367_p4 = por %p7366_p3, %p7365_p2 }
  0x39   : > { %p7368_p8 = pnand %p7367_p4, %p7361_p11 }
  0x3b   : > { %7371 = shalt.err (!%p7368_p8)
}
  0x3c   : > { %7030 = dma.hbm_to_vmem [thread:$0]  (!%p7558_p5), %s7565_s25, 2624, %s7567_s28, %s7569_s29, %s7443_s5, %s7443_s5, %s7444_s6  }
  0x3d   : > { %p8602_p1 = scmp.ne.s32.totalorder %s8597_s23, 0 }
  0x3f   : > { %196 = sbr.rel (%p8602_p1) target bundleno = 654 (0x28e), region = 36 }
  0x44   : > { %s7596_s30 = sand.u32 1, %s7432_s16   ;;  %p8603_p4 = scmp.ne.s32.totalorder %s8595_s21, 0 }
  0x45   : > { %s7012_s8 = smul.u32 164, %s7596_s30  ;;  %s199_s12 = scalar_lea.sflag [#allocation4], %s7596_s30 }
  0x47   : > { %s7600_s20 = scalar_lea.vmem [#allocation3], %s7012_s8 }
  0x48   : > { %7415 = dma.done.wait (%p8603_p4), %s199_s12, 2624  }
  0x49   : > { %7417 = vsyncadd (%p8603_p4), %s199_s12, 4294964672  ;;  %p8604_p6 = scmp.eq.s32.totalorder %s7495_s19, 0 }
  0x4b   : > { %7419 = dma.done.wait (%p8604_p6), [#allocation7], 9216   ;;  %p8605_p8 = pmov %p8604_p6 }
  0x4c   : > { %v7076_v0 = vld [vmem:[#allocation6 + $0x38] sm:$0xff]   ;;  %v7077_v1 = vld [vmem:[#allocation6 + $0x30] sm:$0xff]   ;;  %v7078_v2 = vld [vmem:[#allocation6 + $0x28] sm:$0xff]   ;;  %vm1591_vm0 = vcmask 1046528   ;;  %vm944_vm1 = vsmask.f32 7424 }
  0x4d   : > { %7421 = vsyncadd (%p8605_p8), [#allocation7], 4294958080  ;;  %6994 = vmatprep.subr.bf16.mxu1 %v7076_v0  ;;  %6526 = vmatprep.subr.bf16.mxu0 %v7076_v0  ;;  %v7079_v3 = vld [vmem:[#allocation6 + $0x20] sm:$0xff]   ;;  %v7080_v6 = vld [vmem:[#allocation6 + $0x18] sm:$0xff]   ;;  %vm2662_vm2 = vsmask.f32 6400 }
  0x4e   : > { %7002 = vmatpush3.bf16.msra.mxu1 %v7076_v0  ;;  %6527 = vmatpush3.bf16.msra.mxu0 %v7076_v0  ;;  %v7084_v4 = vld [vmem:[%s7600_s20 + $0x40] sm:$0xff]   ;;  %v7081_v7 = vld [vmem:[#allocation6 + $0x10] sm:$0xff]   ;;  %v7082_v8 = vld [vmem:[#allocation6 + $0x8] sm:$0xff]   ;;  %vm3331_vm3 = vcmask 1045504   ;;  %vm5071_vm4 = vcmask 1044480   ;;  %s7013_s14 = smul.u32 144, %s7596_s30 }
  0x4f   : > { %6995 = vmatprep.subr.bf16.mxu1 %v7077_v1  ;;  %6528 = vmatprep.subr.bf16.mxu0 %v7077_v1  ;;  %v7087_v5 = vld [vmem:[%s7600_s20] sm:$0xff]   ;;  %v7085_v11 = vld [vmem:[%s7600_s20 + $0x48] sm:$0xff]   ;;  %v7089_v14 = vld [vmem:[#allocation6 + $0x70] sm:$0xff]   ;;  %vm4402_vm5 = vsmask.f32 5376  ;;  %s7014_s28 = smul.u32 2304, %s7495_s19 }
  0x50   : > { %6558 = vmatprep.mubr.bf16.mxu1 %v7084_v4  ;;  %6542 = vmatprep.mubr.bf16.mxu0 %v7087_v5  ;;  %v7083_v9 = vld [vmem:[#allocation6] sm:$0xff]   ;;  %v7086_v10 = vld [vmem:[#allocation6 + $0x78] sm:$0xff]   ;;  %v7091_v15 = vld [vmem:[%s7600_s20 + $0x50] sm:$0xff]   ;;  %s8427_s25 = scalar_lea.vmem [#allocation8], %s7013_s14  ;;  %s5763_s19 = scalar_lea.sflag [#allocation5], %s7596_s30 }
  0x51   : > { %v7090_v12 = vld [vmem:[#allocation6 + $0xb8] sm:$0xff]   ;;  %v7088_v13 = vld [vmem:[%s7600_s20 + $0x8] sm:$0xff]   ;;  %v7093_v16 = vld [vmem:[#allocation6 + $0xb0] sm:$0xff]   ;;  %s5776_s29 = sshll.u32 %s8427_s25, 4  ;;  %s8540_s13 = scalar_lea.hbm %s8590_s4, %s7014_s28  ;;  %s8542_s29 = int_to_ptr.vmem [resolvable:$true] %s5776_s29 }
  0x52   : > { %7003 = vmatpush3.bf16.msra.mxu1 %v7077_v1  ;;  %6529 = vmatpush3.bf16.msra.mxu0 %v7077_v1  ;;  %v7095_v17 = vld [vmem:[%s7600_s20 + $0x10] sm:$0xff]   ;;  %v7092_v19 = vld [vmem:[%s7600_s20 + $0x58] sm:$0xff]   ;;  %v7098_v22 = vld [vmem:[%s7600_s20 + $0x60] sm:$0xff]   ;;  %s7372_s26 = scalar_lea.vmem %s8542_s29, 2304  ;;  %p8628_p5 = scmp.ne.s32.totalorder %s8600_s10, 0 }
  0x53   : > { %6996 = vmatprep.subr.bf16.mxu1 %v7078_v2  ;;  %6530 = vmatprep.subr.bf16.mxu0 %v7078_v2  ;;  %v7094_v18 = vld [vmem:[#allocation6 + $0x68] sm:$0xff]   ;;  %v7096_v21 = vld [vmem:[%s7600_s20 + $0x18] sm:$0xff]   ;;  %v7099_v23 = vld [vmem:[#allocation6 + $0x60] sm:$0xff]   ;;  %p7373_p3 = scmp.ne.s32.totalorder %s8542_s29, %s7372_s26  ;;  %s7446_s7 = smov [#allocation8]  }
  0x54   : > { %v7097_v20 = vld [vmem:[#allocation6 + $0xa8] sm:$0xff]   ;;  %v7101_v24 = vld [vmem:[#allocation6 + $0xa0] sm:$0xff]   ;;  %v7103_v26 = vld [vmem:[#allocation6 + $0x58] sm:$0xff]   ;;  %s7376_s8 = sshll.u32 %s7446_s7, 4  ;;  %s7377_s8 = int_to_ptr.vmem [resolvable:$false] %s7376_s8 }
  0x55   : > { %v7102_v25 = vld [vmem:[%s7600_s20 + $0x20] sm:$0xff]   ;;  %v7100_v27 = vld [vmem:[%s7600_s20 + $0x68] sm:$0xff]   ;;  %v7106_v30 = vld [vmem:[%s7600_s20 + $0x70] sm:$0xff]   ;;  %p7374_p7 = pnand %p7373_p3, %p8628_p5  ;;  %s7378_s12 = scalar_lea.vmem %s7377_s8, 4608 }
  0x56   : > { %7004 = vmatpush3.bf16.msra.mxu1 %v7078_v2  ;;  %6531 = vmatpush3.bf16.msra.mxu0 %v7078_v2  ;;  %v7105_v28 = vld [vmem:[#allocation6 + $0x98] sm:$0xff]   ;;  %v7104_v29 = vld [vmem:[%s7600_s20 + $0x28] sm:$0xff]   ;;  %v7108_v31 = vld [vmem:[#allocation6 + $0x50] sm:$0xff]   ;;  %p7379_p10 = scmp.lt.s32.totalorder %s8542_s29, %s7377_s8  ;;  %p7380_p12 = scmp.lt.s32.totalorder %s7378_s12, %s7372_s26 }
  0x57   : > { %6997 = vmatprep.subr.bf16.mxu1 %v7079_v3  ;;  %6532 = vmatprep.subr.bf16.mxu0 %v7079_v3  ;;  %v7109_v32 = vld [vmem:[#allocation6 + $0x90] sm:$0xff]   ;;  %v7121_v33 = vld [vmem:[%s7600_s20] sm:$0xff]   ;;  %v7112_v35 = vld [vmem:[#allocation6 + $0x88] sm:$0xff]   ;;  %p7375_p9 = pneg %p7374_p7 }
  0x58   : > { %v7110_v34 = vld [vmem:[%s7600_s20 + $0x30] sm:$0xff]   ;;  %v7118_v36 = vld [vmem:[%s7600_s20] sm:$0xfe]   ;;  %v7119_v37 = vld [vmem:[%s7600_s20 + $0x8] sm:$0xff]   ;;  %v948_v42 = vshll.u32 %v7121_v33, 16  ;;  %v946_v49 = vshrl.u32 %v7121_v33, 16  ;;  %p7381_p13 = por %p7380_p12, %p7379_p10 }
  0x59   : > { %v7113_v38 = vld [vmem:[#allocation6 + $0x48] sm:$0xff]   ;;  %v7107_v39 = vld [vmem:[%s7600_s20 + $0x78] sm:$0xff]   ;;  %v7114_v43 = vld [vmem:[%s7600_s20 + $0x80] sm:$0xff]   ;;  %v1592_v45 = vrot.slane %v7118_v36, 1  ;;  %v1593_v46 = vrot.slane %v7119_v37, 1 }
  0x5a   : > { %7005 = vmatpush3.bf16.msra.mxu1 %v7079_v3  ;;  %6533 = vmatpush3.bf16.msra.mxu0 %v7079_v3  ;;  %v7111_v40 = vld [vmem:[%s7600_s20 + $0x38] sm:$0xff]   ;;  %v7122_v41 = vld [vmem:[%s7600_s20 + $0x8] sm:$0xff]   ;;  %v7120_v48 = vld [vmem:[%s7600_s20 + $0x10] sm:$0xff]   ;;  %v950_v50 = vrot.slane %v948_v42, 1  ;;  %p7382_p0 = pnand %p7381_p13, %p7375_p9 }
  0x5b   : > { %6998 = vmatprep.subr.bf16.mxu1 %v7080_v6  ;;  %6534 = vmatprep.subr.bf16.mxu0 %v7080_v6  ;;  %v7116_v44 = vld [vmem:[#allocation6 + $0x80] sm:$0xff]   ;;  %v953_v51 = vshll.u32 %v7122_v41, 16  ;;  %v7126_v52 = vld [vmem:[%s7600_s20 + $0x18] sm:$0xff]   ;;  %v1594_v53 = vsel %vm1591_vm0, %v1592_v45, %v1593_v46  ;;  %v7123_v54 = vld [vmem:[%s7600_s20 + $0x10] sm:$0xff]   ;;  %v1595_v55 = vrot.slane %v7120_v48, 1  ;;  %v957_v63 = vshrl.u32 %v7122_v41, 16 }
  0x5c   : > { %v7117_v47 = vld [vmem:[#allocation6 + $0x40] sm:$0xff]   ;;  %v7125_v56 = vld [vmem:[#allocation6 + $0x138] sm:$0xff]   ;;  %v951_v57 = vor.u32 %v950_v50, %v946_v49  ;;  %v1597_v61 = vrot.slane %v7126_v52, 1  ;;  %v961_v0 = vshll.u32 %v7123_v54, 16  ;;  %v965_v3 = vshrl.u32 %v7123_v54, 16  ;;  %v7136_v37 = vld [vmem:[#allocation6 + $0xe8] sm:$0xff]  }
  0x5d   : > { %v955_v58 = vrot.slane %v953_v51, 1  ;;  %v7128_v59 = vld [vmem:[%s7600_s20 + $0x18] sm:$0xff]   ;;  %v7115_v62 = vld [vmem:[%s7600_s20 + $0x88] sm:$0xff]   ;;  %v1596_v1 = vsel %vm1591_vm0, %v1593_v46, %v1595_v55  ;;  %v7127_v2 = vld [vmem:[%s7600_s20 + $0x20] sm:$0xff]  }
  0x5e   : > { %7006 = vmatpush3.bf16.msra.mxu1 %v7080_v6  ;;  %6535 = vmatpush3.bf16.msra.mxu0 %v7080_v6  ;;  %v7124_v60 = vld [vmem:[#allocation6 + $0xf8] sm:$0xff]   ;;  %v969_v5 = vshll.u32 %v7128_v59, 16  ;;  %v7131_v6 = vld [vmem:[#allocation6 + $0x130] sm:$0xff]   ;;  %v7142_v45 = vld [vmem:[#allocation6 + $0xe0] sm:$0xff]  }
  0x5f   : > { %6999 = vmatprep.subr.bf16.mxu1 %v7081_v7  ;;  %6536 = vmatprep.subr.bf16.mxu0 %v7081_v7  ;;  %v956_v4 = vsel %vm944_vm1, %v951_v57, %v955_v58  ;;  %v7139_v41 = vld [vmem:[%s7600_s20 + $0x40] sm:$0xff]   ;;  %v7143_v48 = vld [vmem:[%s7600_s20 + $0x48] sm:$0xff]  }
  0x60   : > { %v7151_v51 = vld [vmem:[#allocation6 + $0x118] sm:$0xff]   ;;  %v1607_v52 = vrot.slane %v7139_v41, 1 }
  0x62   : > { %7007 = vmatpush3.bf16.msra.mxu1 %v7081_v7  ;;  %6537 = vmatpush3.bf16.msra.mxu0 %v7081_v7  ;;  %v1598_v7 = vsel %vm1591_vm0, %v1595_v55, %v1597_v61 }
  0x63   : > { %7000 = vmatprep.subr.bf16.mxu1 %v7082_v8  ;;  %6538 = vmatprep.subr.bf16.mxu0 %v7082_v8 }
  0x66   : > { %7008 = vmatpush3.bf16.msra.mxu1 %v7082_v8  ;;  %6539 = vmatpush3.bf16.msra.mxu0 %v7082_v8  ;;  %v7132_v8 = vld [vmem:[%s7600_s20 + $0x28] sm:$0xff]  }
  0x67   : > { %7001 = vmatprep.subr.bf16.mxu1 %v7083_v9  ;;  %6540 = vmatprep.subr.bf16.mxu0 %v7083_v9 }
  0x6a   : > { %7009 = vmatpush3.bf16.msra.mxu1 %v7083_v9  ;;  %6541 = vmatpush3.bf16.msra.mxu0 %v7083_v9  ;;  %v963_v9 = vrot.slane %v961_v0, 1 }
  0x6b   : > { %6578 = vmatprep.subr.bf16.mxu1 %v7086_v10  ;;  %6630 = vmatprep.subr.bf16.mxu0 %v7090_v12 }
  0x6d   : > { %6559 = vmatmul.mubr.bf16.vlgmr.msra.gmra.mxu1 %v7085_v11  ;;  %6543 = vmatmul.mubr.bf16.vlgmr.msra.gmra.mxu0 %v7088_v13  ;;  %v959_v11 = vor.u32 %v957_v63, %v955_v58  ;;  %v967_v13 = vor.u32 %v965_v3, %v963_v9  ;;  %v1609_v58 = vrot.slane %v7143_v48, 1  ;;  %v7159_v48 = vld [vmem:[%s7600_s20 + $0x70] sm:$0xff]  }
  0x6e   : > { %6579 = vmatpush3.bf16.msra.mxu1 %v7086_v10  ;;  %6631 = vmatpush3.bf16.msra.mxu0 %v7090_v12  ;;  %v7129_v10 = vld [vmem:[%s7600_s20 + $0x20] sm:$0xff]   ;;  %v1599_v12 = vrot.slane %v7127_v2, 1 }
  0x6f   : > { %6580 = vmatprep.subr.bf16.mxu1 %v7089_v14  ;;  %6562 = vmatprep.mubr.bf16.mxu1 %v7091_v15  ;;  %v7134_v15 = vld [vmem:[%s7600_s20 + $0x28] sm:$0xff]  }
  0x70   : > { %6632 = vmatprep.subr.bf16.mxu0 %v7093_v16  ;;  %6546 = vmatprep.mubr.bf16.mxu0 %v7095_v17  ;;  %v973_v17 = vshrl.u32 %v7128_v59, 16  ;;  %v7149_v59 = vld [vmem:[#allocation6 + $0xd8] sm:$0xff]  }
  0x72   : > { %6581 = vmatpush3.bf16.msra.mxu1 %v7089_v14  ;;  %6633 = vmatpush3.bf16.msra.mxu0 %v7093_v16  ;;  %v971_v14 = vrot.slane %v969_v5, 1  ;;  %v7138_v16 = vld [vmem:[#allocation6 + $0x128] sm:$0xff]  }
  0x73   : > { %6582 = vmatprep.subr.bf16.mxu1 %v7094_v18  ;;  %6634 = vmatprep.subr.bf16.mxu0 %v7097_v20 }
  0x75   : > { %6563 = vmatmul.mubr.bf16.gmra.mxu1 %v7092_v19  ;;  %6547 = vmatmul.mubr.bf16.gmra.mxu0 %v7096_v21  ;;  %v977_v19 = vshll.u32 %v7129_v10, 16  ;;  %v964_v21 = vsel %vm944_vm1, %v959_v11, %v963_v9  ;;  %v7147_v9 = vld [vmem:[%s7600_s20 + $0x50] sm:$0xff]  }
  0x76   : > { %6583 = vmatpush3.bf16.msra.mxu1 %v7094_v18  ;;  %6635 = vmatpush3.bf16.msra.mxu0 %v7097_v20  ;;  %v1601_v18 = vrot.slane %v7132_v8, 1  ;;  %v7130_v20 = vld [vmem:[#allocation6 + $0xf0] sm:$0xff]  }
  0x77   : > { %6566 = vmatprep.mubr.bf16.mxu1 %v7098_v22  ;;  %6584 = vmatprep.subr.bf16.mxu1 %v7099_v23  ;;  %v1600_v22 = vsel %vm1591_vm0, %v1597_v61, %v1599_v12 }
  0x78   : > { %6636 = vmatprep.subr.bf16.mxu0 %v7101_v24  ;;  %6550 = vmatprep.mubr.bf16.mxu0 %v7102_v25  ;;  %v972_v25 = vsel %vm944_vm1, %v967_v13, %v971_v14 }
  0x7a   : > { %6585 = vmatpush3.bf16.msra.mxu1 %v7099_v23  ;;  %6637 = vmatpush3.bf16.msra.mxu0 %v7101_v24  ;;  %v7133_v23 = vld [vmem:[%s7600_s20 + $0x30] sm:$0xff]   ;;  %v981_v24 = vshrl.u32 %v7129_v10, 16 }
  0x7b   : > { %6586 = vmatprep.subr.bf16.mxu1 %v7103_v26  ;;  %6638 = vmatprep.subr.bf16.mxu0 %v7105_v28  ;;  %v1603_v33 = vrot.slane %v7133_v23, 1 }
  0x7d   : > { %6567 = vmatmul.mubr.bf16.gmra.mxu1 %v7100_v27  ;;  %6551 = vmatmul.mubr.bf16.gmra.mxu0 %v7104_v29  ;;  %v7135_v27 = vld [vmem:[%s7600_s20 + $0x30] sm:$0xff]   ;;  %v7137_v29 = vld [vmem:[%s7600_s20 + $0x38] sm:$0xff]  }
  0x7e   : > { %6587 = vmatpush3.bf16.msra.mxu1 %v7103_v26  ;;  %6639 = vmatpush3.bf16.msra.mxu0 %v7105_v28  ;;  %v985_v26 = vshll.u32 %v7134_v15, 16  ;;  %v1602_v28 = vsel %vm1591_vm0, %v1599_v12, %v1601_v18 }
  0x7f   : > { %6570 = vmatprep.mubr.bf16.mxu1 %v7106_v30  ;;  %6588 = vmatprep.subr.bf16.mxu1 %v7108_v31  ;;  %v979_v30 = vrot.slane %v977_v19, 1 }
  0x80   : > { %6640 = vmatprep.subr.bf16.mxu0 %v7109_v32  ;;  %6554 = vmatprep.mubr.bf16.mxu0 %v7110_v34  ;;  %v7140_v34 = vld [vmem:[%s7600_s20 + $0x38] sm:$0xff]   ;;  %v987_v36 = vrot.slane %v985_v26, 1 }
  0x82   : > { %6589 = vmatpush3.bf16.msra.mxu1 %v7108_v31  ;;  %6641 = vmatpush3.bf16.msra.mxu0 %v7109_v32  ;;  %v7145_v31 = vld [vmem:[#allocation6 + $0x120] sm:$0xff]   ;;  %v975_v32 = vor.u32 %v973_v17, %v971_v14  ;;  %v7165_v17 = vld [vmem:[#allocation6 + $0x108] sm:$0xff]  }
  0x83   : > { %6642 = vmatprep.subr.bf16.mxu0 %v7112_v35  ;;  %6590 = vmatprep.subr.bf16.mxu1 %v7113_v38 }
  0x84   : > { %v980_v42 = vsel %vm944_vm1, %v975_v32, %v979_v30 }
  0x85   : > { %6571 = vmatmul.mubr.bf16.gmra.mxu1 %v7107_v39  ;;  %6555 = vmatmul.mubr.bf16.gmra.mxu0 %v7111_v40  ;;  %v1605_v39 = vrot.slane %v7137_v29, 1  ;;  %v989_v40 = vshrl.u32 %v7134_v15, 16  ;;  %v7152_v15 = vld [vmem:[%s7600_s20 + $0x58] sm:$0xff]  }
  0x86   : > { %6643 = vmatpush3.bf16.msra.mxu0 %v7112_v35  ;;  %6574 = vmatprep.mubr.bf16.mxu1 %v7114_v43  ;;  %v983_v35 = vor.u32 %v981_v24, %v979_v30  ;;  %v1604_v43 = vsel %vm1591_vm0, %v1601_v18, %v1603_v33  ;;  %v1025_v18 = vshll.u32 %v7147_v9, 16  ;;  %v1033_v26 = vshll.u32 %v7152_v15, 16  ;;  %v7153_v30 = vld [vmem:[%s7600_s20 + $0x60] sm:$0xff]  }
  0x87   : > { %6591 = vmatpush3.bf16.msra.mxu1 %v7113_v38  ;;  %6644 = vmatprep.subr.bf16.mxu0 %v7116_v44  ;;  %v993_v38 = vshll.u32 %v7135_v27, 16  ;;  %v1606_v50 = vsel %vm1591_vm0, %v1603_v33, %v1605_v39  ;;  %v991_v54 = vor.u32 %v989_v40, %v987_v36  ;;  %v1608_v0 = vsel %vm1591_vm0, %v1605_v39, %v1607_v52  ;;  %v7155_v39 = vld [vmem:[%s7600_s20 + $0x70] sm:$0xff]  }
  0x88   : > { %6592 = vmatprep.subr.bf16.mxu1 %v7117_v47  ;;  %6646 = vmatprep.mubr.bf16.mxu0 %v1594_v53  ;;  %v988_v46 = vsel %vm944_vm1, %v983_v35, %v987_v36  ;;  %v7141_v53 = vld [vmem:[%s7600_s20 + $0x40] sm:$0xff]   ;;  %v1027_v29 = vrot.slane %v1025_v18, 1  ;;  %v1035_v36 = vrot.slane %v1033_v26, 1 }
  0x89   : > { %v995_v49 = vrot.slane %v993_v38, 1  ;;  %v1009_v61 = vshll.u32 %v7141_v53, 16  ;;  %v1013_v2 = vshrl.u32 %v7141_v53, 16  ;;  %v1041_v38 = vshll.u32 %v7153_v30, 16 }
  0x8a   : > { %6645 = vmatpush3.bf16.msra.mxu0 %v7116_v44  ;;  %v1001_v44 = vshll.u32 %v7140_v34, 16 }
  0x8b   : > { %6593 = vmatpush3.bf16.msra.mxu1 %v7117_v47  ;;  %6734 = vmatprep.subr.bf16.mxu0 %v7125_v56  ;;  %v997_v47 = vshrl.u32 %v7135_v27, 16  ;;  %v996_v63 = vsel %vm944_vm1, %v991_v54, %v995_v49  ;;  %v1011_v8 = vrot.slane %v1009_v61, 1  ;;  %v7154_v27 = vld [vmem:[%s7600_s20 + $0x68] sm:$0xff]   ;;  %v7163_v54 = vld [vmem:[%s7600_s20 + $0x78] sm:$0xff]   ;;  %v1061_v61 = vshrl.u32 %v7159_v48, 16 }
  0x8c   : > { %6682 = vmatprep.subr.bf16.mxu1 %v7124_v60  ;;  %v1003_v55 = vrot.slane %v1001_v44, 1 }
  0x8d   : > { %6575 = vmatmul.mubr.bf16.gmra.mxu1 %v7115_v62  ;;  %6647 = vmatmul.mubr.bf16.vlgmr.msra.gmra.mxu0 %v1596_v1  ;;  %v999_v57 = vor.u32 %v997_v47, %v995_v49  ;;  %v7158_v62 = vld [vmem:[#allocation6 + $0x110] sm:$0xff]   ;;  %v1015_v13 = vor.u32 %v1013_v2, %v1011_v8  ;;  %v1043_v49 = vrot.slane %v1041_v38, 1 }
  0x8e   : > { %6594 = vmatprep.mubr.bf16.mxu1 %v956_v4  ;;  %6735 = vmatpush3.bf16.msra.mxu0 %v7125_v56  ;;  %v7146_v56 = vld [vmem:[%s7600_s20 + $0x48] sm:$0xff]   ;;  %v7144_v1 = vld [vmem:[%s7600_s20 + $0x50] sm:$0xff]   ;;  %v7148_v4 = vld [vmem:[%s7600_s20 + $0x58] sm:$0xff]  }
  0x8f   : > { %6650 = vmatprep.mubr.bf16.mxu0 %v1598_v7  ;;  %6736 = vmatprep.subr.bf16.mxu0 %v7131_v6  ;;  %v1017_v3 = vshll.u32 %v7146_v56, 16  ;;  %v1004_v5 = vsel %vm944_vm1, %v999_v57, %v1003_v55  ;;  %v7156_v7 = vld [vmem:[#allocation6 + $0xd0] sm:$0xff]   ;;  %v1611_v11 = vrot.slane %v7144_v1, 1  ;;  %v1613_v14 = vrot.slane %v7148_v4, 1  ;;  %v7161_v57 = vld [vmem:[%s7600_s20 + $0x80] sm:$0xff]  }
  0x90   : > { %v7160_v47 = vld [vmem:[%s7600_s20 + $0x78] sm:$0xff]   ;;  %v1065_v1 = vshll.u32 %v7163_v54, 16  ;;  %v7173_v2 = vld [vmem:[%s7600_s20 + $0x10] sm:$0xff]  }
  0x91   : > { %v1019_v12 = vrot.slane %v1017_v3, 1  ;;  %v1614_v24 = vsel %vm1591_vm0, %v1611_v11, %v1613_v14  ;;  %v2672_v18 = vshrl.u32 %v7173_v2, 16 }
  0x92   : > { %6737 = vmatpush3.bf16.msra.mxu0 %v7131_v6  ;;  %v1610_v6 = vsel %vm1591_vm0, %v1607_v52, %v1609_v58 }
  0x93   : > { %6738 = vmatprep.subr.bf16.mxu0 %v7138_v16  ;;  %v1020_v23 = vsel %vm944_vm1, %v1015_v13, %v1019_v12  ;;  %v1069_v13 = vshrl.u32 %v7163_v54, 16 }
  0x95   : > { %6595 = vmatmul.mubr.bf16.vlgmr.msra.gmra.mxu1 %v964_v21  ;;  %6651 = vmatmul.mubr.bf16.gmra.mxu0 %v1600_v22  ;;  %v1021_v21 = vshrl.u32 %v7146_v56, 16  ;;  %v7150_v22 = vld [vmem:[%s7600_s20 + $0x60] sm:$0xff]   ;;  %v1621_v56 = vrot.slane %v7160_v47, 1  ;;  %v7181_v47 = vld [vmem:[%s7600_s20 + $0x28] sm:$0xff]  }
  0x96   : > { %6683 = vmatpush3.bf16.msra.mxu1 %v7124_v60  ;;  %6598 = vmatprep.mubr.bf16.mxu1 %v972_v25  ;;  %v1005_v60 = vshrl.u32 %v7140_v34, 16  ;;  %v1029_v25 = vshrl.u32 %v7147_v9, 16  ;;  %v1615_v33 = vrot.slane %v7150_v22, 1  ;;  %v7157_v34 = vld [vmem:[%s7600_s20 + $0x68] sm:$0xff]   ;;  %v1623_v9 = vrot.slane %v7161_v57, 1 }
  0x97   : > { %6684 = vmatprep.subr.bf16.mxu1 %v7130_v20  ;;  %6654 = vmatprep.mubr.bf16.mxu0 %v1602_v28  ;;  %v7169_v28 = vld [vmem:[#allocation6 + $0xc0] sm:$0xff]   ;;  %v1023_v32 = vor.u32 %v1021_v21, %v1019_v12  ;;  %v1067_v12 = vrot.slane %v1065_v1, 1 }
  0x98   : > { %6739 = vmatpush3.bf16.msra.mxu0 %v7138_v16  ;;  %v1007_v10 = vor.u32 %v1005_v60, %v1003_v55  ;;  %v7162_v16 = vld [vmem:[#allocation6 + $0xc8] sm:$0xff]   ;;  %v1031_v35 = vor.u32 %v1029_v25, %v1027_v29  ;;  %v1616_v41 = vsel %vm1591_vm0, %v1613_v14, %v1615_v33  ;;  %v7688_v60 = vld [vmem:[#allocation6 + $0x178] sm:$0xff]  }
  0x99   : > { %6740 = vmatprep.subr.bf16.mxu0 %v7145_v31  ;;  %v1028_v40 = vsel %vm944_vm1, %v1023_v32, %v1027_v29  ;;  %v1071_v38 = vor.u32 %v1069_v13, %v1067_v12  ;;  %v7187_v13 = vld [vmem:[%s7600_s20 + $0x38] sm:$0xff]  }
  0x9a   : > { %6685 = vmatpush3.bf16.msra.mxu1 %v7130_v20  ;;  %v1012_v19 = vsel %vm944_vm1, %v1007_v10, %v1011_v8  ;;  %v1612_v20 = vsel %vm1591_vm0, %v1609_v58, %v1611_v11  ;;  %v1036_v44 = vsel %vm944_vm1, %v1031_v35, %v1035_v36  ;;  %v1057_v58 = vshll.u32 %v7159_v48, 16  ;;  %v7702_v10 = vld [vmem:[%s7600_s20 + $0x88] sm:$0xff]   ;;  %v7176_v48 = vld [vmem:[%s7600_s20 + $0x10] sm:$0xff]  }
  0x9b   : > { %6686 = vmatprep.subr.bf16.mxu1 %v7136_v37  ;;  %v1081_v22 = vshll.u32 %v7702_v10, 16 }
  0x9c   : > { %6741 = vmatpush3.bf16.msra.mxu0 %v7145_v31  ;;  %v7171_v31 = vld [vmem:[#allocation6 + $0x100] sm:$0xff]  }
  0x9d   : > { %6599 = vmatmul.mubr.bf16.gmra.mxu1 %v980_v42  ;;  %6655 = vmatmul.mubr.bf16.gmra.mxu0 %v1604_v43  ;;  %v1037_v42 = vshrl.u32 %v7152_v15, 16  ;;  %v1049_v43 = vshll.u32 %v7157_v34, 16  ;;  %v7167_v15 = vld [vmem:[%s7600_s20 + $0x90] ss:$0 sps:$4 sm:$0x11]  }
  0x9e   : > { %6602 = vmatprep.mubr.bf16.mxu1 %v988_v46  ;;  %6687 = vmatpush3.bf16.msra.mxu1 %v7136_v37  ;;  %v1617_v37 = vrot.slane %v7154_v27, 1  ;;  %v1045_v46 = vshrl.u32 %v7153_v30, 16  ;;  %v7170_v27 = vld [vmem:[%s7600_s20 + $0x90] ss:$0 sps:$4 sm:$0x11]   ;;  %v1627_v35 = vrot.slane %v7167_v15, 1 }
  0x9f   : > { %6658 = vmatprep.mubr.bf16.mxu0 %v1606_v50  ;;  %6688 = vmatprep.subr.bf16.mxu1 %v7142_v45  ;;  %v1619_v50 = vrot.slane %v7155_v39, 1  ;;  %v1039_v52 = vor.u32 %v1037_v42, %v1035_v36  ;;  %v1051_v53 = vrot.slane %v1049_v43, 1  ;;  %v1083_v36 = vrot.slane %v1081_v22, 1  ;;  %v7185_v15 = vld [vmem:[#allocation6 + $0x1b0] sm:$0xff]  }
  0xa0   : > { %6742 = vmatprep.subr.bf16.mxu0 %v7151_v51  ;;  %v1047_v55 = vor.u32 %v1045_v46, %v1043_v49  ;;  %v2717_v22 = vshrl.u32 %v7187_v13, 16 }
  0xa1   : > { %6743 = vmatpush3.bf16.msra.mxu0 %v7151_v51  ;;  %v1053_v51 = vshrl.u32 %v7157_v34, 16  ;;  %v1622_v4 = vsel %vm1591_vm0, %v1619_v50, %v1621_v56 }
  0xa2   : > { %6689 = vmatpush3.bf16.msra.mxu1 %v7142_v45  ;;  %6744 = vmatprep.subr.bf16.mxu0 %v7158_v62  ;;  %v1618_v45 = vsel %vm1591_vm0, %v1615_v33, %v1617_v37  ;;  %v1052_v3 = vsel %vm944_vm1, %v1047_v55, %v1051_v53  ;;  %v7180_v33 = vld [vmem:[%s7600_s20 + $0x20] sm:$0xff]  }
  0xa3   : > { %6690 = vmatprep.subr.bf16.mxu1 %v7149_v59  ;;  %v1055_v8 = vor.u32 %v1053_v51, %v1051_v53  ;;  %v2693_v46 = vshll.u32 %v7180_v33, 16  ;;  %v7175_v53 = vld [vmem:[%s7600_s20 + $0x8] sm:$0xfe]  }
  0xa5   : > { %6603 = vmatmul.mubr.bf16.gmra.mxu1 %v996_v63  ;;  %6659 = vmatmul.mubr.bf16.gmra.mxu0 %v1608_v0  ;;  %v1044_v63 = vsel %vm944_vm1, %v1039_v52, %v1043_v49  ;;  %v1620_v0 = vsel %vm1591_vm0, %v1617_v37, %v1619_v50  ;;  %v1085_v37 = vshrl.u32 %v7702_v10, 16 }
  0xa6   : > { %6606 = vmatprep.mubr.bf16.mxu1 %v1004_v5  ;;  %6662 = vmatprep.mubr.bf16.mxu0 %v1610_v6  ;;  %v7172_v5 = vld [vmem:[%s7600_s20 + $0x8] sm:$0xfe]   ;;  %v1059_v6 = vrot.slane %v1057_v58, 1  ;;  %v2695_v58 = vrot.slane %v2693_v46, 2  ;;  %v7189_v46 = vld [vmem:[%s7600_s20 + $0x38] sm:$0xff]  }
  0xa7   : > { %6691 = vmatpush3.bf16.msra.mxu1 %v7149_v59  ;;  %6745 = vmatpush3.bf16.msra.mxu0 %v7158_v62  ;;  %v7686_v59 = vld [vmem:[%s7600_s20 + $0x88] sm:$0xff]   ;;  %v7690_v62 = vld [vmem:[#allocation6 + $0x1b8] sm:$0xff]  }
  0xa8   : > { %6692 = vmatprep.subr.bf16.mxu1 %v7156_v7  ;;  %6746 = vmatprep.subr.bf16.mxu0 %v7165_v17  ;;  %v1063_v11 = vor.u32 %v1061_v61, %v1059_v6  ;;  %v1625_v14 = vrot.slane %v7686_v59, 1  ;;  %v2699_v61 = vshrl.u32 %v7181_v47, 16 }
  0xaa   : > { %v1626_v25 = vsel %vm1591_vm0, %v1623_v9, %v1625_v14  ;;  %v1628_v50 = vsel %vm1591_vm0, %v1625_v14, %v1627_v35  ;;  %v7197_v35 = vld [vmem:[%s7600_s20 + $0x50] sm:$0xff]  }
  0xab   : > { %6693 = vmatpush3.bf16.msra.mxu1 %v7156_v7  ;;  %6747 = vmatpush3.bf16.msra.mxu0 %v7165_v17  ;;  %v7164_v7 = vld [vmem:[%s7600_s20 + $0x80] sm:$0xff]   ;;  %v2667_v17 = vshll.u32 %v7172_v5, 16 }
  0xac   : > { %6694 = vmatprep.subr.bf16.mxu1 %v7162_v16  ;;  %6748 = vmatprep.subr.bf16.mxu0 %v7171_v31  ;;  %v1073_v21 = vshll.u32 %v7164_v7, 16  ;;  %v1077_v26 = vshrl.u32 %v7164_v7, 16  ;;  %v7177_v7 = vld [vmem:[%s7600_s20 + $0x18] sm:$0xff]  }
  0xad   : > { %6607 = vmatmul.mubr.bf16.gmra.mxu1 %v1012_v19  ;;  %6663 = vmatmul.mubr.bf16.gmra.mxu0 %v1612_v20  ;;  %v2675_v19 = vshll.u32 %v7173_v2, 16  ;;  %v1060_v20 = vsel %vm944_vm1, %v1055_v8, %v1059_v6  ;;  %v2669_v30 = vrot.slane %v2667_v17, 2  ;;  %v2127_v2 = vrot.slane %v7175_v53, 1 }
  0xae   : > { %6610 = vmatprep.mubr.bf16.mxu1 %v1020_v23  ;;  %6666 = vmatprep.mubr.bf16.mxu0 %v1614_v24  ;;  %v1624_v23 = vsel %vm1591_vm0, %v1621_v56, %v1623_v9  ;;  %v1068_v24 = vsel %vm944_vm1, %v1063_v11, %v1067_v12  ;;  %v1075_v34 = vrot.slane %v1073_v21, 1  ;;  %v7186_v56 = vld [vmem:[%s7600_s20 + $0x30] sm:$0xff]   ;;  %v2701_v8 = vrot.slane %v2699_v61, 1  ;;  %v7725_v9 = vld [vmem:[%s7600_s20 + $0x20] sm:$0xff]  }
  0xaf   : > { %6695 = vmatpush3.bf16.msra.mxu1 %v7162_v16  ;;  %6749 = vmatpush3.bf16.msra.mxu0 %v7171_v31  ;;  %v2664_v16 = vshrl.u32 %v7172_v5, 16  ;;  %v2674_v31 = vrot.slane %v2672_v18, 1  ;;  %v2677_v32 = vrot.slane %v2675_v19, 2  ;;  %v2711_v5 = vshll.u32 %v7186_v56, 16  ;;  %v7191_v18 = vld [vmem:[%s7600_s20 + $0x40] sm:$0xff]  }
  0xb0   : > { %6696 = vmatprep.subr.bf16.mxu1 %v7169_v28  ;;  %6838 = vmatprep.subr.bf16.mxu0 %v7690_v62  ;;  %v1076_v49 = vsel %vm944_vm1, %v1071_v38, %v1075_v34  ;;  %v7743_v38 = vld [vmem:[%s7600_s20 + $0x30] sm:$0xff]   ;;  %v7202_v61 = vld [vmem:[%s7600_s20 + $0x60] sm:$0xff]  }
  0xb1   : > { %v2666_v29 = vrot.slane %v2664_v16, 1  ;;  %v2678_v43 = vor.u32 %v2677_v32, %v2674_v31  ;;  %v2713_v17 = vrot.slane %v2711_v5, 2 }
  0xb3   : > { %6697 = vmatpush3.bf16.msra.mxu1 %v7169_v28  ;;  %v7174_v28 = vld [vmem:[%s7600_s20 + $0x18] sm:$0xff]   ;;  %v2670_v42 = vor.u32 %v2669_v30, %v2666_v29  ;;  %v7193_v29 = vld [vmem:[%s7600_s20 + $0x48] sm:$0xff]  }
  0xb4   : > { %6786 = vmatprep.subr.bf16.mxu1 %v7688_v60  ;;  %v2681_v39 = vshrl.u32 %v7174_v28, 16  ;;  %v7183_v30 = vld [vmem:[%s7600_s20 + $0x28] sm:$0xff]  }
  0xb5   : > { %6611 = vmatmul.mubr.bf16.gmra.mxu1 %v1028_v40  ;;  %6667 = vmatmul.mubr.bf16.gmra.mxu0 %v1616_v41  ;;  %v2684_v40 = vshll.u32 %v7174_v28, 16  ;;  %v1079_v41 = vor.u32 %v1077_v26, %v1075_v34  ;;  %v2679_v55 = vsel %vm2662_vm2, %v2670_v42, %v2678_v43  ;;  %v2726_v26 = vshrl.u32 %v7191_v18, 16 }
  0xb6   : > { %6614 = vmatprep.mubr.bf16.mxu1 %v1036_v44  ;;  %6670 = vmatprep.mubr.bf16.mxu0 %v1618_v45  ;;  %v1089_v44 = vshll.u32 %v7170_v27, 16  ;;  %v2690_v45 = vshrl.u32 %v7180_v33, 16  ;;  %v2683_v51 = vrot.slane %v2681_v39, 1  ;;  %v7192_v27 = vld [vmem:[#allocation6 + $0x1a8] sm:$0xff]   ;;  %v2729_v28 = vshll.u32 %v7191_v18, 16 }
  0xb7   : > { %v2686_v52 = vrot.slane %v2684_v40, 2  ;;  %v1084_v54 = vsel %vm944_vm1, %v1079_v41, %v1083_v36  ;;  %v2719_v33 = vrot.slane %v2717_v22, 1  ;;  %v2728_v39 = vrot.slane %v2726_v26, 1  ;;  %v7210_v26 = vld [vmem:[#allocation6 + $0x150] sm:$0xff]  }
  0xb8   : > { %v2692_v57 = vrot.slane %v2690_v45, 1  ;;  %v1091_v59 = vrot.slane %v1089_v44, 1  ;;  %v2731_v40 = vrot.slane %v2729_v28, 2  ;;  %v2735_v41 = vshrl.u32 %v7193_v29, 16  ;;  %v7199_v44 = vld [vmem:[#allocation6 + $0x1a0] sm:$0xff]  }
  0xb9   : > { %v2687_v1 = vor.u32 %v2686_v52, %v2683_v51  ;;  %v2738_v42 = vshll.u32 %v7193_v29, 16  ;;  %v7749_v51 = vld [vmem:[%s7600_s20 + $0x40] sm:$0xff]  }
  0xba   : > { %v2696_v6 = vor.u32 %v2695_v58, %v2692_v57  ;;  %v2732_v52 = vor.u32 %v2731_v40, %v2728_v39  ;;  %v2737_v53 = vrot.slane %v2735_v41, 1  ;;  %v7209_v39 = vld [vmem:[%s7600_s20 + $0x78] sm:$0xff]  }
  0xbb   : > { %v2688_v11 = vsel %vm2662_vm2, %v2678_v43, %v2687_v1  ;;  %v2134_v43 = vrot.slane %v7183_v30, 1 }
  0xbc   : > { %v2697_v19 = vsel %vm2662_vm2, %v2687_v1, %v2696_v6 }
  0xbd   : > { %6615 = vmatmul.mubr.bf16.gmra.mxu1 %v1044_v63  ;;  %6671 = vmatmul.mubr.bf16.gmra.mxu0 %v1620_v0  ;;  %v2702_v63 = vshll.u32 %v7181_v47, 16  ;;  %v1087_v0 = vor.u32 %v1085_v37, %v1083_v36  ;;  %v7190_v47 = vld [vmem:[#allocation6 + $0x168] sm:$0xff]  }
  0xbe   : > { %6618 = vmatprep.mubr.bf16.mxu1 %v1052_v3  ;;  %6674 = vmatprep.mubr.bf16.mxu0 %v1622_v4  ;;  %v2128_v3 = vrot.slane %v7176_v48, 1  ;;  %v2708_v4 = vshrl.u32 %v7186_v56, 16  ;;  %v2744_v48 = vshrl.u32 %v7197_v35, 16 }
  0xbf   : > { %v1092_v10 = vsel %vm944_vm1, %v1087_v0, %v1091_v59  ;;  %v2704_v12 = vrot.slane %v2702_v63, 2  ;;  %v7198_v59 = vld [vmem:[%s7600_s20 + $0x58] sm:$0xff]   ;;  %v2138_v0 = vrot.slane %v7189_v46, 1 }
  0xc0   : > { %v2129_v14 = vsel %vm1591_vm0, %v2127_v2, %v2128_v3  ;;  %v2710_v16 = vrot.slane %v2708_v4, 1  ;;  %v2746_v57 = vrot.slane %v2744_v48, 1  ;;  %v7205_v2 = vld [vmem:[#allocation6 + $0x198] sm:$0xff]   ;;  %v7195_v4 = vld [vmem:[%s7600_s20 + $0x48] sm:$0xff]  }
  0xc1   : > { %v2705_v21 = vor.u32 %v2704_v12, %v2701_v8  ;;  %v7203_v8 = vld [vmem:[#allocation6 + $0x158] sm:$0xff]   ;;  %v2765_v12 = vshll.u32 %v7202_v61, 16 }
  0xc3   : > { %v2706_v32 = vsel %vm2662_vm2, %v2696_v6, %v2705_v21  ;;  %v2753_v6 = vshrl.u32 %v7198_v59, 16 }
  0xc5   : > { %6619 = vmatmul.mubr.bf16.gmra.mxu1 %v1060_v20  ;;  %6675 = vmatmul.mubr.bf16.gmra.mxu0 %v1624_v23  ;;  %v2130_v20 = vrot.slane %v7177_v7, 1  ;;  %v2720_v23 = vshll.u32 %v7187_v13, 16  ;;  %v2756_v7 = vshll.u32 %v7198_v59, 16  ;;  %v2142_v13 = vrot.slane %v7195_v4, 1 }
  0xc6   : > { %6622 = vmatprep.mubr.bf16.mxu1 %v1068_v24  ;;  %6678 = vmatprep.mubr.bf16.mxu0 %v1626_v25  ;;  %v2132_v24 = vrot.slane %v7725_v9, 1  ;;  %v2714_v25 = vor.u32 %v2713_v17, %v2710_v16  ;;  %v7212_v9 = vld [vmem:[#allocation6 + $0x190] sm:$0xff]  }
  0xc7   : > { %v2131_v31 = vsel %vm1591_vm0, %v2128_v3, %v2130_v20  ;;  %v2722_v34 = vrot.slane %v2720_v23, 2  ;;  %v2140_v3 = vrot.slane %v7749_v51, 1  ;;  %v7208_v16 = vld [vmem:[%s7600_s20 + $0x70] sm:$0xff]   ;;  %v2792_v51 = vshll.u32 %v7209_v39, 16 }
  0xc8   : > { %v2133_v36 = vsel %vm1591_vm0, %v2130_v20, %v2132_v24  ;;  %v2715_v37 = vsel %vm2662_vm2, %v2705_v21, %v2714_v25  ;;  %v2758_v20 = vrot.slane %v2756_v7, 2  ;;  %v7767_v21 = vld [vmem:[%s7600_s20 + $0x58] sm:$0xff]  }
  0xc9   : > { %v2723_v45 = vor.u32 %v2722_v34, %v2719_v33  ;;  %v2141_v22 = vsel %vm1591_vm0, %v2138_v0, %v2140_v3  ;;  %v2783_v34 = vshll.u32 %v7208_v16, 16  ;;  %v2143_v40 = vsel %vm1591_vm0, %v2140_v3, %v2142_v13 }
  0xcb   : > { %v2724_v56 = vsel %vm2662_vm2, %v2714_v25, %v2723_v45  ;;  %v2733_v1 = vsel %vm2662_vm2, %v2723_v45, %v2732_v52  ;;  %v2767_v25 = vrot.slane %v2765_v12, 2 }
  0xcd   : > { %6623 = vmatmul.mubr.bf16.gmra.mxu1 %v1076_v49  ;;  %6679 = vmatmul.mubr.bf16.gmra.mxu0 %v1628_v50  ;;  %v2747_v49 = vshll.u32 %v7197_v35, 16  ;;  %v2136_v50 = vrot.slane %v7743_v38, 1  ;;  %v7216_v35 = vld [vmem:[#allocation6 + $0x148] sm:$0xff]  }
  0xce   : > { %6626 = vmatprep.mubr.bf16.mxu1 %v1084_v54  ;;  %6750 = vmatprep.mubr.bf16.mxu0 %v2679_v55  ;;  %v2740_v54 = vrot.slane %v2738_v42, 2  ;;  %v7196_v55 = vld [vmem:[#allocation6 + $0x160] sm:$0xff]  }
  0xcf   : > { %v2749_v58 = vrot.slane %v2747_v49, 2  ;;  %v2137_v63 = vsel %vm1591_vm0, %v2134_v43, %v2136_v50  ;;  %v2139_v17 = vsel %vm1591_vm0, %v2136_v50, %v2138_v0  ;;  %v7223_v49 = vld [vmem:[#allocation6 + $0x140] sm:$0xff]   ;;  %v2789_v50 = vshrl.u32 %v7209_v39, 16 }
  0xd0   : > { %v2741_v5 = vor.u32 %v2740_v54, %v2737_v53  ;;  %v7783_v54 = vld [vmem:[#allocation6 + $0x238] sm:$0xff]  }
  0xd1   : > { %v2791_v59 = vrot.slane %v2789_v50, 1  ;;  %v7230_v50 = vld [vmem:[%s7600_s20 + $0x10] sm:$0xff]  }
  0xd2   : > { %v2742_v18 = vsel %vm2662_vm2, %v2732_v52, %v2741_v5 }
  0xd5   : > { %6627 = vmatmul.mubr.bf16.gmra.mxu1 %v1092_v10  ;;  %6751 = vmatmul.mubr.bf16.vlgmr.msra.gmra.mxu0 %v2688_v11  ;;  %v2750_v10 = vor.u32 %v2749_v58, %v2746_v57  ;;  %v2762_v11 = vshrl.u32 %v7202_v61, 16  ;;  %v7787_v58 = vld [vmem:[#allocation6 + $0x1f8] sm:$0xff]   ;;  %v2794_v61 = vrot.slane %v2792_v51, 2 }
  0xd6   : > { %6698 = vmatprep.mubr.bf16.mxu1 %v2129_v14  ;;  %6839 = vmatpush3.bf16.msra.mxu0 %v7690_v62  ;;  %v7184_v62 = vld [vmem:[#allocation6 + $0x170] sm:$0xff]  }
  0xd7   : > { %6754 = vmatprep.mubr.bf16.mxu0 %v2697_v19  ;;  %6840 = vmatprep.subr.bf16.mxu0 %v7185_v15  ;;  %v7760_v14 = vld [vmem:[%s7600_s20 + $0x50] sm:$0xff]   ;;  %v2755_v19 = vrot.slane %v2753_v6, 1  ;;  %v2751_v23 = vsel %vm2662_vm2, %v2741_v5, %v2750_v10 }
  0xd8   : > { %v2144_v28 = vrot.slane %v7760_v14, 1  ;;  %v7220_v6 = vld [vmem:[%s7600_s20 + $0x90] sm:$0xff]  }
  0xd9   : > { %v2819_v14 = vshll.u32 %v7220_v6, 16 }
  0xda   : > { %6841 = vmatpush3.bf16.msra.mxu0 %v7185_v15  ;;  %v7204_v15 = vld [vmem:[%s7600_s20 + $0x68] sm:$0xff]  }
  0xdb   : > { %6842 = vmatprep.subr.bf16.mxu0 %v7192_v27  ;;  %v2771_v29 = vshrl.u32 %v7204_v15, 16  ;;  %v2774_v30 = vshll.u32 %v7204_v15, 16  ;;  %v7221_v15 = vld [vmem:[%s7600_s20 + $0x98] ss:$0 sps:$4 sm:$0x33]  }
  0xdd   : > { %6699 = vmatmul.mubr.bf16.vlgmr.msra.gmra.mxu1 %v2131_v31  ;;  %6755 = vmatmul.mubr.bf16.gmra.mxu0 %v2706_v32  ;;  %v2780_v31 = vshrl.u32 %v7208_v16, 16  ;;  %v2759_v32 = vor.u32 %v2758_v20, %v2755_v19  ;;  %v2773_v38 = vrot.slane %v2771_v29, 1  ;;  %v2776_v42 = vrot.slane %v2774_v30, 2  ;;  %v7213_v16 = vld [vmem:[%s7600_s20 + $0x78] sm:$0xff]  }
  0xde   : > { %6787 = vmatpush3.bf16.msra.mxu1 %v7688_v60  ;;  %6702 = vmatprep.mubr.bf16.mxu1 %v2133_v36  ;;  %v2135_v60 = vsel %vm1591_vm0, %v2132_v24, %v2134_v43  ;;  %v2764_v24 = vrot.slane %v2762_v11, 1  ;;  %v2146_v36 = vrot.slane %v7767_v21, 1  ;;  %v7214_v43 = vld [vmem:[%s7600_s20 + $0x80] sm:$0xff]   ;;  %v2828_v29 = vshll.u32 %v7221_v15, 16 }
  0xdf   : > { %6788 = vmatprep.subr.bf16.mxu1 %v7184_v62  ;;  %6758 = vmatprep.mubr.bf16.mxu0 %v2715_v37  ;;  %v7225_v37 = vld [vmem:[#allocation6 + $0x180] sm:$0xff]   ;;  %v2760_v41 = vsel %vm2662_vm2, %v2750_v10, %v2759_v32  ;;  %v2782_v46 = vrot.slane %v2780_v31, 1  ;;  %v2777_v52 = vor.u32 %v2776_v42, %v2773_v38  ;;  %v2798_v53 = vshrl.u32 %v7214_v43, 16 }
  0xe0   : > { %6843 = vmatpush3.bf16.msra.mxu0 %v7192_v27  ;;  %v7219_v27 = vld [vmem:[#allocation6 + $0x188] sm:$0xff]   ;;  %v2768_v33 = vor.u32 %v2767_v25, %v2764_v24  ;;  %v2801_v57 = vshll.u32 %v7214_v43, 16  ;;  %v2821_v25 = vrot.slane %v2819_v14, 2  ;;  %v7238_v14 = vld [vmem:[#allocation6 + $0x1f0] sm:$0xff]  }
  0xe1   : > { %6844 = vmatprep.subr.bf16.mxu0 %v7199_v44 }
  0xe2   : > { %6789 = vmatpush3.bf16.msra.mxu1 %v7184_v62  ;;  %v7773_v62 = vld [vmem:[%s7600_s20 + $0x60] sm:$0xff]   ;;  %v2769_v45 = vsel %vm2662_vm2, %v2759_v32, %v2768_v33  ;;  %v2778_v0 = vsel %vm2662_vm2, %v2768_v33, %v2777_v52  ;;  %v2803_v5 = vrot.slane %v2801_v57, 2  ;;  %v7218_v32 = vld [vmem:[%s7600_s20 + $0x88] sm:$0xff]   ;;  %v7222_v33 = vld [vmem:[%s7600_s20 + $0x90] sm:$0xff]  }
  0xe3   : > { %6790 = vmatprep.subr.bf16.mxu1 %v7190_v47  ;;  %v2148_v48 = vrot.slane %v7773_v62, 1  ;;  %v2160_v43 = vrot.slane %v7222_v33, 1 }
  0xe4   : > { %6845 = vmatpush3.bf16.msra.mxu0 %v7199_v44  ;;  %v2145_v44 = vsel %vm1591_vm0, %v2142_v13, %v2144_v28  ;;  %v2816_v13 = vshrl.u32 %v7220_v6, 16 }
  0xe5   : > { %6703 = vmatmul.mubr.bf16.gmra.mxu1 %v2135_v60  ;;  %6759 = vmatmul.mubr.bf16.gmra.mxu0 %v2724_v56  ;;  %v7211_v56 = vld [vmem:[%s7600_s20 + $0x70] sm:$0xff]   ;;  %v2149_v3 = vsel %vm1591_vm0, %v2146_v36, %v2148_v48 }
  0xe6   : > { %6706 = vmatprep.mubr.bf16.mxu1 %v2137_v63  ;;  %6791 = vmatpush3.bf16.msra.mxu1 %v7190_v47  ;;  %v2785_v47 = vrot.slane %v2783_v34, 2  ;;  %v2147_v63 = vsel %vm1591_vm0, %v2144_v28, %v2146_v36  ;;  %v2818_v24 = vrot.slane %v2816_v13, 1  ;;  %v2830_v36 = vrot.slane %v2828_v29, 2 }
  0xe7   : > { %6762 = vmatprep.mubr.bf16.mxu0 %v2733_v1  ;;  %6792 = vmatprep.subr.bf16.mxu1 %v7196_v55  ;;  %v2800_v1 = vrot.slane %v2798_v53, 1  ;;  %v7229_v53 = vld [vmem:[%s7600_s20 + $0x8] sm:$0xfc]  }
  0xe8   : > { %6846 = vmatprep.subr.bf16.mxu0 %v7205_v2  ;;  %v2786_v60 = vor.u32 %v2785_v47, %v2782_v46  ;;  %v2822_v31 = vor.u32 %v2821_v25, %v2818_v24  ;;  %v7224_v46 = vld [vmem:[%s7600_s20 + $0x98] ss:$0 sps:$4 sm:$0x11]   ;;  %v7228_v47 = vld [vmem:[%s7600_s20 + $0x20] sm:$0xff]   ;;  %v3332_v57 = vrot.slane %v7229_v53, 2  ;;  %v7244_v25 = vld [vmem:[#allocation6 + $0x1e8] sm:$0xff]  }
  0xe9   : > { %6847 = vmatpush3.bf16.msra.mxu0 %v7205_v2  ;;  %v7215_v2 = vld [vmem:[%s7600_s20 + $0x88] sm:$0xff]   ;;  %v2804_v12 = vor.u32 %v2803_v5, %v2800_v1  ;;  %v7239_v5 = vld [vmem:[#allocation6 + $0x230] sm:$0xff]  }
  0xea   : > { %6793 = vmatpush3.bf16.msra.mxu1 %v7196_v55  ;;  %6848 = vmatprep.subr.bf16.mxu0 %v7212_v9  ;;  %v7207_v55 = vld [vmem:[%s7600_s20 + $0x68] sm:$0xff]   ;;  %v2787_v4 = vsel %vm2662_vm2, %v2777_v52, %v2786_v60  ;;  %v2807_v10 = vshrl.u32 %v7215_v2, 16  ;;  %v2810_v11 = vshll.u32 %v7215_v2, 16 }
  0xeb   : > { %6794 = vmatprep.subr.bf16.mxu1 %v7203_v8  ;;  %v2150_v7 = vrot.slane %v7207_v55, 1  ;;  %v7234_v55 = vld [vmem:[%s7600_s20 + $0x28] sm:$0xff]  }
  0xec   : > { %v2809_v20 = vrot.slane %v2807_v10, 1  ;;  %v2812_v21 = vrot.slane %v2810_v11, 2  ;;  %v7246_v11 = vld [vmem:[#allocation6 + $0x228] sm:$0xff]  }
  0xed   : > { %6707 = vmatmul.mubr.bf16.gmra.mxu1 %v2139_v17  ;;  %6763 = vmatmul.mubr.bf16.gmra.mxu0 %v2742_v18  ;;  %v7217_v17 = vld [vmem:[%s7600_s20 + $0x80] sm:$0xff]   ;;  %v2151_v18 = vsel %vm1591_vm0, %v2148_v48, %v2150_v7 }
  0xee   : > { %6710 = vmatprep.mubr.bf16.mxu1 %v2141_v22  ;;  %6766 = vmatprep.mubr.bf16.mxu0 %v2751_v23  ;;  %v2813_v28 = vor.u32 %v2812_v21, %v2809_v20  ;;  %v2156_v30 = vrot.slane %v7217_v17, 1  ;;  %v7241_v17 = vld [vmem:[%s7600_s20 + $0x40] sm:$0xff]   ;;  %v7245_v20 = vld [vmem:[%s7600_s20 + $0x48] sm:$0xff]  }
  0xef   : > { %6795 = vmatpush3.bf16.msra.mxu1 %v7203_v8  ;;  %6849 = vmatpush3.bf16.msra.mxu0 %v7212_v9  ;;  %v2152_v8 = vrot.slane %v7211_v56, 1  ;;  %v2795_v9 = vor.u32 %v2794_v61, %v2791_v59  ;;  %v3870_v56 = vrot.slane %v7228_v47, 2  ;;  %v3333_v59 = vrot.slane %v7230_v50, 2  ;;  %v7231_v61 = vld [vmem:[%s7600_s20 + $0x18] sm:$0xff]   ;;  %v7253_v21 = vld [vmem:[#allocation6 + $0x220] sm:$0xff]  }
  0xf0   : > { %6796 = vmatprep.subr.bf16.mxu1 %v7210_v26  ;;  %6850 = vmatprep.subr.bf16.mxu0 %v7219_v27  ;;  %v2823_v39 = vsel %vm2662_vm2, %v2813_v28, %v2822_v31  ;;  %v7249_v47 = vld [vmem:[%s7600_s20 + $0x48] sm:$0xff]   ;;  %v7252_v50 = vld [vmem:[%s7600_s20 + $0x60] sm:$0xff]  }
  0xf1   : > { %v2796_v19 = vsel %vm2662_vm2, %v2786_v60, %v2795_v9  ;;  %v2153_v22 = vsel %vm1591_vm0, %v2150_v7, %v2152_v8  ;;  %v2805_v23 = vsel %vm2662_vm2, %v2795_v9, %v2804_v12  ;;  %v2162_v60 = vrot.slane %v7224_v46, 1  ;;  %v7240_v7 = vld [vmem:[%s7600_s20 + $0x38] sm:$0xff]  }
  0xf2   : > { %v3876_v13 = vrot.slane %v7240_v7, 2  ;;  %v7270_v7 = vld [vmem:[#allocation6 + $0x1c8] sm:$0xff]  }
  0xf3   : > { %6797 = vmatpush3.bf16.msra.mxu1 %v7210_v26  ;;  %6851 = vmatpush3.bf16.msra.mxu0 %v7219_v27  ;;  %v2825_v26 = vshrl.u32 %v7221_v15, 16  ;;  %v2154_v27 = vrot.slane %v7213_v16, 1  ;;  %v2163_v1 = vsel %vm1591_vm0, %v2160_v43, %v2162_v60  ;;  %v7254_v60 = vld [vmem:[%s7600_s20 + $0x50] sm:$0xff]  }
  0xf4   : > { %6798 = vmatprep.subr.bf16.mxu1 %v7216_v35  ;;  %6852 = vmatprep.subr.bf16.mxu0 %v7225_v37 }
  0xf5   : > { %6711 = vmatmul.mubr.bf16.gmra.mxu1 %v2143_v40  ;;  %6767 = vmatmul.mubr.bf16.gmra.mxu0 %v2760_v41  ;;  %v2827_v62 = vrot.slane %v2825_v26, 1  ;;  %v2155_v34 = vsel %vm1591_vm0, %v2152_v8, %v2154_v27  ;;  %v2157_v38 = vsel %vm1591_vm0, %v2154_v27, %v2156_v30  ;;  %v7226_v40 = vld [vmem:[%s7600_s20 + $0x10] sm:$0xfc]   ;;  %v2158_v41 = vrot.slane %v7218_v32, 1  ;;  %v7243_v27 = vld [vmem:[%s7600_s20 + $0x38] sm:$0xff]   ;;  %v7250_v32 = vld [vmem:[#allocation6 + $0x1e0] sm:$0xff]  }
  0xf6   : > { %6714 = vmatprep.mubr.bf16.mxu1 %v2145_v44  ;;  %6770 = vmatprep.mubr.bf16.mxu0 %v2769_v45  ;;  %v3867_v44 = vrot.slane %v7226_v40, 2  ;;  %v3335_v8 = vrot.slane %v7231_v61, 2  ;;  %v3880_v26 = vrot.slane %v7245_v20, 2  ;;  %v7266_v40 = vld [vmem:[#allocation6 + $0x210] sm:$0xff]   ;;  %v7277_v20 = vld [vmem:[#allocation6 + $0x1c0] sm:$0xff]  }
  0xf7   : > { %6799 = vmatpush3.bf16.msra.mxu1 %v7216_v35  ;;  %6853 = vmatpush3.bf16.msra.mxu0 %v7225_v37  ;;  %v2814_v35 = vsel %vm2662_vm2, %v2804_v12, %v2813_v28  ;;  %v7227_v37 = vld [vmem:[%s7600_s20 + $0x18] sm:$0xff]   ;;  %v2831_v42 = vor.u32 %v2830_v36, %v2827_v62  ;;  %v2159_v48 = vsel %vm1591_vm0, %v2156_v30, %v2158_v41  ;;  %v7237_v12 = vld [vmem:[%s7600_s20 + $0x28] sm:$0xff]   ;;  %v7247_v28 = vld [vmem:[%s7600_s20 + $0x50] sm:$0xff]  }
  0xf8   : > { %6800 = vmatprep.subr.bf16.mxu1 %v7223_v49  ;;  %6942 = vmatprep.subr.bf16.mxu0 %v7783_v54  ;;  %v3868_v45 = vrot.slane %v7227_v37, 2  ;;  %v2161_v51 = vsel %vm1591_vm0, %v2158_v41, %v2160_v43  ;;  %v3336_v15 = vsel %vm3331_vm3, %v3333_v59, %v3335_v8  ;;  %v7848_v62 = vld [vmem:[%s7600_s20 + $0x58] sm:$0xff]   ;;  %v3343_v37 = vrot.slane %v7243_v27, 2 }
  0xf9   : > { %v3884_v43 = vrot.slane %v7848_v62, 2 }
  0xfa   : > { %v3869_v52 = vsel %vm3331_vm3, %v3867_v44, %v3868_v45  ;;  %v3871_v2 = vsel %vm3331_vm3, %v3868_v45, %v3870_v56  ;;  %v7257_v44 = vld [vmem:[#allocation6 + $0x1d8] sm:$0xff]  }
  0xfb   : > { %6801 = vmatpush3.bf16.msra.mxu1 %v7223_v49  ;;  %v2832_v49 = vsel %vm2662_vm2, %v2822_v31, %v2831_v42 }
  0xfc   : > { %6890 = vmatprep.subr.bf16.mxu1 %v7787_v58 }
  0xfd   : > { %6715 = vmatmul.mubr.bf16.gmra.mxu1 %v2147_v63  ;;  %6771 = vmatmul.mubr.bf16.gmra.mxu0 %v2778_v0  ;;  %v3872_v63 = vrot.slane %v7234_v55, 2  ;;  %v7235_v0 = vld [vmem:[%s7600_s20 + $0x30] sm:$0xff]  }
  0xfe   : > { %6718 = vmatprep.mubr.bf16.mxu1 %v2149_v3  ;;  %6774 = vmatprep.mubr.bf16.mxu0 %v2787_v4  ;;  %v7236_v3 = vld [vmem:[%s7600_s20 + $0x20] sm:$0xff]   ;;  %v3334_v4 = vsel %vm3331_vm3, %v3332_v57, %v3333_v59  ;;  %v3874_v9 = vrot.slane %v7235_v0, 2  ;;  %v7264_v57 = vld [vmem:[#allocation6 + $0x1d0] sm:$0xff]   ;;  %v7273_v59 = vld [vmem:[#allocation6 + $0x208] sm:$0xff]   ;;  %v3347_v0 = vrot.slane %v7249_v47, 2 }
  0xff   : > { %v3873_v6 = vsel %vm3331_vm3, %v3870_v56, %v3872_v63  ;;  %v3337_v10 = vrot.slane %v7236_v3, 2  ;;  %v7256_v56 = vld [vmem:[%s7600_s20 + $0x68] sm:$0xff]  }
 0x100   : > { %v3875_v16 = vsel %vm3331_vm3, %v3872_v63, %v3874_v9 }
 0x105   : > { %6719 = vmatmul.mubr.bf16.gmra.mxu1 %v2151_v18  ;;  %6775 = vmatmul.mubr.bf16.gmra.mxu0 %v2796_v19  ;;  %v3338_v18 = vsel %vm3331_vm3, %v3335_v8, %v3337_v10  ;;  %v7242_v19 = vld [vmem:[%s7600_s20 + $0x30] sm:$0xff]   ;;  %v7279_v8 = vld [vmem:[#allocation6 + $0x200] sm:$0xff]  }
 0x106   : > { %6722 = vmatprep.mubr.bf16.mxu1 %v2153_v22  ;;  %6778 = vmatprep.mubr.bf16.mxu0 %v2805_v23  ;;  %v3339_v22 = vrot.slane %v7237_v12, 2  ;;  %v3878_v23 = vrot.slane %v7241_v17, 2  ;;  %v3341_v24 = vrot.slane %v7242_v19, 2  ;;  %v7260_v12 = vld [vmem:[%s7600_s20 + $0x60] sm:$0xff]  }
 0x108   : > { %v3340_v29 = vsel %vm3331_vm3, %v3337_v10, %v3339_v22  ;;  %v3879_v30 = vsel %vm3331_vm3, %v3876_v13, %v3878_v23  ;;  %v3342_v31 = vsel %vm3331_vm3, %v3339_v22, %v3341_v24  ;;  %v3881_v33 = vsel %vm3331_vm3, %v3878_v23, %v3880_v26 }
 0x10d   : > { %6723 = vmatmul.mubr.bf16.gmra.mxu1 %v2155_v34  ;;  %6779 = vmatmul.mubr.bf16.gmra.mxu0 %v2814_v35  ;;  %v7259_v34 = vld [vmem:[#allocation6 + $0x218] sm:$0xff]  }
 0x10e   : > { %6726 = vmatprep.mubr.bf16.mxu1 %v2157_v38  ;;  %6782 = vmatprep.mubr.bf16.mxu0 %v2823_v39  ;;  %v3882_v38 = vrot.slane %v7247_v28, 2 }
 0x110   : > { %v3885_v55 = vsel %vm3331_vm3, %v3882_v38, %v3884_v43 }
 0x115   : > { %6727 = vmatmul.mubr.bf16.gmra.mxu1 %v2159_v48  ;;  %6783 = vmatmul.mubr.bf16.gmra.mxu0 %v2832_v49  ;;  %v3344_v48 = vsel %vm3331_vm3, %v3341_v24, %v3343_v37  ;;  %v3883_v49 = vsel %vm3331_vm3, %v3880_v26, %v3882_v38  ;;  %v3353_v24 = vrot.slane %v7260_v12, 2  ;;  %v7265_v38 = vld [vmem:[%s7600_s20 + $0x70] sm:$0xff]  }
 0x116   : > { %6730 = vmatprep.mubr.bf16.mxu1 %v2161_v51  ;;  %6854 = vmatprep.mubr.bf16.mxu0 %v3869_v52 }
 0x11d   : > { %6731 = vmatmul.mubr.bf16.gmra.mxu1 %v2163_v1  ;;  %6855 = vmatmul.mubr.bf16.vlgmr.msra.gmra.mxu0 %v3871_v2  ;;  %v3886_v1 = vrot.slane %v7252_v50, 2  ;;  %v3357_v50 = vrot.slane %v7265_v38, 2 }
 0x11e   : > { %6802 = vmatprep.mubr.bf16.mxu1 %v3334_v4  ;;  %6943 = vmatpush3.bf16.msra.mxu0 %v7783_v54  ;;  %v3877_v54 = vsel %vm3331_vm3, %v3874_v9, %v3876_v13  ;;  %v3349_v4 = vrot.slane %v7254_v60, 2  ;;  %v7269_v60 = vld [vmem:[%s7600_s20 + $0x90] sm:$0xff]  }
 0x11f   : > { %6858 = vmatprep.mubr.bf16.mxu0 %v3873_v6  ;;  %6944 = vmatprep.subr.bf16.mxu0 %v7239_v5  ;;  %v7255_v6 = vld [vmem:[%s7600_s20 + $0x58] sm:$0xff]  }
 0x120   : > { %v3351_v22 = vrot.slane %v7255_v6, 2 }
 0x122   : > { %6945 = vmatpush3.bf16.msra.mxu0 %v7239_v5  ;;  %v3888_v5 = vrot.slane %v7256_v56, 2 }
 0x123   : > { %6946 = vmatprep.subr.bf16.mxu0 %v7246_v11 }
 0x124   : > { %v3889_v19 = vsel %vm3331_vm3, %v3886_v1, %v3888_v5 }
 0x125   : > { %6803 = vmatmul.mubr.bf16.vlgmr.msra.gmra.mxu1 %v3336_v15  ;;  %6859 = vmatmul.mubr.bf16.gmra.mxu0 %v3875_v16  ;;  %v7262_v15 = vld [vmem:[%s7600_s20 + $0x78] sm:$0xff]  }
 0x126   : > { %6891 = vmatpush3.bf16.msra.mxu1 %v7787_v58  ;;  %6806 = vmatprep.mubr.bf16.mxu1 %v3338_v18  ;;  %v7844_v58 = vld [vmem:[%s7600_s20 + $0x40] sm:$0xff]   ;;  %v3350_v18 = vsel %vm3331_vm3, %v3347_v0, %v3349_v4 }
 0x127   : > { %6892 = vmatprep.subr.bf16.mxu1 %v7238_v14  ;;  %6862 = vmatprep.mubr.bf16.mxu0 %v3877_v54  ;;  %v3345_v39 = vrot.slane %v7844_v58, 2  ;;  %v3352_v58 = vsel %vm3331_vm3, %v3349_v4, %v3351_v22 }
 0x128   : > { %6947 = vmatpush3.bf16.msra.mxu0 %v7246_v11  ;;  %v7258_v11 = vld [vmem:[%s7600_s20 + $0x70] sm:$0xff]  }
 0x129   : > { %6948 = vmatprep.subr.bf16.mxu0 %v7253_v21  ;;  %v3346_v53 = vsel %vm3331_vm3, %v3343_v37, %v3345_v39  ;;  %v3348_v13 = vsel %vm3331_vm3, %v3345_v39, %v3347_v0  ;;  %v3890_v23 = vrot.slane %v7258_v11, 2  ;;  %v7268_v39 = vld [vmem:[%s7600_s20 + $0x88] sm:$0xff]  }
 0x12a   : > { %6893 = vmatpush3.bf16.msra.mxu1 %v7238_v14  ;;  %v3887_v14 = vsel %vm3331_vm3, %v3884_v43, %v3886_v1 }
 0x12b   : > { %6894 = vmatprep.subr.bf16.mxu1 %v7244_v25 }
 0x12c   : > { %6949 = vmatpush3.bf16.msra.mxu0 %v7253_v21 }
 0x12d   : > { %v7851_v35 = vpop.f32.mrf.mxu1  ;;  %6807 = vmatmul.mubr.bf16.gmra.mxu1 %v3340_v29  ;;  %v7853_v36 = vpop.f32.mrf.mxu0  ;;  %6863 = vmatmul.mubr.bf16.gmra.mxu0 %v3879_v30  ;;  %v7261_v30 = vld [vmem:[%s7600_s20 + $0x68] sm:$0xff]  }
 0x12e   : > { %6810 = vmatprep.mubr.bf16.mxu1 %v3342_v31  ;;  %6895 = vmatpush3.bf16.msra.mxu1 %v7244_v25  ;;  %v3892_v25 = vrot.slane %v7262_v15, 2  ;;  %v3891_v31 = vsel %vm3331_vm3, %v3888_v5, %v3890_v23 }
 0x12f   : > { %v7856_v41 = vpop.f32.mrf.mxu1  ;;  %v7858_v42 = vpop.f32.mrf.mxu0  ;;  %6866 = vmatprep.mubr.bf16.mxu0 %v3881_v33  ;;  %6896 = vmatprep.subr.bf16.mxu1 %v7250_v32 }
 0x130   : > { %6950 = vmatprep.subr.bf16.mxu0 %v7259_v34  ;;  %v3893_v37 = vsel %vm3331_vm3, %v3890_v23, %v3892_v25 }
 0x131   : > { %v7861_v45 = vpop.f32.mrf.mxu1  ;;  %v7863_v46 = vpop.f32.mrf.mxu0  ;;  %6951 = vmatpush3.bf16.msra.mxu0 %v7259_v34  ;;  %v3354_v34 = vsel %vm3331_vm3, %v3351_v22, %v3353_v24  ;;  %v7275_v22 = vld [vmem:[%s7600_s20 + $0xa0] ss:$0 sps:$4 sm:$0x33]  }
 0x132   : > { %6897 = vmatpush3.bf16.msra.mxu1 %v7250_v32  ;;  %6952 = vmatprep.subr.bf16.mxu0 %v7266_v40  ;;  %v7263_v32 = vld [vmem:[%s7600_s20 + $0x80] sm:$0xff]  }
 0x133   : > { %v7869_v51 = vpop.f32.mrf.mxu1  ;;  %v7871_v52 = vpop.f32.mrf.mxu0  ;;  %6898 = vmatprep.subr.bf16.mxu1 %v7257_v44  ;;  %v3894_v47 = vrot.slane %v7263_v32, 2  ;;  %v7280_v32 = vld [vmem:[%s7600_s20 + $0x10] sm:$0xf8]  }
 0x135   : > { %v7877_v61 = vpop.f32.mrf.mxu1  ;;  %6811 = vmatmul.mubr.bf16.gmra.mxu1 %v3344_v48  ;;  %v7879_v63 = vpop.f32.mrf.mxu0  ;;  %6867 = vmatmul.mubr.bf16.gmra.mxu0 %v3883_v49  ;;  %v3895_v0 = vsel %vm3331_vm3, %v3892_v25, %v3894_v47  ;;  %v7272_v25 = vld [vmem:[%s7600_s20 + $0x88] sm:$0xff]  }
 0x136   : > { %6814 = vmatprep.mubr.bf16.mxu1 %v3346_v53  ;;  %6870 = vmatprep.mubr.bf16.mxu0 %v3885_v55  ;;  %v3896_v53 = vrot.slane %v7268_v39, 2  ;;  %v7267_v55 = vld [vmem:[%s7600_s20 + $0x78] sm:$0xff]  }
 0x137   : > { %v7881_v2 = vpop.f32.mrf.mxu1  ;;  %v7883_v3 = vpop.f32.mrf.mxu0  ;;  %6899 = vmatpush3.bf16.msra.mxu1 %v7257_v44  ;;  %6953 = vmatpush3.bf16.msra.mxu0 %v7266_v40  ;;  %v3355_v44 = vrot.slane %v7261_v30, 2 }
 0x138   : > { %6900 = vmatprep.subr.bf16.mxu1 %v7264_v57  ;;  %6954 = vmatprep.subr.bf16.mxu0 %v7273_v59  ;;  %v3897_v6 = vsel %vm3331_vm3, %v3894_v47, %v3896_v53  ;;  %v7283_v47 = vld [vmem:[%s7600_s20 + $0x10] sm:$0xfc]  }
 0x139   : > { %v7886_v9 = vpop.f32.mrf.mxu1  ;;  %v7888_v10 = vpop.f32.mrf.mxu0  ;;  %v3358_v5 = vsel %vm3331_vm3, %v3355_v44, %v3357_v50 }
 0x13b   : > { %v7895_v16 = vpop.f32.mrf.mxu1  ;;  %v7897_v17 = vpop.f32.mrf.mxu0  ;;  %6901 = vmatpush3.bf16.msra.mxu1 %v7264_v57  ;;  %6955 = vmatpush3.bf16.msra.mxu0 %v7273_v59  ;;  %v3356_v59 = vsel %vm3331_vm3, %v3353_v24, %v3355_v44 }
 0x13c   : > { %6902 = vmatprep.subr.bf16.mxu1 %v7270_v7  ;;  %6956 = vmatprep.subr.bf16.mxu0 %v7279_v8 }
 0x13d   : > { %v7901_v54 = vpop.f32.mrf.mxu1  ;;  %6815 = vmatmul.mubr.bf16.gmra.mxu1 %v3348_v13  ;;  %v7903_v21 = vpop.f32.mrf.mxu0  ;;  %6871 = vmatmul.mubr.bf16.gmra.mxu0 %v3887_v14  ;;  %v3359_v13 = vrot.slane %v7267_v55, 2  ;;  %v3898_v14 = vrot.slane %v7269_v60, 2  ;;  %v7284_v55 = vld [vmem:[%s7600_s20 + $0x18] sm:$0xff]  }
 0x13e   : > { %6818 = vmatprep.mubr.bf16.mxu1 %v3350_v18  ;;  %6874 = vmatprep.mubr.bf16.mxu0 %v3889_v19 }
 0x13f   : > { %v7905_v26 = vpop.f32.mrf.mxu1  ;;  %v7907_v27 = vpop.f32.mrf.mxu0  ;;  %6903 = vmatpush3.bf16.msra.mxu1 %v7270_v7  ;;  %6957 = vmatpush3.bf16.msra.mxu0 %v7279_v8  ;;  %v7271_v7 = vld [vmem:[%s7600_s20 + $0x80] sm:$0xff]   ;;  %v7274_v8 = vld [vmem:[%s7600_s20 + $0x98] sm:$0xff]   ;;  %v3360_v30 = vsel %vm3331_vm3, %v3357_v50, %v3359_v13  ;;  %v3363_v50 = vrot.slane %v7272_v25, 2  ;;  %v4412_v25 = vshrl.u32 %v7284_v55, 16 }
 0x140   : > { %6904 = vmatprep.subr.bf16.mxu1 %v7277_v20  ;;  %v3361_v19 = vrot.slane %v7271_v7, 2 }
 0x141   : > { %v7909_v28 = vpop.f32.mrf.mxu1  ;;  %v7911_v29 = vpop.f32.mrf.mxu0 }
 0x142   : > { %v3362_v39 = vsel %vm3331_vm3, %v3359_v13, %v3361_v19 }
 0x143   : > { %v7917_v62 = vpop.f32.mrf.mxu1  ;;  %v7919_v33 = vpop.f32.mrf.mxu0  ;;  %6905 = vmatpush3.bf16.msra.mxu1 %v7277_v20  ;;  %v3900_v20 = vrot.slane %v7274_v8, 2 }
 0x145   : > { %v7925_v40 = vpop.f32.mrf.mxu1  ;;  %6819 = vmatmul.mubr.bf16.gmra.mxu1 %v3352_v58  ;;  %v7927_v43 = vpop.f32.mrf.mxu0  ;;  %6875 = vmatmul.mubr.bf16.gmra.mxu0 %v3891_v31  ;;  %v3899_v58 = vsel %vm3331_vm3, %v3896_v53, %v3898_v14  ;;  %v7960_v31 = vld [vmem:[%s7600_s20 + $0x90] sm:$0xff]   ;;  %v3901_v44 = vsel %vm3331_vm3, %v3898_v14, %v3900_v20  ;;  %v3902_v53 = vrot.slane %v7275_v22, 2  ;;  %v4404_v14 = vshrl.u32 %v7283_v47, 16 }
 0x146   : > { %6822 = vmatprep.mubr.bf16.mxu1 %v3354_v34  ;;  %6878 = vmatprep.mubr.bf16.mxu0 %v3893_v37  ;;  %v7964_v34 = vld [vmem:[%s7600_s20 + $0x18] sm:$0xff]   ;;  %v4415_v22 = vshll.u32 %v7284_v55, 16 }
 0x147   : > { %v7929_v48 = vpop.f32.mrf.mxu1  ;;  %v7931_v49 = vpop.f32.mrf.mxu0  ;;  %v5073_v7 = vrot.slane %v7964_v34, 3  ;;  %v7282_v34 = vld [vmem:[%s7600_s20 + $0x20] sm:$0xff]  }
 0x149   : > { %v7935_v56 = vpop.f32.mrf.mxu1  ;;  %v7937_v57 = vpop.f32.mrf.mxu0 }
 0x14a   : > { %8606 = vst [vmem:[#allocation12_spill] sm:$0xff] %v7935_v56 }
 0x14b   : > { %v7941_v1 = vpop.f32.mrf.mxu1  ;;  %v7943_v4 = vpop.f32.mrf.mxu0 }
 0x14c   : > { %8607 = vst [vmem:[#allocation13_spill] sm:$0xff] %v7941_v1 }
 0x14d   : > { %v7949_v11 = vpop.f32.mrf.mxu1  ;;  %6823 = vmatmul.mubr.bf16.gmra.mxu1 %v3356_v59  ;;  %v6648_v12 = vpop.f32.mrf.mxu0  ;;  %6879 = vmatmul.mubr.bf16.gmra.mxu0 %v3895_v0 }
 0x14e   : > { %8608 = vst [vmem:[#allocation14_spill] sm:$0xff] %v7949_v11  ;;  %6826 = vmatprep.mubr.bf16.mxu1 %v3358_v5  ;;  %6882 = vmatprep.mubr.bf16.mxu0 %v3897_v6  ;;  %v3365_v5 = vrot.slane %v7960_v31, 2  ;;  %v5072_v6 = vrot.slane %v7280_v32, 3  ;;  %v3903_v32 = vsel %vm3331_vm3, %v3900_v20, %v3902_v53  ;;  %v4417_v11 = vrot.slane %v4415_v22, 3  ;;  %v7288_v20 = vld [vmem:[%s7600_s20 + $0x28] sm:$0xff]  }
 0x14f   : > { %v7951_v15 = vpop.f32.mrf.mxu1  ;;  %v1729_v18 = vpop.f32.mrf.mxu0 }
 0x150   : > { %8609 = vst [vmem:[#allocation15_spill] sm:$0xff] %v7951_v15  ;;  %v5074_v55 = vsel %vm5071_vm4, %v5072_v6, %v5073_v7  ;;  %v7987_v15 = vld [vmem:[%s7600_s20 + $0x28] sm:$0xff]  }
 0x151   : > { %v7954_v23 = vpop.f32.mrf.mxu1  ;;  %v6649_v24 = vpop.f32.mrf.mxu0 }
 0x152   : > { %8610 = vst [vmem:[#allocation16_spill] sm:$0xff] %v7954_v23 }
 0x153   : > { %v7966_v37 = vpop.f32.mrf.mxu1  ;;  %v1732_v38 = vpop.f32.mrf.mxu0 }
 0x154   : > { %8611 = vst [vmem:[#allocation17_spill] sm:$0xff] %v7966_v37  ;;  %v7285_v37 = vld [vmem:[%s7600_s20 + $0x20] sm:$0xff]  }
 0x155   : > { %v6596_v60 = vpop.f32.mrf.mxu1  ;;  %6827 = vmatmul.mubr.bf16.gmra.mxu1 %v3360_v30  ;;  %v6652_v59 = vpop.f32.mrf.mxu0  ;;  %6883 = vmatmul.mubr.bf16.gmra.mxu0 %v3899_v58  ;;  %v4407_v30 = vshll.u32 %v7283_v47, 16  ;;  %v3366_v47 = vsel %vm3331_vm3, %v3363_v50, %v3365_v5  ;;  %v4421_v56 = vshrl.u32 %v7285_v37, 16 }
 0x156   : > { %v1338_v0 = vadd.f32 %v6596_v60, %v7853_v36  ;;  %6830 = vmatprep.mubr.bf16.mxu1 %v3362_v39  ;;  %6886 = vmatprep.mubr.bf16.mxu0 %v3901_v44  ;;  %v3364_v44 = vsel %vm3331_vm3, %v3361_v19, %v3363_v50  ;;  %v7278_v60 = vld [vmem:[%s7600_s20 + $0x98] ss:$0 sps:$4 sm:$0x33]   ;;  %v4406_v19 = vrot.slane %v4404_v14, 2  ;;  %v4424_v14 = vshll.u32 %v7285_v37, 16 }
 0x157   : > { %v1193_v8 = vpop.f32.mrf.mxu1  ;;  %v1745_v13 = vpop.f32.mrf.mxu0  ;;  %v3367_v6 = vrot.slane %v7278_v60, 2 }
 0x158   : > { %v1336_v58 = vadd.f32 %v1193_v8, %v7858_v42  ;;  %v7976_v36 = vadd.f32 %v6648_v12, %v1338_v0  ;;  %v4409_v8 = vrot.slane %v4407_v30, 3  ;;  %v5077_v30 = vrot.slane %v7987_v15, 3 }
 0x159   : > { %v6597_v39 = vpop.f32.mrf.mxu1  ;;  %v6653_v31 = vpop.f32.mrf.mxu0  ;;  %v3368_v37 = vsel %vm3331_vm3, %v3365_v5, %v3367_v6 }
 0x15a   : > { %8612 = vst [vmem:[#allocation18_spill] sm:$0xff] %v7976_v36  ;;  %v1339_v23 = vadd.f32 %v6597_v39, %v7863_v46  ;;  %v7989_v42 = vadd.f32 %v1729_v18, %v1336_v58  ;;  %v4414_v36 = vrot.slane %v4412_v25, 2  ;;  %v5075_v39 = vrot.slane %v7282_v34, 3  ;;  %v7289_v34 = vld [vmem:[%s7600_s20 + $0x30] sm:$0xff]  }
 0x15b   : > { %v1196_v12 = vpop.f32.mrf.mxu1  ;;  %v1748_v0 = vpop.f32.mrf.mxu0  ;;  %v4430_v58 = vshrl.u32 %v7288_v20, 16 }
 0x15c   : > { %v1337_v53 = vadd.f32 %v1196_v12, %v7871_v52  ;;  %v7993_v1 = vadd.f32 %v6649_v24, %v1339_v23  ;;  %v4410_v24 = vor.u32 %v4409_v8, %v4406_v19  ;;  %v4418_v22 = vor.u32 %v4417_v11, %v4414_v36  ;;  %v7287_v36 = vld [vmem:[%s7600_s20 + $0x30] sm:$0xff]  }
 0x15d   : > { %v6600_v46 = vpop.f32.mrf.mxu1  ;;  %6831 = vmatmul.mubr.bf16.gmra.mxu1 %v3364_v44  ;;  %v6656_v50 = vpop.f32.mrf.mxu0  ;;  %6887 = vmatmul.mubr.bf16.gmra.mxu0 %v3903_v32  ;;  %v4433_v44 = vshll.u32 %v7288_v20, 16  ;;  %v4426_v11 = vrot.slane %v4424_v14, 3  ;;  %v5078_v8 = vsel %vm5071_vm4, %v5075_v39, %v5077_v30  ;;  %v4432_v20 = vrot.slane %v4430_v58, 2 }
 0x15e   : > { %v1342_v18 = vadd.f32 %v6600_v46, %v7879_v63  ;;  %6834 = vmatprep.mubr.bf16.mxu1 %v3366_v47  ;;  %6958 = vmatprep.mubr.bf16.mxu0 %v5074_v55  ;;  %v7997_v25 = vadd.f32 %v1732_v38, %v1337_v53  ;;  %v5076_v38 = vsel %vm5071_vm4, %v5073_v7, %v5075_v39  ;;  %v4423_v55 = vrot.slane %v4421_v56, 2  ;;  %v8012_v53 = vld [vmem:[%s7600_s20 + $0x38] sm:$0xff]  }
 0x15f   : > { %v1209_v52 = vpop.f32.mrf.mxu1  ;;  %v1761_v23 = vpop.f32.mrf.mxu0  ;;  %v4435_v5 = vrot.slane %v4433_v44, 3  ;;  %v7292_v46 = vld [vmem:[%s7600_s20 + $0x38] sm:$0xff]   ;;  %v5079_v39 = vrot.slane %v7287_v36, 3  ;;  %v5081_v44 = vrot.slane %v8012_v53, 3 }
 0x160   : > { %v1340_v32 = vadd.f32 %v1209_v52, %v7883_v3  ;;  %v8000_v60 = vadd.f32 %v6652_v59, %v1342_v18  ;;  %v4419_v59 = vsel %vm4402_vm5, %v4410_v24, %v4418_v22  ;;  %v4442_v18 = vshll.u32 %v7289_v34, 16 }
 0x161   : > { %v6601_v63 = vpop.f32.mrf.mxu1  ;;  %v6657_v15 = vpop.f32.mrf.mxu0  ;;  %v4427_v52 = vor.u32 %v4426_v11, %v4423_v55 }
 0x162   : > { %v1343_v47 = vadd.f32 %v6601_v63, %v7888_v10  ;;  %v8007_v12 = vadd.f32 %v1745_v13, %v1340_v32  ;;  %v4439_v13 = vshrl.u32 %v7289_v34, 16  ;;  %v4448_v32 = vshrl.u32 %v7292_v46, 16 }
 0x163   : > { %v1212_v3 = vpop.f32.mrf.mxu1  ;;  %v1764_v19 = vpop.f32.mrf.mxu0  ;;  %v4451_v63 = vshll.u32 %v7292_v46, 16  ;;  %v4444_v55 = vrot.slane %v4442_v18, 3  ;;  %v4428_v36 = vsel %vm4402_vm5, %v4418_v22, %v4427_v52 }
 0x164   : > { %v1341_v7 = vadd.f32 %v1212_v3, %v7897_v17  ;;  %v8016_v6 = vadd.f32 %v6653_v31, %v1343_v47  ;;  %v4436_v31 = vor.u32 %v4435_v5, %v4432_v20  ;;  %v4441_v47 = vrot.slane %v4439_v13, 2 }
 0x165   : > { %v6604_v10 = vpop.f32.mrf.mxu1  ;;  %6835 = vmatmul.mubr.bf16.gmra.mxu1 %v3368_v37  ;;  %v6660_v56 = vpop.f32.mrf.mxu0  ;;  %6959 = vmatmul.mubr.bf16.vlgmr.msra.gmra.mxu0 %v5076_v38  ;;  %v5080_v3 = vsel %vm5071_vm4, %v5077_v30, %v5079_v39  ;;  %v5082_v5 = vsel %vm5071_vm4, %v5079_v39, %v5081_v44  ;;  %v4450_v53 = vrot.slane %v4448_v32, 2  ;;  %v4453_v46 = vrot.slane %v4451_v63, 3 }
 0x166   : > { %v1346_v14 = vadd.f32 %v6604_v10, %v7903_v21  ;;  %6906 = vmatprep.mubr.bf16.mxu1 %v4419_v59  ;;  %6962 = vmatprep.mubr.bf16.mxu0 %v5078_v8  ;;  %v8019_v24 = vadd.f32 %v1748_v0, %v1341_v7  ;;  %v7291_v0 = vld [vmem:[%s7600_s20 + $0x40] sm:$0xff]   ;;  %v8035_v7 = vld [vmem:[%s7600_s20 + $0x48] sm:$0xff]  }
 0x167   : > { %v1225_v58 = vpop.f32.mrf.mxu1  ;;  %v1777_v17 = vpop.f32.mrf.mxu0  ;;  %v7293_v59 = vld [vmem:[%s7600_s20 + $0x40] sm:$0xff]   ;;  %v7296_v10 = vld [vmem:[%s7600_s20 + $0x48] sm:$0xff]   ;;  %v5083_v18 = vrot.slane %v7291_v0, 3  ;;  %v5085_v63 = vrot.slane %v8035_v7, 3 }
 0x168   : > { %v1344_v37 = vadd.f32 %v1225_v58, %v7907_v27  ;;  %v8023_v38 = vadd.f32 %v6656_v50, %v1346_v14  ;;  %v4437_v50 = vsel %vm4402_vm5, %v4427_v52, %v4436_v31  ;;  %v4457_v52 = vshrl.u32 %v7293_v59, 16 }
 0x169   : > { %v6605_v21 = vpop.f32.mrf.mxu1  ;;  %v6661_v34 = vpop.f32.mrf.mxu0  ;;  %v4460_v39 = vshll.u32 %v7293_v59, 16 }
 0x16a   : > { %v1347_v11 = vadd.f32 %v6605_v21, %v7911_v29  ;;  %v8030_v8 = vadd.f32 %v1761_v23, %v1344_v37  ;;  %v4445_v23 = vor.u32 %v4444_v55, %v4441_v47  ;;  %v4466_v37 = vshrl.u32 %v7296_v10, 16 }
 0x16b   : > { %v1228_v20 = vpop.f32.mrf.mxu1  ;;  %v1780_v27 = vpop.f32.mrf.mxu0  ;;  %v4469_v21 = vshll.u32 %v7296_v10, 16  ;;  %v4459_v59 = vrot.slane %v4457_v52, 2  ;;  %v8058_v10 = vld [vmem:[%s7600_s20 + $0x58] sm:$0xff]  }
 0x16c   : > { %v1345_v29 = vadd.f32 %v1228_v20, %v7919_v33  ;;  %v8039_v13 = vadd.f32 %v6657_v15, %v1347_v11  ;;  %v4454_v15 = vor.u32 %v4453_v46, %v4450_v53  ;;  %v4446_v0 = vsel %vm4402_vm5, %v4436_v31, %v4445_v23 }
 0x16d   : > { %v6608_v22 = vpop.f32.mrf.mxu1  ;;  %6907 = vmatmul.mubr.bf16.vlgmr.msra.gmra.mxu1 %v4428_v36  ;;  %v6664_v30 = vpop.f32.mrf.mxu0  ;;  %6963 = vmatmul.mubr.bf16.gmra.mxu0 %v5080_v3  ;;  %v7297_v36 = vld [vmem:[%s7600_s20 + $0x50] sm:$0xff]   ;;  %v4462_v20 = vrot.slane %v4460_v39, 3  ;;  %v5086_v46 = vsel %vm5071_vm4, %v5083_v18, %v5085_v63  ;;  %v4468_v7 = vrot.slane %v4466_v37, 2  ;;  %v4471_v31 = vrot.slane %v4469_v21, 3 }
 0x16e   : > { %v1350_v14 = vadd.f32 %v6608_v22, %v7927_v43  ;;  %6910 = vmatprep.mubr.bf16.mxu1 %v4437_v50  ;;  %6966 = vmatprep.mubr.bf16.mxu0 %v5082_v5  ;;  %v8042_v58 = vadd.f32 %v1764_v19, %v1345_v29  ;;  %v5084_v19 = vsel %vm5071_vm4, %v5081_v44, %v5083_v18  ;;  %v7295_v50 = vld [vmem:[%s7600_s20 + $0x50] sm:$0xff]   ;;  %v7300_v29 = vld [vmem:[%s7600_s20 + $0x58] sm:$0xff]   ;;  %v4478_v52 = vshll.u32 %v7297_v36, 16 }
 0x16f   : > { %v1241_v32 = vpop.f32.mrf.mxu1  ;;  %v1793_v33 = vpop.f32.mrf.mxu0  ;;  %v5087_v18 = vrot.slane %v7295_v50, 3  ;;  %v5089_v21 = vrot.slane %v8058_v10, 3 }
 0x170   : > { %v1348_v47 = vadd.f32 %v1241_v32, %v7931_v49  ;;  %v8046_v55 = vadd.f32 %v6660_v56, %v1350_v14  ;;  %v4455_v56 = vsel %vm4402_vm5, %v4445_v23, %v4454_v15  ;;  %v4463_v23 = vor.u32 %v4462_v20, %v4459_v59 }
 0x171   : > { %v6609_v43 = vpop.f32.mrf.mxu1  ;;  %v6665_v11 = vpop.f32.mrf.mxu0  ;;  %v4480_v59 = vrot.slane %v4478_v52, 3 }
 0x172   : > { %v1351_v3 = vadd.f32 %v6609_v43, %v7937_v57  ;;  %v8053_v5 = vadd.f32 %v1777_v17, %v1348_v47  ;;  %v4475_v17 = vshrl.u32 %v7297_v36, 16  ;;  %v4484_v47 = vshrl.u32 %v7300_v29, 16 }
 0x173   : > { %v1244_v53 = vpop.f32.mrf.mxu1  ;;  %v1796_v49 = vpop.f32.mrf.mxu0  ;;  %v4487_v43 = vshll.u32 %v7300_v29, 16  ;;  %v4464_v50 = vsel %vm4402_vm5, %v4454_v15, %v4463_v23 }
 0x174   : > { %v1349_v44 = vadd.f32 %v1244_v53, %v7943_v4  ;;  %v8062_v22 = vadd.f32 %v6661_v34, %v1351_v3  ;;  %v4472_v34 = vor.u32 %v4471_v31, %v4468_v7  ;;  %v4477_v3 = vrot.slane %v4475_v17, 2 }
 0x175   : > { %v6612_v57 = vpop.f32.mrf.mxu1  ;;  %6911 = vmatmul.mubr.bf16.gmra.mxu1 %v4446_v0  ;;  %v6668_v14 = vpop.f32.mrf.mxu0  ;;  %6967 = vmatmul.mubr.bf16.gmra.mxu0 %v5084_v19  ;;  %v5088_v53 = vsel %vm5071_vm4, %v5085_v63, %v5087_v18  ;;  %v5090_v31 = vsel %vm5071_vm4, %v5087_v18, %v5089_v21  ;;  %v4486_v10 = vrot.slane %v4484_v47, 2  ;;  %v4489_v29 = vrot.slane %v4487_v43, 3 }
 0x176   : > { %v1354_v39 = vadd.f32 %v6612_v57, %v7851_v35  ;;  %6914 = vmatprep.mubr.bf16.mxu1 %v4455_v56  ;;  %6970 = vmatprep.mubr.bf16.mxu0 %v5086_v46  ;;  %v8065_v32 = vadd.f32 %v1780_v27, %v1349_v44  ;;  %v7299_v27 = vld [vmem:[%s7600_s20 + $0x60] sm:$0xff]   ;;  %v8081_v44 = vld [vmem:[%s7600_s20 + $0x68] sm:$0xff]  }
 0x177   : > { %v1257_v37 = vpop.f32.mrf.mxu1  ;;  %v1809_v4 = vpop.f32.mrf.mxu0  ;;  %v7301_v56 = vld [vmem:[%s7600_s20 + $0x60] sm:$0xff]   ;;  %v7304_v57 = vld [vmem:[%s7600_s20 + $0x68] sm:$0xff]   ;;  %v5091_v52 = vrot.slane %v7299_v27, 3  ;;  %v5093_v43 = vrot.slane %v8081_v44, 3 }
 0x178   : > { %v1352_v0 = vadd.f32 %v1257_v37, %v7856_v41  ;;  %v8069_v19 = vadd.f32 %v6664_v30, %v1354_v39  ;;  %v4473_v30 = vsel %vm4402_vm5, %v4463_v23, %v4472_v34  ;;  %v4493_v23 = vshrl.u32 %v7301_v56, 16 }
 0x179   : > { %v6613_v35 = vpop.f32.mrf.mxu1  ;;  %v6669_v36 = vpop.f32.mrf.mxu0  ;;  %v4496_v18 = vshll.u32 %v7301_v56, 16 }
 0x17a   : > { %v1355_v20 = vadd.f32 %v6613_v35, %v7861_v45  ;;  %v8076_v46 = vadd.f32 %v1793_v33, %v1352_v0  ;;  %v4481_v33 = vor.u32 %v4480_v59, %v4477_v3  ;;  %v4502_v0 = vshrl.u32 %v7304_v57, 16 }
 0x17b   : > { %v1260_v7 = vpop.f32.mrf.mxu1  ;;  %v1812_v41 = vpop.f32.mrf.mxu0  ;;  %v4505_v35 = vshll.u32 %v7304_v57, 16  ;;  %v4495_v56 = vrot.slane %v4493_v23, 2  ;;  %v8104_v57 = vld [vmem:[%s7600_s20 + $0x78] sm:$0xff]  }
 0x17c   : > { %v1353_v45 = vadd.f32 %v1260_v7, %v7869_v51  ;;  %v8085_v17 = vadd.f32 %v6665_v11, %v1355_v20  ;;  %v4490_v11 = vor.u32 %v4489_v29, %v4486_v10  ;;  %v4482_v27 = vsel %vm4402_vm5, %v4472_v34, %v4481_v33 }
 0x17d   : > { %v6616_v15 = vpop.f32.mrf.mxu1  ;;  %6915 = vmatmul.mubr.bf16.gmra.mxu1 %v4464_v50  ;;  %v6672_v63 = vpop.f32.mrf.mxu0  ;;  %6971 = vmatmul.mubr.bf16.gmra.mxu0 %v5088_v53  ;;  %v7305_v50 = vld [vmem:[%s7600_s20 + $0x70] sm:$0xff]   ;;  %v4498_v7 = vrot.slane %v4496_v18, 3  ;;  %v5094_v29 = vsel %vm5071_vm4, %v5091_v52, %v5093_v43  ;;  %v4504_v44 = vrot.slane %v4502_v0, 2  ;;  %v4507_v34 = vrot.slane %v4505_v35, 3 }
 0x17e   : > { %v1358_v39 = vadd.f32 %v6616_v15, %v7877_v61  ;;  %6918 = vmatprep.mubr.bf16.mxu1 %v4473_v30  ;;  %6974 = vmatprep.mubr.bf16.mxu0 %v5090_v31  ;;  %v8088_v37 = vadd.f32 %v1796_v49, %v1353_v45  ;;  %v5092_v49 = vsel %vm5071_vm4, %v5089_v21, %v5091_v52  ;;  %v7303_v30 = vld [vmem:[%s7600_s20 + $0x70] sm:$0xff]   ;;  %v7308_v45 = vld [vmem:[%s7600_s20 + $0x78] sm:$0xff]   ;;  %v4514_v23 = vshll.u32 %v7305_v50, 16 }
 0x17f   : > { %v1273_v47 = vpop.f32.mrf.mxu1  ;;  %v1825_v51 = vpop.f32.mrf.mxu0  ;;  %v5095_v52 = vrot.slane %v7303_v30, 3  ;;  %v5097_v35 = vrot.slane %v8104_v57, 3 }
 0x180   : > { %v1356_v3 = vadd.f32 %v1273_v47, %v7881_v2  ;;  %v8092_v59 = vadd.f32 %v6668_v14, %v1358_v39  ;;  %v4491_v14 = vsel %vm4402_vm5, %v4481_v33, %v4490_v11  ;;  %v4499_v33 = vor.u32 %v4498_v7, %v4495_v56 }
 0x181   : > { %v6617_v61 = vpop.f32.mrf.mxu1  ;;  %v6673_v20 = vpop.f32.mrf.mxu0  ;;  %v4516_v56 = vrot.slane %v4514_v23, 3 }
 0x182   : > { %v1359_v53 = vadd.f32 %v6617_v61, %v7886_v9  ;;  %v8099_v31 = vadd.f32 %v1809_v4, %v1356_v3  ;;  %v4511_v4 = vshrl.u32 %v7305_v50, 16  ;;  %v4520_v3 = vshrl.u32 %v7308_v45, 16 }
 0x183   : > { %v1276_v10 = vpop.f32.mrf.mxu1  ;;  %v1828_v2 = vpop.f32.mrf.mxu0  ;;  %v4523_v61 = vshll.u32 %v7308_v45, 16  ;;  %v4500_v30 = vsel %vm4402_vm5, %v4490_v11, %v4499_v33 }
 0x184   : > { %v1357_v21 = vadd.f32 %v1276_v10, %v7895_v16  ;;  %v8108_v15 = vadd.f32 %v6669_v36, %v1359_v53  ;;  %v4508_v36 = vor.u32 %v4507_v34, %v4504_v44  ;;  %v4513_v53 = vrot.slane %v4511_v4, 2 }
 0x185   : > { %v6620_v9 = vpop.f32.mrf.mxu1  ;;  %6919 = vmatmul.mubr.bf16.gmra.mxu1 %v4482_v27  ;;  %v6676_v39 = vpop.f32.mrf.mxu0  ;;  %6975 = vmatmul.mubr.bf16.gmra.mxu0 %v5092_v49  ;;  %v5096_v10 = vsel %vm5071_vm4, %v5093_v43, %v5095_v52  ;;  %v5098_v34 = vsel %vm5071_vm4, %v5095_v52, %v5097_v35  ;;  %v4522_v57 = vrot.slane %v4520_v3, 2  ;;  %v4525_v45 = vrot.slane %v4523_v61, 3 }
 0x186   : > { %v1362_v18 = vadd.f32 %v6620_v9, %v7901_v54  ;;  %6922 = vmatprep.mubr.bf16.mxu1 %v4491_v14  ;;  %6978 = vmatprep.mubr.bf16.mxu0 %v5094_v29  ;;  %v8111_v47 = vadd.f32 %v1812_v41, %v1357_v21  ;;  %v7307_v41 = vld [vmem:[%s7600_s20 + $0x80] sm:$0xff]   ;;  %v8127_v21 = vld [vmem:[%s7600_s20 + $0x88] sm:$0xff]  }
 0x187   : > { %v1289_v0 = vpop.f32.mrf.mxu1  ;;  %v1841_v16 = vpop.f32.mrf.mxu0  ;;  %v7309_v14 = vld [vmem:[%s7600_s20 + $0x80] sm:$0xff]   ;;  %v7312_v9 = vld [vmem:[%s7600_s20 + $0x88] sm:$0xff]   ;;  %v5099_v23 = vrot.slane %v7307_v41, 3  ;;  %v5101_v61 = vrot.slane %v8127_v21, 3 }
 0x188   : > { %v1360_v27 = vadd.f32 %v1289_v0, %v7905_v26  ;;  %v8115_v49 = vadd.f32 %v6672_v63, %v1362_v18  ;;  %v4509_v63 = vsel %vm4402_vm5, %v4499_v33, %v4508_v36  ;;  %v4529_v33 = vshrl.u32 %v7309_v14, 16 }
 0x189   : > { %v6621_v54 = vpop.f32.mrf.mxu1  ;;  %v6677_v50 = vpop.f32.mrf.mxu0  ;;  %v4532_v52 = vshll.u32 %v7309_v14, 16  ;;  %v5102_v21 = vsel %vm5071_vm4, %v5099_v23, %v5101_v61 }
 0x18a   : > { %v1363_v7 = vadd.f32 %v6621_v54, %v7909_v28  ;;  %v8122_v29 = vadd.f32 %v1825_v51, %v1360_v27  ;;  %v4517_v51 = vor.u32 %v4516_v56, %v4513_v53  ;;  %v4538_v27 = vshrl.u32 %v7312_v9, 16 }
 0x18b   : > { %v1292_v44 = vpop.f32.mrf.mxu1  ;;  %v1844_v26 = vpop.f32.mrf.mxu0  ;;  %v4541_v54 = vshll.u32 %v7312_v9, 16 }
 0x18c   : > { %v1361_v28 = vadd.f32 %v1292_v44, %v7917_v62  ;;  %v8131_v4 = vadd.f32 %v6673_v20, %v1363_v7  ;;  %v4526_v20 = vor.u32 %v4525_v45, %v4522_v57  ;;  %v4518_v41 = vsel %vm4402_vm5, %v4508_v36, %v4517_v51 }
 0x18d   : > { %v6624_v11 = vpop.f32.mrf.mxu1  ;;  %6923 = vmatmul.mubr.bf16.gmra.mxu1 %v4500_v30  ;;  %v6680_v43 = vpop.f32.mrf.mxu0  ;;  %6979 = vmatmul.mubr.bf16.gmra.mxu0 %v5096_v10  ;;  %v7313_v30 = vld [vmem:[%s7600_s20 + $0x90] sm:$0xff]   ;;  %v8613_v10 = vld [vmem:[#allocation12_spill] sm:$0xff]  ;;  %v4531_v44 = vrot.slane %v4529_v33, 2  ;;  %v4540_v9 = vrot.slane %v4538_v27, 2  ;;  %v4543_v36 = vrot.slane %v4541_v54, 3 }
 0x18e   : > { %v1366_v18 = vadd.f32 %v6624_v11, %v7925_v40  ;;  %6926 = vmatprep.mubr.bf16.mxu1 %v4509_v63  ;;  %6982 = vmatprep.mubr.bf16.mxu0 %v5098_v34  ;;  %v8134_v0 = vadd.f32 %v1828_v2, %v1361_v28  ;;  %v5100_v2 = vsel %vm5071_vm4, %v5097_v35, %v5099_v23  ;;  %v4534_v63 = vrot.slane %v4532_v52, 3  ;;  %v7311_v34 = vld [vmem:[%s7600_s20 + $0x90] sm:$0xff]   ;;  %v8150_v28 = vld [vmem:[%s7600_s20 + $0x98] sm:$0xff]  }
 0x18f   : > { %v1305_v3 = vpop.f32.mrf.mxu1  ;;  %v1857_v62 = vpop.f32.mrf.mxu0  ;;  %v7316_v11 = vld [vmem:[%s7600_s20 + $0x98] sm:$0xff]   ;;  %v8614_v35 = vld [vmem:[#allocation13_spill] sm:$0xff]  ;;  %v5103_v23 = vrot.slane %v7311_v34, 3  ;;  %v8620_v34 = vld [vmem:[#allocation16_spill] sm:$0xff] }
 0x190   : > { %v1364_v53 = vadd.f32 %v1305_v3, %v7929_v48  ;;  %v8138_v56 = vadd.f32 %v6676_v39, %v1366_v18  ;;  %v4527_v39 = vsel %vm4402_vm5, %v4517_v51, %v4526_v20  ;;  %v4535_v51 = vor.u32 %v4534_v63, %v4531_v44 }
 0x191   : > { %v6625_v40 = vpop.f32.mrf.mxu1  ;;  %v6681_v7 = vpop.f32.mrf.mxu0 }
 0x192   : > { %v1367_v14 = vadd.f32 %v6625_v40, %v8613_v10  ;;  %v8145_v57 = vadd.f32 %v1841_v16, %v1364_v53  ;;  %v4547_v16 = vshrl.u32 %v7313_v30, 16  ;;  %v4550_v53 = vshll.u32 %v7313_v30, 16  ;;  %v8616_v40 = vld [vmem:[#allocation14_spill] sm:$0xff] }
 0x193   : > { %v1308_v45 = vpop.f32.mrf.mxu1  ;;  %v1860_v48 = vpop.f32.mrf.mxu0 }
 0x194   : > { %v1365_v18 = vadd.f32 %v1308_v45, %v8614_v35  ;;  %v8154_v3 = vadd.f32 %v6677_v50, %v1367_v14  ;;  %v4544_v50 = vor.u32 %v4543_v36, %v4540_v9  ;;  %v5105_v14 = vrot.slane %v8150_v28, 3  ;;  %v7317_v9 = vld [vmem:[%s7600_s20 + $0xa0] ss:$0 sps:$4 sm:$0x77]  }
 0x195   : > { %v6628_v33 = vpop.f32.mrf.mxu1  ;;  %6927 = vmatmul.mubr.bf16.gmra.mxu1 %v4518_v41  ;;  %v6752_v52 = vpop.f32.mrf.mxu0  ;;  %6983 = vmatmul.mubr.bf16.gmra.mxu0 %v5100_v2  ;;  %v4556_v41 = vshrl.u32 %v7316_v11, 16  ;;  %v4559_v35 = vshll.u32 %v7316_v11, 16  ;;  %v8618_v2 = vld [vmem:[#allocation15_spill] sm:$0xff]  ;;  %v4549_v44 = vrot.slane %v4547_v16, 2  ;;  %v4552_v63 = vrot.slane %v4550_v53, 3  ;;  %v8622_v16 = vld [vmem:[#allocation17_spill] sm:$0xff] }
 0x196   : > { %8615 = vst [vmem:[#allocation12_spill] sm:$0xff] %v8154_v3  ;;  %v1370_v10 = vadd.f32 %v6628_v33, %v8616_v40  ;;  %6930 = vmatprep.mubr.bf16.mxu1 %v4527_v39  ;;  %6986 = vmatprep.mubr.bf16.mxu0 %v5102_v21  ;;  %v8157_v27 = vadd.f32 %v1844_v26, %v1365_v18  ;;  %v7315_v21 = vld [vmem:[%s7600_s20 + $0xa0] ss:$0 sps:$4 sm:$0x77]  }
 0x197   : > { %v1321_v54 = vpop.f32.mrf.mxu1  ;;  %v2933_v45 = vpop.f32.mrf.mxu0  ;;  %v4536_v18 = vsel %vm4402_vm5, %v4526_v20, %v4535_v51  ;;  %v5104_v40 = vsel %vm5071_vm4, %v5101_v61, %v5103_v23  ;;  %v4553_v61 = vor.u32 %v4552_v63, %v4549_v44 }
 0x198   : > { %8617 = vst [vmem:[#allocation13_spill] sm:$0xff] %v8157_v27  ;;  %v1368_v3 = vadd.f32 %v1321_v54, %v8618_v2  ;;  %v8161_v30 = vadd.f32 %v6680_v43, %v1370_v10  ;;  %v4545_v54 = vsel %vm4402_vm5, %v4535_v51, %v4544_v50  ;;  %v5106_v43 = vsel %vm5071_vm4, %v5103_v23, %v5105_v14 }
 0x199   : > { %v6629_v33 = vpop.f32.mrf.mxu1  ;;  %v6753_v39 = vpop.f32.mrf.mxu0  ;;  %v4558_v10 = vrot.slane %v4556_v41, 2  ;;  %v4561_v2 = vrot.slane %v4559_v35, 3  ;;  %v4568_v51 = vshll.u32 %v7317_v9, 16 }
 0x19a   : > { %8619 = vst [vmem:[#allocation14_spill] sm:$0xff] %v8161_v30  ;;  %v1371_v26 = vadd.f32 %v6629_v33, %v8620_v34  ;;  %v8168_v36 = vadd.f32 %v1857_v62, %v1368_v3  ;;  %v5107_v34 = vrot.slane %v7315_v21, 3  ;;  %v8623_v62 = vld [vmem:[#allocation18_spill] sm:$0xff] }
 0x19b   : > { %v1324_v28 = vpop.f32.mrf.mxu1  ;;  %v2936_v11 = vpop.f32.mrf.mxu0  ;;  %v4562_v35 = vor.u32 %v4561_v2, %v4558_v10 }
 0x19c   : > { %8621 = vst [vmem:[#allocation15_spill] sm:$0xff] %v8168_v36  ;;  %v1369_v53 = vadd.f32 %v1324_v28, %v8622_v16  ;;  %v8173_v30 = vadd.f32 %v6681_v7, %v1371_v26  ;;  %v4565_v36 = vshrl.u32 %v7317_v9, 16  ;;  %v5108_v63 = vsel %vm5071_vm4, %v5105_v14, %v5107_v34 }
 0x19d   : > { %v6700_v33 = vpop.f32.mrf.mxu1  ;;  %6931 = vmatmul.mubr.bf16.gmra.mxu1 %v4536_v18  ;;  %v6756_v20 = vpop.f32.mrf.mxu0  ;;  %6987 = vmatmul.mubr.bf16.gmra.mxu0 %v5104_v40  ;;  %v4554_v40 = vsel %vm4402_vm5, %v4544_v50, %v4553_v61  ;;  %v4563_v10 = vsel %vm4402_vm5, %v4553_v61, %v4562_v35 }
 0x19e   : > { %v2409_v3 = vadd.f32 %v6700_v33, %v8623_v62  ;;  %6934 = vmatprep.mubr.bf16.mxu1 %v4545_v54  ;;  %6990 = vmatprep.mubr.bf16.mxu0 %v5106_v43  ;;  %v8176_v27 = vadd.f32 %v1860_v48, %v1369_v53  ;;  %v4567_v28 = vrot.slane %v4565_v36, 2  ;;  %v4570_v54 = vrot.slane %v4568_v51, 3 }
 0x19f   : > { %v2264_v23 = vpop.f32.mrf.mxu1  ;;  %v2949_v41 = vpop.f32.mrf.mxu0 }
 0x1a0   : > { %v2407_v7 = vadd.f32 %v2264_v23, %v7989_v42  ;;  %v8179_v26 = vadd.f32 %v6752_v52, %v2409_v3 }
 0x1a1   : > { %v6701_v18 = vpop.f32.mrf.mxu1  ;;  %v6757_v44 = vpop.f32.mrf.mxu0 }
 0x1a2   : > { %v2410_v21 = vadd.f32 %v6701_v18, %v7993_v1  ;;  %v8184_v9 = vadd.f32 %v2933_v45, %v2407_v7  ;;  %v4571_v1 = vor.u32 %v4570_v54, %v4567_v28 }
 0x1a3   : > { %v2267_v48 = vpop.f32.mrf.mxu1  ;;  %v2952_v43 = vpop.f32.mrf.mxu0 }
 0x1a4   : > { %v2408_v42 = vadd.f32 %v2267_v48, %v7997_v25  ;;  %v8188_v52 = vadd.f32 %v6753_v39, %v2410_v21  ;;  %v4572_v34 = vsel %vm4402_vm5, %v4562_v35, %v4571_v1 }
 0x1a5   : > { %v6704_v2 = vpop.f32.mrf.mxu1  ;;  %6935 = vmatmul.mubr.bf16.gmra.mxu1 %v4554_v40  ;;  %v6760_v50 = vpop.f32.mrf.mxu0  ;;  %6991 = vmatmul.mubr.bf16.gmra.mxu0 %v5108_v63 }
 0x1a6   : > { %v2413_v14 = vadd.f32 %v6704_v2, %v8000_v60  ;;  %6938 = vmatprep.mubr.bf16.mxu1 %v4563_v10  ;;  %v8191_v36 = vadd.f32 %v2936_v11, %v2408_v42 }
 0x1a7   : > { %v2280_v45 = vpop.f32.mrf.mxu1  ;;  %v2965_v16 = vpop.f32.mrf.mxu0 }
 0x1a8   : > { %v2411_v53 = vadd.f32 %v2280_v45, %v8007_v12  ;;  %v8194_v33 = vadd.f32 %v6756_v20, %v2413_v14 }
 0x1a9   : > { %v6705_v61 = vpop.f32.mrf.mxu1  ;;  %v6761_v25 = vpop.f32.mrf.mxu0 }
 0x1aa   : > { %v2414_v39 = vadd.f32 %v6705_v61, %v8016_v6  ;;  %v8198_v62 = vadd.f32 %v2949_v41, %v2411_v53 }
 0x1ab   : > { %v2283_v3 = vpop.f32.mrf.mxu1  ;;  %v2968_v60 = vpop.f32.mrf.mxu0 }
 0x1ac   : > { %v2412_v51 = vadd.f32 %v2283_v3, %v8019_v24  ;;  %v8201_v11 = vadd.f32 %v6757_v44, %v2414_v39 }
 0x1ad   : > { %v6708_v23 = vpop.f32.mrf.mxu1  ;;  %6939 = vmatmul.mubr.bf16.gmra.mxu1 %v4572_v34  ;;  %v6764_v7 = vpop.f32.mrf.mxu0 }
 0x1ae   : > { %v2417_v12 = vadd.f32 %v6708_v23, %v8023_v38  ;;  %v8204_v20 = vadd.f32 %v2952_v43, %v2412_v51 }
 0x1af   : > { %v2296_v18 = vpop.f32.mrf.mxu1  ;;  %v2981_v40 = vpop.f32.mrf.mxu0 }
 0x1b0   : > { %v2415_v6 = vadd.f32 %v2296_v18, %v8030_v8  ;;  %v8207_v35 = vadd.f32 %v6760_v50, %v2417_v12 }
 0x1b1   : > { %v6709_v41 = vpop.f32.mrf.mxu1  ;;  %v6765_v63 = vpop.f32.mrf.mxu0 }
 0x1b2   : > { %v2418_v21 = vadd.f32 %v6709_v41, %v8039_v13  ;;  %v8210_v24 = vadd.f32 %v2965_v16, %v2415_v6 }
 0x1b3   : > { %v2299_v44 = vpop.f32.mrf.mxu1  ;;  %v2984_v28 = vpop.f32.mrf.mxu0 }
 0x1b4   : > { %v2416_v54 = vadd.f32 %v2299_v44, %v8042_v58  ;;  %v8213_v48 = vadd.f32 %v6761_v25, %v2418_v21 }
 0x1b5   : > { %v6712_v38 = vpop.f32.mrf.mxu1  ;;  %v6768_v43 = vpop.f32.mrf.mxu0 }
 0x1b6   : > { %v2421_v10 = vadd.f32 %v6712_v38, %v8046_v55  ;;  %v8216_v42 = vadd.f32 %v2968_v60, %v2416_v54 }
 0x1b7   : > { %v2312_v8 = vpop.f32.mrf.mxu1  ;;  %v2997_v2 = vpop.f32.mrf.mxu0 }
 0x1b8   : > { %v2419_v50 = vadd.f32 %v2312_v8, %v8053_v5  ;;  %v8219_v14 = vadd.f32 %v6764_v7, %v2421_v10 }
 0x1b9   : > { %v6713_v13 = vpop.f32.mrf.mxu1  ;;  %v6769_v1 = vpop.f32.mrf.mxu0 }
 0x1ba   : > { %v2422_v45 = vadd.f32 %v6713_v13, %v8062_v22  ;;  %v8222_v16 = vadd.f32 %v2981_v40, %v2419_v50 }
 0x1bb   : > { %v2315_v58 = vpop.f32.mrf.mxu1  ;;  %v3000_v53 = vpop.f32.mrf.mxu0 }
 0x1bc   : > { %v2420_v61 = vadd.f32 %v2315_v58, %v8065_v32  ;;  %v8225_v25 = vadd.f32 %v6765_v63, %v2422_v45 }
 0x1bd   : > { %v6716_v55 = vpop.f32.mrf.mxu1  ;;  %v6772_v39 = vpop.f32.mrf.mxu0 }
 0x1be   : > { %v2425_v34 = vadd.f32 %v6716_v55, %v8069_v19  ;;  %v8228_v3 = vadd.f32 %v2984_v28, %v2420_v61 }
 0x1bf   : > { %v2328_v5 = vpop.f32.mrf.mxu1  ;;  %v3013_v60 = vpop.f32.mrf.mxu0 }
 0x1c0   : > { %v2423_v51 = vadd.f32 %v2328_v5, %v8076_v46  ;;  %v8231_v23 = vadd.f32 %v6768_v43, %v2425_v34 }
 0x1c1   : > { %v6717_v22 = vpop.f32.mrf.mxu1  ;;  %v6773_v7 = vpop.f32.mrf.mxu0 }
 0x1c2   : > { %v2426_v12 = vadd.f32 %v6717_v22, %v8085_v17  ;;  %v8234_v18 = vadd.f32 %v2997_v2, %v2423_v51 }
 0x1c3   : > { %v2331_v32 = vpop.f32.mrf.mxu1  ;;  %v3016_v40 = vpop.f32.mrf.mxu0 }
 0x1c4   : > { %v2424_v6 = vadd.f32 %v2331_v32, %v8088_v37  ;;  %v8237_v41 = vadd.f32 %v6769_v1, %v2426_v12 }
 0x1c5   : > { %v6720_v19 = vpop.f32.mrf.mxu1  ;;  %v6776_v63 = vpop.f32.mrf.mxu0 }
 0x1c6   : > { %v2429_v21 = vadd.f32 %v6720_v19, %v8092_v59  ;;  %v8240_v44 = vadd.f32 %v3000_v53, %v2424_v6 }
 0x1c7   : > { %v2344_v46 = vpop.f32.mrf.mxu1  ;;  %v3029_v28 = vpop.f32.mrf.mxu0 }
 0x1c8   : > { %v2427_v54 = vadd.f32 %v2344_v46, %v8099_v31  ;;  %v8243_v38 = vadd.f32 %v6772_v39, %v2429_v21  ;;  %v8624_v21 = vld [vmem:[#allocation12_spill] sm:$0xff] }
 0x1c9   : > { %v6721_v17 = vpop.f32.mrf.mxu1  ;;  %v6777_v43 = vpop.f32.mrf.mxu0 }
 0x1ca   : > { %v2430_v10 = vadd.f32 %v6721_v17, %v8108_v15  ;;  %v8246_v8 = vadd.f32 %v3013_v60, %v2427_v54  ;;  %v8625_v17 = vld [vmem:[#allocation13_spill] sm:$0xff] }
 0x1cb   : > { %v2347_v37 = vpop.f32.mrf.mxu1  ;;  %v3032_v2 = vpop.f32.mrf.mxu0 }
 0x1cc   : > { %v2428_v50 = vadd.f32 %v2347_v37, %v8111_v47  ;;  %v8249_v13 = vadd.f32 %v6773_v7, %v2430_v10 }
 0x1cd   : > { %v6724_v59 = vpop.f32.mrf.mxu1  ;;  %v6780_v1 = vpop.f32.mrf.mxu0 }
 0x1ce   : > { %v2433_v45 = vadd.f32 %v6724_v59, %v8115_v49  ;;  %v8252_v58 = vadd.f32 %v3016_v40, %v2428_v50 }
 0x1cf   : > { %v2360_v31 = vpop.f32.mrf.mxu1  ;;  %v3045_v53 = vpop.f32.mrf.mxu0 }
 0x1d0   : > { %v2431_v61 = vadd.f32 %v2360_v31, %v8122_v29  ;;  %v8255_v55 = vadd.f32 %v6776_v63, %v2433_v45  ;;  %v8627_v45 = vld [vmem:[#allocation15_spill] sm:$0xff] }
 0x1d1   : > { %v6725_v15 = vpop.f32.mrf.mxu1  ;;  %v6781_v39 = vpop.f32.mrf.mxu0 }
 0x1d2   : > { %v2434_v34 = vadd.f32 %v6725_v15, %v8131_v4  ;;  %v8258_v5 = vadd.f32 %v3029_v28, %v2431_v61 }
 0x1d3   : > { %v2363_v47 = vpop.f32.mrf.mxu1  ;;  %v3048_v60 = vpop.f32.mrf.mxu0 }
 0x1d4   : > { %v2432_v51 = vadd.f32 %v2363_v47, %v8134_v0  ;;  %v8261_v22 = vadd.f32 %v6777_v43, %v2434_v34 }
 0x1d5   : > { %v6728_v49 = vpop.f32.mrf.mxu1  ;;  %v6784_v7 = vpop.f32.mrf.mxu0 }
 0x1d6   : > { %v2437_v12 = vadd.f32 %v6728_v49, %v8138_v56  ;;  %v8264_v32 = vadd.f32 %v3032_v2, %v2432_v51  ;;  %v8626_v2 = vld [vmem:[#allocation14_spill] sm:$0xff] }
 0x1d7   : > { %v2376_v29 = vpop.f32.mrf.mxu1  ;;  %v3061_v40 = vpop.f32.mrf.mxu0 }
 0x1d8   : > { %v2435_v6 = vadd.f32 %v2376_v29, %v8145_v57  ;;  %v8267_v19 = vadd.f32 %v6780_v1, %v2437_v12 }
 0x1d9   : > { %v6729_v4 = vpop.f32.mrf.mxu1  ;;  %v6785_v63 = vpop.f32.mrf.mxu0 }
 0x1da   : > { %v2438_v46 = vadd.f32 %v6729_v4, %v8624_v21  ;;  %v8270_v28 = vadd.f32 %v3045_v53, %v2435_v6 }
 0x1db   : > { %v2379_v0 = vpop.f32.mrf.mxu1  ;;  %v3064_v54 = vpop.f32.mrf.mxu0 }
 0x1dc   : > { %v2436_v43 = vadd.f32 %v2379_v0, %v8625_v17  ;;  %v8273_v10 = vadd.f32 %v6781_v39, %v2438_v46 }
 0x1dd   : > { %v6732_v56 = vpop.f32.mrf.mxu1  ;;  %v6856_v37 = vpop.f32.mrf.mxu0 }
 0x1de   : > { %v2441_v50 = vadd.f32 %v6732_v56, %v8626_v2  ;;  %v8276_v59 = vadd.f32 %v3048_v60, %v2436_v43 }
 0x1df   : > { %v2392_v57 = vpop.f32.mrf.mxu1  ;;  %v4004_v1 = vpop.f32.mrf.mxu0 }
 0x1e0   : > { %v2439_v31 = vadd.f32 %v2392_v57, %v8627_v45  ;;  %v8279_v61 = vadd.f32 %v6784_v7, %v2441_v50 }
 0x1e1   : > { %v6733_v53 = vpop.f32.mrf.mxu1  ;;  %v6857_v15 = vpop.f32.mrf.mxu0 }
 0x1e2   : > { %v2442_v34 = vadd.f32 %v6733_v53, %v8173_v30  ;;  %v8282_v47 = vadd.f32 %v3061_v40, %v2439_v31 }
 0x1e3   : > { %v2395_v39 = vpop.f32.mrf.mxu1  ;;  %v4007_v51 = vpop.f32.mrf.mxu0 }
 0x1e4   : > { %v2440_v49 = vadd.f32 %v2395_v39, %v8176_v27  ;;  %v8285_v12 = vadd.f32 %v6785_v63, %v2442_v34 }
 0x1e5   : > { %v6804_v60 = vpop.f32.mrf.mxu1  ;;  %v6860_v29 = vpop.f32.mrf.mxu0 }
 0x1e6   : > { %v3614_v6 = vadd.f32 %v6804_v60, %v8179_v26  ;;  %v8288_v4 = vadd.f32 %v3064_v54, %v2440_v49 }
 0x1e7   : > { %v3469_v7 = vpop.f32.mrf.mxu1  ;;  %v4020_v21 = vpop.f32.mrf.mxu0 }
 0x1e8   : > { %v3612_v46 = vadd.f32 %v3469_v7, %v8184_v9  ;;  %v8291_v0 = vadd.f32 %v6856_v37, %v3614_v6 }
 0x1e9   : > { %v6805_v30 = vpop.f32.mrf.mxu1  ;;  %v6861_v40 = vpop.f32.mrf.mxu0 }
 0x1ea   : > { %v3615_v17 = vadd.f32 %v6805_v30, %v8188_v52  ;;  %v8294_v43 = vadd.f32 %v4004_v1, %v3612_v46 }
 0x1eb   : > { %v3472_v27 = vpop.f32.mrf.mxu1  ;;  %v4023_v63 = vpop.f32.mrf.mxu0 }
 0x1ec   : > { %v3613_v56 = vadd.f32 %v3472_v27, %v8191_v36  ;;  %v8297_v2 = vadd.f32 %v6857_v15, %v3615_v17 }
 0x1ed   : > { %v6808_v26 = vpop.f32.mrf.mxu1  ;;  %v6864_v54 = vpop.f32.mrf.mxu0 }
 0x1ee   : > { %v3618_v50 = vadd.f32 %v6808_v26, %v8194_v33  ;;  %v8300_v57 = vadd.f32 %v4007_v51, %v3613_v56 }
 0x1ef   : > { %v3485_v9 = vpop.f32.mrf.mxu1  ;;  %v4036_v37 = vpop.f32.mrf.mxu0 }
 0x1f0   : > { %v3616_v45 = vadd.f32 %v3485_v9, %v8198_v62  ;;  %v8303_v31 = vadd.f32 %v6860_v29, %v3618_v50 }
 0x1f1   : > { %v6809_v52 = vpop.f32.mrf.mxu1  ;;  %v6865_v1 = vpop.f32.mrf.mxu0 }
 0x1f2   : > { %v3619_v53 = vadd.f32 %v6809_v52, %v8201_v11  ;;  %v8306_v34 = vadd.f32 %v4020_v21, %v3616_v45 }
 0x1f3   : > { %v3488_v36 = vpop.f32.mrf.mxu1  ;;  %v4039_v15 = vpop.f32.mrf.mxu0 }
 0x1f4   : > { %v3617_v39 = vadd.f32 %v3488_v36, %v8204_v20  ;;  %v8309_v49 = vadd.f32 %v6861_v40, %v3619_v53 }
 0x1f5   : > { %v6812_v33 = vpop.f32.mrf.mxu1  ;;  %v6868_v51 = vpop.f32.mrf.mxu0 }
 0x1f6   : > { %v3622_v60 = vadd.f32 %v6812_v33, %v8207_v35  ;;  %v8312_v6 = vadd.f32 %v4023_v63, %v3617_v39 }
 0x1f7   : > { %v3501_v62 = vpop.f32.mrf.mxu1  ;;  %v4052_v29 = vpop.f32.mrf.mxu0 }
 0x1f8   : > { %v3620_v7 = vadd.f32 %v3501_v62, %v8210_v24  ;;  %v8315_v46 = vadd.f32 %v6864_v54, %v3622_v60 }
 0x1f9   : > { %v6813_v11 = vpop.f32.mrf.mxu1  ;;  %v6869_v21 = vpop.f32.mrf.mxu0 }
 0x1fa   : > { %v3623_v30 = vadd.f32 %v6813_v11, %v8213_v48  ;;  %v8318_v17 = vadd.f32 %v4036_v37, %v3620_v7 }
 0x1fb   : > { %v3504_v20 = vpop.f32.mrf.mxu1  ;;  %v4055_v40 = vpop.f32.mrf.mxu0 }
 0x1fc   : > { %v3621_v27 = vadd.f32 %v3504_v20, %v8216_v42  ;;  %v8321_v56 = vadd.f32 %v6865_v1, %v3623_v30 }
 0x1fd   : > { %v6816_v35 = vpop.f32.mrf.mxu1  ;;  %v6872_v63 = vpop.f32.mrf.mxu0 }
 0x1fe   : > { %v3626_v26 = vadd.f32 %v6816_v35, %v8219_v14  ;;  %v8324_v50 = vadd.f32 %v4039_v15, %v3621_v27 }
 0x1ff   : > { %v3517_v24 = vpop.f32.mrf.mxu1  ;;  %v4068_v54 = vpop.f32.mrf.mxu0 }
 0x200   : > { %v3624_v9 = vadd.f32 %v3517_v24, %v8222_v16  ;;  %v8327_v45 = vadd.f32 %v6868_v51, %v3626_v26 }
 0x201   : > { %v6817_v48 = vpop.f32.mrf.mxu1  ;;  %v6873_v37 = vpop.f32.mrf.mxu0 }
 0x202   : > { %v3627_v52 = vadd.f32 %v6817_v48, %v8225_v25  ;;  %v8330_v53 = vadd.f32 %v4052_v29, %v3624_v9 }
 0x203   : > { %v3520_v42 = vpop.f32.mrf.mxu1  ;;  %v4071_v1 = vpop.f32.mrf.mxu0 }
 0x204   : > { %v3625_v36 = vadd.f32 %v3520_v42, %v8228_v3  ;;  %v8333_v39 = vadd.f32 %v6869_v21, %v3627_v52 }
 0x205   : > { %v6820_v14 = vpop.f32.mrf.mxu1  ;;  %v6876_v15 = vpop.f32.mrf.mxu0 }
 0x206   : > { %v3630_v33 = vadd.f32 %v6820_v14, %v8231_v23  ;;  %v8336_v60 = vadd.f32 %v4055_v40, %v3625_v36 }
 0x207   : > { %v3533_v16 = vpop.f32.mrf.mxu1  ;;  %v4084_v51 = vpop.f32.mrf.mxu0 }
 0x208   : > { %v3628_v62 = vadd.f32 %v3533_v16, %v8234_v18  ;;  %v8339_v7 = vadd.f32 %v6872_v63, %v3630_v33 }
 0x209   : > { %v6821_v25 = vpop.f32.mrf.mxu1  ;;  %v6877_v29 = vpop.f32.mrf.mxu0 }
 0x20a   : > { %v3631_v11 = vadd.f32 %v6821_v25, %v8237_v41  ;;  %v8342_v30 = vadd.f32 %v4068_v54, %v3628_v62 }
 0x20b   : > { %v3536_v3 = vpop.f32.mrf.mxu1  ;;  %v4087_v21 = vpop.f32.mrf.mxu0 }
 0x20c   : > { %v3629_v20 = vadd.f32 %v3536_v3, %v8240_v44  ;;  %v8345_v27 = vadd.f32 %v6873_v37, %v3631_v11 }
 0x20d   : > { %v6824_v23 = vpop.f32.mrf.mxu1  ;;  %v6880_v40 = vpop.f32.mrf.mxu0 }
 0x20e   : > { %v3634_v35 = vadd.f32 %v6824_v23, %v8243_v38  ;;  %v8348_v26 = vadd.f32 %v4071_v1, %v3629_v20 }
 0x20f   : > { %v3549_v18 = vpop.f32.mrf.mxu1  ;;  %v4100_v63 = vpop.f32.mrf.mxu0 }
 0x210   : > { %v3632_v24 = vadd.f32 %v3549_v18, %v8246_v8  ;;  %v8351_v9 = vadd.f32 %v6876_v15, %v3634_v35 }
 0x211   : > { %v6825_v41 = vpop.f32.mrf.mxu1  ;;  %v6881_v54 = vpop.f32.mrf.mxu0 }
 0x212   : > { %v3635_v48 = vadd.f32 %v6825_v41, %v8249_v13  ;;  %v8354_v52 = vadd.f32 %v4084_v51, %v3632_v24 }
 0x213   : > { %v3552_v44 = vpop.f32.mrf.mxu1  ;;  %v4103_v37 = vpop.f32.mrf.mxu0 }
 0x214   : > { %v3633_v42 = vadd.f32 %v3552_v44, %v8252_v58  ;;  %v8357_v36 = vadd.f32 %v6877_v29, %v3635_v48 }
 0x215   : > { %v6828_v38 = vpop.f32.mrf.mxu1  ;;  %v6884_v1 = vpop.f32.mrf.mxu0 }
 0x216   : > { %v3638_v14 = vadd.f32 %v6828_v38, %v8255_v55  ;;  %v8360_v33 = vadd.f32 %v4087_v21, %v3633_v42 }
 0x217   : > { %v3565_v8 = vpop.f32.mrf.mxu1  ;;  %v4116_v15 = vpop.f32.mrf.mxu0 }
 0x218   : > { %v3636_v16 = vadd.f32 %v3565_v8, %v8258_v5  ;;  %v8363_v62 = vadd.f32 %v6880_v40, %v3638_v14 }
 0x219   : > { %v6829_v13 = vpop.f32.mrf.mxu1  ;;  %v6885_v51 = vpop.f32.mrf.mxu0 }
 0x21a   : > { %v3639_v25 = vadd.f32 %v6829_v13, %v8261_v22  ;;  %v8366_v11 = vadd.f32 %v4100_v63, %v3636_v16 }
 0x21b   : > { %v3568_v58 = vpop.f32.mrf.mxu1  ;;  %v4119_v29 = vpop.f32.mrf.mxu0 }
 0x21c   : > { %v3637_v3 = vadd.f32 %v3568_v58, %v8264_v32  ;;  %v8369_v20 = vadd.f32 %v6881_v54, %v3639_v25 }
 0x21d   : > { %v6832_v55 = vpop.f32.mrf.mxu1  ;;  %v6888_v21 = vpop.f32.mrf.mxu0 }
 0x21e   : > { %v3642_v23 = vadd.f32 %v6832_v55, %v8267_v19  ;;  %v8372_v35 = vadd.f32 %v4103_v37, %v3637_v3 }
 0x21f   : > { %v3581_v5 = vpop.f32.mrf.mxu1  ;;  %v4132_v40 = vpop.f32.mrf.mxu0 }
 0x220   : > { %v3640_v18 = vadd.f32 %v3581_v5, %v8270_v28  ;;  %v8375_v24 = vadd.f32 %v6884_v1, %v3642_v23 }
 0x221   : > { %v6833_v22 = vpop.f32.mrf.mxu1  ;;  %v6889_v63 = vpop.f32.mrf.mxu0 }
 0x222   : > { %v3643_v41 = vadd.f32 %v6833_v22, %v8273_v10  ;;  %v8378_v48 = vadd.f32 %v4116_v15, %v3640_v18 }
 0x223   : > { %v3584_v32 = vpop.f32.mrf.mxu1  ;;  %v4135_v54 = vpop.f32.mrf.mxu0 }
 0x224   : > { %v3641_v44 = vadd.f32 %v3584_v32, %v8276_v59  ;;  %v8381_v42 = vadd.f32 %v6885_v51, %v3643_v41 }
 0x225   : > { %v6836_v19 = vpop.f32.mrf.mxu1  ;;  %v6960_v37 = vpop.f32.mrf.mxu0 }
 0x226   : > { %v3646_v38 = vadd.f32 %v6836_v19, %v8279_v61  ;;  %v8384_v14 = vadd.f32 %v4119_v29, %v3641_v44 }
 0x227   : > { %v3597_v28 = vpop.f32.mrf.mxu1  ;;  %v5209_v1 = vpop.f32.mrf.mxu0 }
 0x228   : > { %v3644_v8 = vadd.f32 %v3597_v28, %v8282_v47  ;;  %v8387_v16 = vadd.f32 %v6888_v21, %v3646_v38  ;;  %v8401_v47 = vld [vmem:[%s8588_s2] ss:$0 sm:$0xff] }
 0x229   : > { %v6837_v10 = vpop.f32.mrf.mxu1  ;;  %v6961_v15 = vpop.f32.mrf.mxu0 }
 0x22a   : > { %v3647_v13 = vadd.f32 %v6837_v10, %v8285_v12  ;;  %v8390_v25 = vadd.f32 %v4132_v40, %v3644_v8 }
 0x22b   : > { %v3600_v59 = vpop.f32.mrf.mxu1  ;;  %v5212_v51 = vpop.f32.mrf.mxu0 }
 0x22c   : > { %v3645_v58 = vadd.f32 %v3600_v59, %v8288_v4  ;;  %v8393_v3 = vadd.f32 %v6889_v63, %v3647_v13 }
 0x22d   : > { %v6908_v61 = vpop.f32.mrf.mxu1  ;;  %v6964_v29 = vpop.f32.mrf.mxu0 }
 0x22e   : > { %v4818_v55 = vadd.f32 %v6908_v61, %v8291_v0  ;;  %v8396_v23 = vadd.f32 %v4135_v54, %v3645_v58  ;;  %v8408_v0 = vld [vmem:[%s8589_s3] ss:$0 sm:$0xff] }
 0x22f   : > { %v4673_v12 = vpop.f32.mrf.mxu1  ;;  %v5225_v21 = vpop.f32.mrf.mxu0 }
 0x230   : > { %v5354_v5 = vadd.f32 %v6960_v37, %v4818_v55  ;;  %v4816_v40 = vadd.f32 %v4673_v12, %v8294_v43 }
 0x231   : > { %v6909_v18 = vpop.f32.mrf.mxu1  ;;  %v6965_v4 = vpop.f32.mrf.mxu0 }
 0x232   : > { %v5469_v22 = vmul.f32 %v8401_v47, %v5354_v5  ;;  %v5352_v63 = vadd.f32 %v5209_v1, %v4816_v40  ;;  %v4819_v41 = vadd.f32 %v6909_v18, %v8297_v2 }
 0x233   : > { %v4676_v32 = vpop.f32.mrf.mxu1  ;;  %v5228_v54 = vpop.f32.mrf.mxu0 }
 0x234   : > { %v5467_v44 = vmul.f32 %v8401_v47, %v5352_v63  ;;  %v5355_v19 = vadd.f32 %v6961_v15, %v4819_v41  ;;  %v4817_v43 = vadd.f32 %v4676_v32, %v8300_v57  ;;  %v5512_v37 = vadd.f32 %v8408_v0, %v5469_v22 }
 0x235   : > { %v6912_v38 = vpop.f32.mrf.mxu1  ;;  %v6968_v28 = vpop.f32.mrf.mxu0 }
 0x236   : > { %v5470_v8 = vmul.f32 %v8401_v47, %v5355_v19  ;;  %v5353_v10 = vadd.f32 %v5212_v51, %v4817_v43  ;;  %v4822_v13 = vadd.f32 %v6912_v38, %v8303_v31  ;;  %v5510_v2 = vadd.f32 %v8408_v0, %v5467_v44 }
 0x237   : > { %v4689_v1 = vpop.f32.mrf.mxu1  ;;  %v5241_v59 = vpop.f32.mrf.mxu0  ;;  %v5548_v61 = vmax.f32 %v5512_v37, 0.0 }
 0x238   : > { %v5513_v58 = vadd.f32 %v8408_v0, %v5470_v8  ;;  %v5468_v15 = vmul.f32 %v8401_v47, %v5353_v10  ;;  %v4820_v57 = vadd.f32 %v4689_v1, %v8306_v34  ;;  %v5358_v55 = vadd.f32 %v6964_v29, %v4822_v13 }
 0x239   : > { %v6913_v12 = vpop.f32.mrf.mxu1  ;;  %v6969_v5 = vpop.f32.mrf.mxu0  ;;  %v5546_v32 = vmax.f32 %v5510_v2, 0.0 }
 0x23a   : > { %v5549_v40 = vmax.f32 %v5513_v58, 0.0  ;;  %v5511_v51 = vadd.f32 %v8408_v0, %v5468_v15  ;;  %v5356_v18 = vadd.f32 %v5225_v21, %v4820_v57  ;;  %v4823_v31 = vadd.f32 %v6913_v12, %v8309_v49 }
 0x23b   : > { %v5473_v22 = vmul.f32 %v8401_v47, %v5358_v55  ;;  %v4692_v63 = vpop.f32.mrf.mxu1  ;;  %v5244_v41 = vpop.f32.mrf.mxu0 }
 0x23c   : > { %v6193_v44 = vpack.c.bf16 %v5549_v40, %v5548_v61  ;;  %v5547_v19 = vmax.f32 %v5511_v51, 0.0  ;;  %v5359_v43 = vadd.f32 %v6965_v4, %v4823_v31  ;;  %v5471_v29 = vmul.f32 %v8401_v47, %v5356_v18 }
 0x23d   : > { %v5516_v34 = vadd.f32 %v8408_v0, %v5473_v22  ;;  %v4821_v37 = vadd.f32 %v4692_v63, %v8312_v6  ;;  %v6916_v38 = vpop.f32.mrf.mxu1  ;;  %v6972_v8 = vpop.f32.mrf.mxu0 }
 0x23e   : > { %6275 = vst [vmem:[%s8427_s25 + $0x8] sm:$0xff] %v6193_v44   ;;  %v6188_v49 = vpack.c.bf16 %v5547_v19, %v5546_v32  ;;  %v5474_v21 = vmul.f32 %v8401_v47, %v5359_v43  ;;  %v4826_v10 = vadd.f32 %v6916_v38, %v8315_v46  ;;  %v5514_v57 = vadd.f32 %v8408_v0, %v5471_v29 }
 0x23f   : > { %v5357_v13 = vadd.f32 %v5228_v54, %v4821_v37  ;;  %v4705_v4 = vpop.f32.mrf.mxu1  ;;  %v5257_v1 = vpop.f32.mrf.mxu0  ;;  %v5552_v15 = vmax.f32 %v5516_v34, 0.0 }
 0x240   : > { %6189 = vst [vmem:[%s8427_s25] sm:$0xff] %v6188_v49   ;;  %v5517_v2 = vadd.f32 %v8408_v0, %v5474_v21  ;;  %v5362_v58 = vadd.f32 %v6968_v28, %v4826_v10  ;;  %v4824_v6 = vadd.f32 %v4705_v4, %v8318_v17  ;;  %v5550_v32 = vmax.f32 %v5514_v57, 0.0 }
 0x241   : > { %v5472_v61 = vmul.f32 %v8401_v47, %v5357_v13  ;;  %v6917_v55 = vpop.f32.mrf.mxu1  ;;  %v6973_v12 = vpop.f32.mrf.mxu0 }
 0x242   : > { %v5553_v40 = vmax.f32 %v5517_v2, 0.0  ;;  %v5477_v46 = vmul.f32 %v8401_v47, %v5362_v58  ;;  %v5360_v54 = vadd.f32 %v5241_v59, %v4824_v6  ;;  %v4827_v51 = vadd.f32 %v6917_v55, %v8321_v56 }
 0x243   : > { %v5515_v18 = vadd.f32 %v8408_v0, %v5472_v61  ;;  %v4708_v31 = vpop.f32.mrf.mxu1  ;;  %v5260_v28 = vpop.f32.mrf.mxu0 }
 0x244   : > { %v6203_v22 = vpack.c.bf16 %v5553_v40, %v5552_v15  ;;  %v5475_v17 = vmul.f32 %v8401_v47, %v5360_v54  ;;  %v5363_v63 = vadd.f32 %v6969_v5, %v4827_v51  ;;  %v5520_v19 = vadd.f32 %v8408_v0, %v5477_v46 }
 0x245   : > { %v5551_v44 = vmax.f32 %v5515_v18, 0.0  ;;  %v4825_v43 = vadd.f32 %v4708_v31, %v8324_v50  ;;  %v6920_v34 = vpop.f32.mrf.mxu1  ;;  %v6976_v29 = vpop.f32.mrf.mxu0 }
 0x246   : > { %6277 = vst [vmem:[%s8427_s25 + $0x18] sm:$0xff] %v6203_v22   ;;  %v5478_v56 = vmul.f32 %v8401_v47, %v5363_v63  ;;  %v4830_v59 = vadd.f32 %v6920_v34, %v8327_v45  ;;  %v5518_v5 = vadd.f32 %v8408_v0, %v5475_v17  ;;  %v5556_v50 = vmax.f32 %v5520_v19, 0.0 }
 0x247   : > { %v6198_v37 = vpack.c.bf16 %v5551_v44, %v5550_v32  ;;  %v5361_v38 = vadd.f32 %v5244_v41, %v4825_v43  ;;  %v4721_v49 = vpop.f32.mrf.mxu1  ;;  %v5273_v21 = vpop.f32.mrf.mxu0 }
 0x248   : > { %v5521_v10 = vadd.f32 %v8408_v0, %v5478_v56  ;;  %v5366_v13 = vadd.f32 %v6972_v8, %v4830_v59  ;;  %v4828_v4 = vadd.f32 %v4721_v49, %v8330_v53  ;;  %v5554_v8 = vmax.f32 %v5518_v5, 0.0 }
 0x249   : > { %6276 = vst [vmem:[%s8427_s25 + $0x10] sm:$0xff] %v6198_v37   ;;  %v5476_v2 = vmul.f32 %v8401_v47, %v5361_v38  ;;  %v6921_v58 = vpop.f32.mrf.mxu1  ;;  %v6977_v6 = vpop.f32.mrf.mxu0 }
 0x24a   : > { %v5557_v15 = vmax.f32 %v5521_v10, 0.0  ;;  %v5481_v45 = vmul.f32 %v8401_v47, %v5366_v13  ;;  %v5364_v41 = vadd.f32 %v5257_v1, %v4828_v4  ;;  %v4831_v57 = vadd.f32 %v6921_v58, %v8333_v39 }
 0x24b   : > { %v5519_v61 = vadd.f32 %v8408_v0, %v5476_v2  ;;  %v4724_v55 = vpop.f32.mrf.mxu1  ;;  %v5276_v40 = vpop.f32.mrf.mxu0 }
 0x24c   : > { %v6213_v46 = vpack.c.bf16 %v5557_v15, %v5556_v50  ;;  %v5367_v53 = vadd.f32 %v6973_v12, %v4831_v57  ;;  %v5524_v51 = vadd.f32 %v8408_v0, %v5481_v45  ;;  %v5479_v18 = vmul.f32 %v8401_v47, %v5364_v41 }
 0x24d   : > { %v5555_v54 = vmax.f32 %v5519_v61, 0.0  ;;  %v4829_v31 = vadd.f32 %v4724_v55, %v8336_v60  ;;  %v6924_v22 = vpop.f32.mrf.mxu1  ;;  %v6980_v17 = vpop.f32.mrf.mxu0 }
 0x24e   : > { %6279 = vst [vmem:[%s8427_s25 + $0x28] sm:$0xff] %v6213_v46   ;;  %v5482_v39 = vmul.f32 %v8401_v47, %v5367_v53  ;;  %v4834_v1 = vadd.f32 %v6924_v22, %v8339_v7  ;;  %v5560_v56 = vmax.f32 %v5524_v51, 0.0  ;;  %v5522_v60 = vadd.f32 %v8408_v0, %v5479_v18 }
 0x24f   : > { %v6208_v63 = vpack.c.bf16 %v5555_v54, %v5554_v8  ;;  %v5365_v32 = vadd.f32 %v5260_v28, %v4829_v31  ;;  %v4737_v44 = vpop.f32.mrf.mxu1  ;;  %v5289_v19 = vpop.f32.mrf.mxu0 }
 0x250   : > { %v5525_v12 = vadd.f32 %v8408_v0, %v5482_v39  ;;  %v5370_v43 = vadd.f32 %v6976_v29, %v4834_v1  ;;  %v4832_v34 = vadd.f32 %v4737_v44, %v8342_v30  ;;  %v5558_v2 = vmax.f32 %v5522_v60, 0.0 }
 0x251   : > { %6278 = vst [vmem:[%s8427_s25 + $0x20] sm:$0xff] %v6208_v63   ;;  %v5480_v59 = vmul.f32 %v8401_v47, %v5365_v32  ;;  %v6925_v37 = vpop.f32.mrf.mxu1  ;;  %v6981_v38 = vpop.f32.mrf.mxu0 }
 0x252   : > { %v5561_v49 = vmax.f32 %v5525_v12, 0.0  ;;  %v5485_v7 = vmul.f32 %v8401_v47, %v5370_v43  ;;  %v5368_v28 = vadd.f32 %v5273_v21, %v4832_v34  ;;  %v4835_v5 = vadd.f32 %v6925_v37, %v8345_v27 }
 0x253   : > { %v5523_v10 = vadd.f32 %v8408_v0, %v5480_v59  ;;  %v4740_v29 = vpop.f32.mrf.mxu1  ;;  %v5292_v13 = vpop.f32.mrf.mxu0 }
 0x254   : > { %v6223_v30 = vpack.c.bf16 %v5561_v49, %v5560_v56  ;;  %v5483_v4 = vmul.f32 %v8401_v47, %v5368_v28  ;;  %v5371_v50 = vadd.f32 %v6977_v6, %v4835_v5  ;;  %v5528_v15 = vadd.f32 %v8408_v0, %v5485_v7 }
 0x255   : > { %v5559_v58 = vmax.f32 %v5523_v10, 0.0  ;;  %v4833_v45 = vadd.f32 %v4740_v29, %v8348_v26  ;;  %v6928_v41 = vpop.f32.mrf.mxu1  ;;  %v6984_v57 = vpop.f32.mrf.mxu0 }
 0x256   : > { %6281 = vst [vmem:[%s8427_s25 + $0x38] sm:$0xff] %v6223_v30   ;;  %v5486_v27 = vmul.f32 %v8401_v47, %v5371_v50  ;;  %v4838_v21 = vadd.f32 %v6928_v41, %v8351_v9  ;;  %v5526_v6 = vadd.f32 %v8408_v0, %v5483_v4  ;;  %v5564_v26 = vmax.f32 %v5528_v15, 0.0 }
 0x257   : > { %v6218_v61 = vpack.c.bf16 %v5559_v58, %v5558_v2  ;;  %v5369_v55 = vadd.f32 %v5276_v40, %v4833_v45  ;;  %v4753_v8 = vpop.f32.mrf.mxu1  ;;  %v5305_v46 = vpop.f32.mrf.mxu0 }
 0x258   : > { %v5529_v53 = vadd.f32 %v8408_v0, %v5486_v27  ;;  %v5374_v54 = vadd.f32 %v6980_v17, %v4838_v21  ;;  %v4836_v51 = vadd.f32 %v4753_v8, %v8354_v52  ;;  %v5562_v17 = vmax.f32 %v5526_v6, 0.0 }
 0x259   : > { %6280 = vst [vmem:[%s8427_s25 + $0x30] sm:$0xff] %v6218_v61   ;;  %v5484_v18 = vmul.f32 %v8401_v47, %v5369_v55  ;;  %v6929_v31 = vpop.f32.mrf.mxu1  ;;  %v6985_v22 = vpop.f32.mrf.mxu0 }
 0x25a   : > { %v5565_v39 = vmax.f32 %v5529_v53, 0.0  ;;  %v5489_v9 = vmul.f32 %v8401_v47, %v5374_v54  ;;  %v5372_v40 = vadd.f32 %v5289_v19, %v4836_v51  ;;  %v4839_v1 = vadd.f32 %v6929_v31, %v8357_v36 }
 0x25b   : > { %v5527_v63 = vadd.f32 %v8408_v0, %v5484_v18  ;;  %v4756_v32 = vpop.f32.mrf.mxu1  ;;  %v5308_v44 = vpop.f32.mrf.mxu0 }
 0x25c   : > { %v6233_v12 = vpack.c.bf16 %v5565_v39, %v5564_v26  ;;  %v5375_v52 = vadd.f32 %v6981_v38, %v4839_v1  ;;  %v5532_v34 = vadd.f32 %v8408_v0, %v5489_v9  ;;  %v5487_v56 = vmul.f32 %v8401_v47, %v5372_v40 }
 0x25d   : > { %v5563_v43 = vmax.f32 %v5527_v63, 0.0  ;;  %v4837_v60 = vadd.f32 %v4756_v32, %v8360_v33  ;;  %v6932_v59 = vpop.f32.mrf.mxu1  ;;  %v6988_v37 = vpop.f32.mrf.mxu0 }
 0x25e   : > { %6283 = vst [vmem:[%s8427_s25 + $0x48] sm:$0xff] %v6233_v12   ;;  %v5490_v36 = vmul.f32 %v8401_v47, %v5375_v52  ;;  %v4842_v19 = vadd.f32 %v6932_v59, %v8363_v62  ;;  %v5568_v30 = vmax.f32 %v5532_v34, 0.0  ;;  %v5530_v33 = vadd.f32 %v8408_v0, %v5487_v56 }
 0x25f   : > { %v6228_v49 = vpack.c.bf16 %v5563_v43, %v5562_v17  ;;  %v5373_v7 = vadd.f32 %v5292_v13, %v4837_v60  ;;  %v4769_v28 = vpop.f32.mrf.mxu1  ;;  %v5321_v5 = vpop.f32.mrf.mxu0 }
 0x260   : > { %v5533_v38 = vadd.f32 %v8408_v0, %v5490_v36  ;;  %v5378_v10 = vadd.f32 %v6984_v57, %v4842_v19  ;;  %v4840_v29 = vadd.f32 %v4769_v28, %v8366_v11  ;;  %v5566_v21 = vmax.f32 %v5530_v33, 0.0 }
 0x261   : > { %6282 = vst [vmem:[%s8427_s25 + $0x40] sm:$0xff] %v6228_v49   ;;  %v5488_v4 = vmul.f32 %v8401_v47, %v5373_v7  ;;  %v6933_v50 = vpop.f32.mrf.mxu1  ;;  %v6989_v15 = vpop.f32.mrf.mxu0 }
 0x262   : > { %v5569_v2 = vmax.f32 %v5533_v38, 0.0  ;;  %v5493_v62 = vmul.f32 %v8401_v47, %v5378_v10  ;;  %v5376_v58 = vadd.f32 %v5305_v46, %v4840_v29  ;;  %v4843_v13 = vadd.f32 %v6933_v50, %v8369_v20 }
 0x263   : > { %v5531_v45 = vadd.f32 %v8408_v0, %v5488_v4  ;;  %v4772_v41 = vpop.f32.mrf.mxu1  ;;  %v5324_v53 = vpop.f32.mrf.mxu0 }
 0x264   : > { %v6243_v57 = vpack.c.bf16 %v5569_v2, %v5568_v30  ;;  %v5491_v11 = vmul.f32 %v8401_v47, %v5376_v58  ;;  %v5379_v27 = vadd.f32 %v6985_v22, %v4843_v13  ;;  %v5536_v55 = vadd.f32 %v8408_v0, %v5493_v62 }
 0x265   : > { %v5567_v61 = vmax.f32 %v5531_v45, 0.0  ;;  %v4841_v8 = vadd.f32 %v4772_v41, %v8372_v35  ;;  %v6936_v6 = vpop.f32.mrf.mxu1 }
 0x266   : > { %6285 = vst [vmem:[%s8427_s25 + $0x58] sm:$0xff] %v6243_v57   ;;  %v5494_v46 = vmul.f32 %v8401_v47, %v5379_v27  ;;  %v4846_v20 = vadd.f32 %v6936_v6, %v8375_v24  ;;  %v5534_v18 = vadd.f32 %v8408_v0, %v5491_v11  ;;  %v5572_v9 = vmax.f32 %v5536_v55, 0.0 }
 0x267   : > { %v6238_v54 = vpack.c.bf16 %v5567_v61, %v5566_v21  ;;  %v5377_v51 = vadd.f32 %v5308_v44, %v4841_v8  ;;  %v4785_v26 = vpop.f32.mrf.mxu1  ;;  %v6992_v44 = vpop.f32.mrf.mxu0 }
 0x268   : > { %v5537_v31 = vadd.f32 %v8408_v0, %v5494_v46  ;;  %v5382_v22 = vadd.f32 %v6988_v37, %v4846_v20  ;;  %v4844_v39 = vadd.f32 %v4785_v26, %v8378_v48  ;;  %v5570_v52 = vmax.f32 %v5534_v18, 0.0 }
 0x269   : > { %6284 = vst [vmem:[%s8427_s25 + $0x50] sm:$0xff] %v6238_v54   ;;  %v5492_v35 = vmul.f32 %v8401_v47, %v5377_v51  ;;  %v6937_v40 = vpop.f32.mrf.mxu1 }
 0x26a   : > { %v5573_v1 = vmax.f32 %v5537_v31, 0.0  ;;  %v5497_v24 = vmul.f32 %v8401_v47, %v5382_v22  ;;  %v5380_v63 = vadd.f32 %v5321_v5, %v4844_v39  ;;  %v4847_v32 = vadd.f32 %v6937_v40, %v8381_v42  ;;  %v5337_v42 = vpop.f32.mrf.mxu0 }
 0x26b   : > { %v5535_v17 = vadd.f32 %v8408_v0, %v5492_v35  ;;  %v4788_v12 = vpop.f32.mrf.mxu1 }
 0x26c   : > { %v6253_v43 = vpack.c.bf16 %v5573_v1, %v5572_v9  ;;  %v5383_v34 = vadd.f32 %v6989_v15, %v4847_v32  ;;  %v5540_v56 = vadd.f32 %v8408_v0, %v5497_v24  ;;  %v5495_v60 = vmul.f32 %v8401_v47, %v5380_v63 }
 0x26d   : > { %v5571_v48 = vmax.f32 %v5535_v17, 0.0  ;;  %v4845_v59 = vadd.f32 %v4788_v12, %v8384_v14  ;;  %v6940_v37 = vpop.f32.mrf.mxu1 }
 0x26e   : > { %6287 = vst [vmem:[%s8427_s25 + $0x68] sm:$0xff] %v6253_v43   ;;  %v5498_v36 = vmul.f32 %v8401_v47, %v5383_v34  ;;  %v4850_v19 = vadd.f32 %v6940_v37, %v8387_v16  ;;  %v5576_v29 = vmax.f32 %v5540_v56, 0.0  ;;  %v5538_v30 = vadd.f32 %v8408_v0, %v5495_v60  ;;  %v6993_v16 = vpop.f32.mrf.mxu0 }
 0x26f   : > { %v6248_v49 = vpack.c.bf16 %v5571_v48, %v5570_v52  ;;  %v5381_v7 = vadd.f32 %v5324_v53, %v4845_v59  ;;  %v4801_v28 = vpop.f32.mrf.mxu1 }
 0x270   : > { %v5541_v5 = vadd.f32 %v8408_v0, %v5498_v36  ;;  %v5386_v38 = vadd.f32 %v6992_v44, %v4850_v19  ;;  %v4848_v10 = vadd.f32 %v4801_v28, %v8390_v25  ;;  %v5574_v45 = vmax.f32 %v5538_v30, 0.0  ;;  %v5340_v21 = vpop.f32.mrf.mxu0 }
 0x271   : > { %6286 = vst [vmem:[%s8427_s25 + $0x60] sm:$0xff] %v6248_v49   ;;  %v5496_v14 = vmul.f32 %v8401_v47, %v5381_v7  ;;  %v6941_v33 = vpop.f32.mrf.mxu1 }
 0x272   : > { %v5577_v4 = vmax.f32 %v5541_v5, 0.0  ;;  %v5501_v50 = vmul.f32 %v8401_v47, %v5386_v38  ;;  %v5384_v2 = vadd.f32 %v5337_v42, %v4848_v10  ;;  %v4851_v62 = vadd.f32 %v6941_v33, %v8393_v3 }
 0x273   : > { %v5539_v58 = vadd.f32 %v8408_v0, %v5496_v14  ;;  %v4804_v13 = vpop.f32.mrf.mxu1 }
 0x274   : > { %v6263_v25 = vpack.c.bf16 %v5577_v4, %v5576_v29  ;;  %v5387_v15 = vadd.f32 %v6993_v16, %v4851_v62  ;;  %v5499_v57 = vmul.f32 %v8401_v47, %v5384_v2  ;;  %v4849_v11 = vadd.f32 %v4804_v13, %v8396_v23 }
 0x275   : > { %v5575_v41 = vmax.f32 %v5539_v58, 0.0  ;;  %v5544_v27 = vadd.f32 %v8408_v0, %v5501_v50 }
 0x276   : > { %6289 = vst [vmem:[%s8427_s25 + $0x78] sm:$0xff] %v6263_v25   ;;  %v5502_v3 = vmul.f32 %v8401_v47, %v5387_v15  ;;  %v5385_v55 = vadd.f32 %v5340_v21, %v4849_v11  ;;  %v5542_v6 = vadd.f32 %v8408_v0, %v5499_v57 }
 0x277   : > { %v6258_v61 = vpack.c.bf16 %v5575_v41, %v5574_v45  ;;  %v5580_v20 = vmax.f32 %v5544_v27, 0.0 }
 0x278   : > { %v5545_v8 = vadd.f32 %v8408_v0, %v5502_v3  ;;  %v5500_v46 = vmul.f32 %v8401_v47, %v5385_v55  ;;  %v5578_v51 = vmax.f32 %v5542_v6, 0.0 }
 0x279   : > { %6288 = vst [vmem:[%s8427_s25 + $0x70] sm:$0xff] %v6258_v61  }
 0x27a   : > { %v5581_v23 = vmax.f32 %v5545_v8, 0.0  ;;  %v5543_v53 = vadd.f32 %v8408_v0, %v5500_v46 }
 0x27c   : > { %v6273_v54 = vpack.c.bf16 %v5581_v23, %v5580_v20  ;;  %v5579_v26 = vmax.f32 %v5543_v53, 0.0 }
 0x27e   : > { %6291 = vst [vmem:[%s8427_s25 + $0x88] sm:$0xff] %v6273_v54   ;;  %v6268_v47 = vpack.c.bf16 %v5579_v26, %v5578_v51 }
 0x280   : > { %6290 = vst [vmem:[%s8427_s25 + $0x80] sm:$0xff] %v6268_v47  }
 0x281   : > { %7385 = shalt.err (!%p7382_p0)
}
 0x282   : > { %s7386_s20 = scalar_lea.hbm %s8540_s13, 2304  ;;  %s7390_s5 = scalar_lea.hbm %s8590_s4, 4608 }
 0x283   : > { %p7387_p11 = scmp.ne.s32.totalorder %s8540_s13, %s7386_s20  ;;  %p7391_p4 = scmp.lt.s32.totalorder %s8540_s13, %s8590_s4 }
 0x284   : > { %p7392_p6 = scmp.lt.s32.totalorder %s7390_s5, %s7386_s20 }
 0x285   : > { %p7388_p2 = pnand %p7387_p11, %p8628_p5 }
 0x286   : > { %p7393_p8 = por %p7392_p6, %p7391_p4 }
 0x287   : > { %p7389_p1 = pneg %p7388_p2 }
 0x289   : > { %p7394_p3 = pnand %p7393_p8, %p7389_p1 }
 0x28b   : > { %7397 = shalt.err (!%p7394_p3)
}
 0x28c   : > { %s7447_s25 = smov 64   ;;  %s7448_s28 = smov 4  }
 0x28d   : > { %7021 = dma.vmem_to_hbm [thread:$0]  (%p8628_p5), %s8542_s29, 2304, %s8540_s13, %s5763_s19, %s7447_s25, %s7447_s25, %s7448_s28  }
 0x28e PF: > { %s5791_s24 = sand.u32 1, %s7428_s15   ;;  %p8629_p7 = scmp.ne.s32.totalorder %s8596_s22, 0 }
 0x28f   : > { %p8630_p9 = scmp.ge.s32.totalorder %s7440_s18, 2  ;;  %s5792_s11 = scalar_lea.sflag [#allocation5], %s5791_s24 }
 0x291   : > { %p7032_p10 = pnand %p8630_p9, %p8629_p7 }
 0x293   : > { %p7033_p12 = pneg %p7032_p10 }
 0x295   : > { %7423 = dma.done.wait (%p7033_p12), %s5792_s11, 2304  }
 0x296   : > { %7425 = vsyncadd (%p7033_p12), %s5792_s11, 4294964992  ;;  %p18_p13 = scmp.ge.s32.totalorder %s7528_s27, 4   ;;  %s8631_s15 = smov %s7432_s16 }
 0x297   : > { %s8632_s16 = smov %s7436_s17  ;;  %s8633_s17 = smov %s7548_s9 }
 0x298   : > { %s8634_s18 = smov %s7528_s27  ;;  %20 = sbr.rel (!%p18_p13) target bundleno = 6 (0x6), region = 93 }
 0x29d   :  { %5797 = vsyncpa [#allocation4], 1 }
 0x29e   :  { %5799 = vsyncpa [#allocation4 + $0x1], 1 }
 0x29f   :  { %5800 = vsyncpa [#allocation7], 1 }
 0x2a0   :  { %5801 = vsyncpa [#allocation5], 1 }
 0x2a1   :  { %5803 = vsyncpa [#allocation5 + $0x1], 1 }

</bundles_post_ra>
